<compile_context>
chip_gen: v7x
topology: tpu7x:2x2x1
jax: 0.10.0
libtpu: 0.0.40
codegen_flags: <defaults>
</compile_context>

<pallas_src>
import functools
import math
from typing import NamedTuple

import jax
import jax.numpy as jnp
import numpy as np
from jax.experimental import pallas as pl
from jax.experimental.pallas import tpu as pltpu


# ----------------------------------------------------------------------------
# Static geometry
# ----------------------------------------------------------------------------
class KDims(NamedTuple):
    Wp1: int   # conv1 padded-frame width (row stride for tap offsets)
    Wp2: int   # conv2 padded-frame width


def _geometry(H, W):
    Ho1, Wo1 = H - 2, W - 2                  # conv1 out (k=5, pad=1)
    Hq1, Wq1 = Ho1 // 2 + 1, Wo1 // 2 + 1    # pool1 out (k=2, s=2, pad=1)
    Hp2, Wp2 = Hq1 + 2, Wq1 + 2              # conv2 padded input frame
    Ho2, Wo2 = Hp2 - 4, Wp2 - 4              # conv2 out
    Hq2, Wq2 = Ho2 // 2 + 1, Wo2 // 2 + 1    # pool2 out
    return dict(
        Hp1=H + 2, Wp1=W + 2, Ho1=Ho1, Wo1=Wo1, Hq1=Hq1, Wq1=Wq1,
        Hp2=Hp2, Wp2=Wp2, Ho2=Ho2, Wo2=Wo2, Hq2=Hq2, Wq2=Wq2,
        F1=(H + 2) * (W + 2), F2=Hp2 * Wp2,
        R1=(Ho1 - 1) * (W + 2) + Wo1, R2=(Ho2 - 1) * Wp2 + Wo2,
        S2=Hq2 * Wq2,
    )


# ----------------------------------------------------------------------------
# The single fused Pallas kernel (one grid step == one batch element)
# ----------------------------------------------------------------------------
def _two_cnn_kernel(x_ref, w1_ref, b1_ref, p1_ref, w2_ref, b2_ref, p2_ref,
                    wf1_ref, bf1_ref, wf2_ref, bf2_ref, out_ref, *, d):
    f32 = jnp.float32
    mxu = w1_ref.dtype
    R1 = p1_ref.shape[1]          # valid conv1 anchor span
    R2 = p2_ref.shape[1]          # valid conv2 anchor span
    C2 = wf1_ref.shape[0]

    # ---- Conv1 (5x5, pad=1) + ReLU: direct 25-tap accumulation -------------
    # The whole (Cin_p, F1) frame is only a few vregs: load it once and slice
    # the *value* per tap (XLU rotates; no im2col stores, no repeated vlds).
    xb = x_ref[...]
    h1 = jnp.dot(w1_ref[0], xb[:, 0:R1], preferred_element_type=f32)
    for t in range(1, 25):
        di, dj = divmod(t, 5)
        off = di * d.Wp1 + dj
        h1 = h1 + jnp.dot(w1_ref[t], xb[:, off:off + R1],
                          preferred_element_type=f32)
    h1 = jnp.maximum(h1 + b1_ref[...], 0.0).astype(mxu)        # (C1, R1)

    # ---- MaxPool1 (2x2, s=2, pad=1): max of four 0/1 tap matmuls -----------
    # Out-of-window taps contribute 0, which never exceeds the true max
    # because the operand is post-ReLU (>= 0).  The tap matrices also insert
    # conv2's zero border and pad the frame to 128 lanes (lane-dense result).
    a1 = jnp.dot(h1, p1_ref[0], preferred_element_type=f32)
    for t in range(1, 4):
        a1 = jnp.maximum(a1, jnp.dot(h1, p1_ref[t],
                                     preferred_element_type=f32))
    a1 = a1.astype(mxu)                                        # (C1, 128)

    # ---- Conv2 (5x5, pad=1) + ReLU: direct 25-tap accumulation -------------
    h2 = jnp.dot(w2_ref[0], a1[:, 0:R2], preferred_element_type=f32)
    for t in range(1, 25):
        di, dj = divmod(t, 5)
        off = di * d.Wp2 + dj
        h2 = h2 + jnp.dot(w2_ref[t], a1[:, off:off + R2],
                          preferred_element_type=f32)
    h2 = jnp.maximum(h2 + b2_ref[...], 0.0).astype(mxu)        # (C2, R2)

    # ---- MaxPool2 (2x2, s=2, pad=1) -----------------------------------------
    a2 = jnp.dot(h2, p2_ref[0], preferred_element_type=f32)
    for t in range(1, 4):
        a2 = jnp.maximum(a2, jnp.dot(h2, p2_ref[t],
                                     preferred_element_type=f32))
    a2 = a2.astype(mxu)                                        # (C2, S2)

    # ---- Classifier ----------------------------------------------------------
    # AdaptiveAvgPool2d((7,7)) + Flatten are folded into wf1 (prepare_params),
    # stored per-channel as (C2, S2, 512): the pooled activation is consumed
    # in its native (C2, S2) layout - no flatten relayout, no scatter stores.
    z = jnp.dot(a2[0:1, :], wf1_ref[0], preferred_element_type=f32)
    for c in range(1, C2):
        z = z + jnp.dot(a2[c:c + 1, :], wf1_ref[c],
                        preferred_element_type=f32)
    z = jnp.maximum(z + bf1_ref[...], 0.0).astype(mxu)         # (1, 512)
    y = jnp.dot(z, wf2_ref[...], preferred_element_type=f32) + bf2_ref[...]
    out_ref[...] = y.astype(out_ref.dtype)


# ----------------------------------------------------------------------------
# One-time parameter preparation (all folding / reshaping happens here, once)
# ----------------------------------------------------------------------------
def _adaptive_matrix(in_size, out_size):
    """AdaptiveAvgPool1d as a matrix P (out_size, in_size): out = P @ in."""
    P = np.zeros((out_size, in_size), np.float32)
    for i in range(out_size):
        s = (i * in_size) // out_size
        e = -((-(i + 1) * in_size) // out_size)   # ceil((i+1)*in/out)
        P[i, s:e] = 1.0 / (e - s)
    return P


def _pool_tap_mats(hin, win, frame_w, out_pad):
    """0/1 matrices implementing MaxPool2d(2, stride=2, pad=1) as 4 taps.

    Rows: flattened conv-output anchors y*frame_w + x (valid y<hin, x<win on a
    frame of width frame_w).  Columns: pooled output placed at
    (oy+out_pad, ox+out_pad) on an output frame of width wout + 2*out_pad
    (out_pad=1 re-creates the zero padding needed by the next conv)."""
    hout, wout = hin // 2 + 1, win // 2 + 1
    out_fh, out_fw = hout + 2 * out_pad, wout + 2 * out_pad
    n_rows = (hin - 1) * frame_w + win
    mats = np.zeros((4, n_rows, out_fh * out_fw), np.float32)
    for t, (dy, dx) in enumerate(((0, 0), (0, 1), (1, 0), (1, 1))):
        for oy in range(hout):
            y = 2 * oy + dy - 1
            if not (0 <= y < hin):
                continue
            for ox in range(wout):
                x = 2 * ox + dx - 1
                if 0 <= x < win:
                    mats[t, y * frame_w + x,
                         (oy + out_pad) * out_fw + (ox + out_pad)] = 1.0
    return mats


def prepare_params(params, H, W, mxu_dtype=jnp.bfloat16):
    """One-time host-side weight folding; mxu_dtype feeds the MXU (f32 acc)."""
    conv1_w = np.asarray(params["conv1_w"], np.float32)      # (C1, Cin, 5, 5)
    conv2_w = np.asarray(params["conv2_w"], np.float32)      # (C2, C1, 5, 5)
    C1, Cin = conv1_w.shape[0], conv1_w.shape[1]
    C2 = conv2_w.shape[0]
    g = _geometry(H, W)

    # Pad conv1 input channels to a multiple of 8 (full sublanes).
    Cin_p = -(-Cin // 8) * 8
    conv1_w = np.pad(conv1_w, ((0, 0), (0, Cin_p - Cin), (0, 0), (0, 0)))

    # Per-tap conv weights, (25, Cout, Cin): tap t = di*5 + dj.
    w1 = conv1_w.transpose(2, 3, 0, 1).reshape(25, C1, Cin_p)
    w2 = conv2_w.transpose(2, 3, 0, 1).reshape(25, C2, C1)
    b1 = np.asarray(params["conv1_b"], np.float32).reshape(C1, 1)
    b2 = np.asarray(params["conv2_b"], np.float32).reshape(C2, 1)

    # MaxPool tap-selection matrices.  pool1's output columns form a full
    # zero-bordered conv2 input frame, padded up to a multiple of 128 lanes.
    p1 = _pool_tap_mats(g["Ho1"], g["Wo1"], g["Wp1"], out_pad=1)   # (4,R1,F2)
    F2p = -(-p1.shape[2] // 128) * 128
    p1 = np.pad(p1, ((0, 0), (0, 0), (0, F2p - p1.shape[2])))
    p2 = _pool_tap_mats(g["Ho2"], g["Wo2"], g["Wp2"], out_pad=0)   # (4,R2,S2)

    # Fold AdaptiveAvgPool2d((7,7)) + Flatten into fc1, stored per channel as
    # (C2, S2, 512) so the kernel consumes the pooled (C2, S2) activation
    # directly (no flatten relayout).
    K = np.kron(_adaptive_matrix(g["Hq2"], 7), _adaptive_matrix(g["Wq2"], 7))
    fc1_w = np.asarray(params["fc1_w"], np.float32)           # (512, C2*49)
    fc1_w = fc1_w.reshape(fc1_w.shape[0], C2, 49)
    wf1 = np.einsum("ocp,ps->cso", fc1_w, K)                   # (C2, S2, 512)
    bf1 = np.asarray(params["fc1_b"], np.float32).reshape(1, -1)
    wf2 = np.asarray(params["fc2_w"], np.float32).T            # (512, NC)
    bf2 = np.asarray(params["fc2_b"], np.float32).reshape(1, -1)

    md = mxu_dtype
    return dict(
        w1=jnp.asarray(w1, md), b1=jnp.asarray(b1), p1=jnp.asarray(p1, md),
        w2=jnp.asarray(w2, md), b2=jnp.asarray(b2), p2=jnp.asarray(p2, md),
        wf1=jnp.asarray(wf1, md), bf1=jnp.asarray(bf1),
        wf2=jnp.asarray(wf2, md), bf2=jnp.asarray(bf2),
    )


# ----------------------------------------------------------------------------
# Forward pass: one fused pallas_call, grid over batch
# ----------------------------------------------------------------------------
def two_cnn_forward(x, kp):
    B, Cin, H, W = x.shape
    g = _geometry(H, W)
    C1, Cin_p = kp["w1"].shape[1], kp["w1"].shape[2]
    C2 = kp["w2"].shape[1]
    NC = kp["wf2"].shape[1]
    DF = kp["wf1"].shape[2]
    F1, F2p = g["F1"], kp["p1"].shape[2]
    mxu = kp["w1"].dtype

    # Cheap glue on the tiny raw input only: conv1 zero padding + channel
    # alignment to 8 sublanes, laid out as per-batch (Cin_p, F1) frames.
    xp = jnp.pad(x.astype(jnp.float32),
                 ((0, 0), (0, Cin_p - Cin), (1, 1), (1, 1)))
    x1 = xp.reshape(B, Cin_p, F1).astype(mxu)

    ops = (x1, kp["w1"], kp["b1"], kp["p1"], kp["w2"], kp["b2"], kp["p2"],
           kp["wf1"], kp["bf1"], kp["wf2"], kp["bf2"])

    def _const_spec(a):
        return pl.BlockSpec(a.shape, lambda b, nd=a.ndim: (0,) * nd)

    in_specs = [pl.BlockSpec((None, Cin_p, F1), lambda b: (b, 0, 0))]
    in_specs += [_const_spec(a) for a in ops[1:]]

    flops = 2 * B * (25 * C1 * Cin_p * g["R1"] + 4 * C1 * g["R1"] * F2p
                     + 25 * C2 * C1 * g["R2"] + 4 * C2 * g["R2"] * g["S2"]
                     + C2 * g["S2"] * DF + DF * NC)
    bytes_accessed = sum(int(np.prod(a.shape)) * a.dtype.itemsize for a in ops)
    bytes_accessed += B * NC * 4

    out = pl.pallas_call(
        functools.partial(_two_cnn_kernel,
                          d=KDims(Wp1=g["Wp1"], Wp2=g["Wp2"])),
        grid=(B,),
        out_shape=jax.ShapeDtypeStruct((B, 1, NC), jnp.float32),
        in_specs=in_specs,
        out_specs=pl.BlockSpec((None, 1, NC), lambda b: (b, 0, 0)),
        compiler_params=pltpu.CompilerParams(
            dimension_semantics=("parallel",)),
        cost_estimate=pl.CostEstimate(flops=int(flops), transcendentals=0,
                                      bytes_accessed=int(bytes_accessed)),
    )(*ops)
    return out.reshape(B, NC)


# ----------------------------------------------------------------------------
# Deterministic parameter init (PyTorch-layout weights)
# ----------------------------------------------------------------------------
def init_params(key, in_channels, hidden, num_classes):
    ks = jax.random.split(key, 8)

    def u(k, shape, fan_in):
        bound = 1.0 / math.sqrt(fan_in)
        return jax.random.uniform(k, shape, jnp.float32, -bound, bound)

    return {
        "conv1_w": u(ks[0], (hidden, in_channels, 5, 5), in_channels * 25),
        "conv1_b": u(ks[1], (hidden,), in_channels * 25),
        "conv2_w": u(ks[2], (2 * hidden, hidden, 5, 5), hidden * 25),
        "conv2_b": u(ks[3], (2 * hidden,), hidden * 25),
        "fc1_w": u(ks[4], (512, 2 * hidden * 49), 2 * hidden * 49),
        "fc1_b": u(ks[5], (512,), 2 * hidden * 49),
        "fc2_w": u(ks[6], (num_classes, 512), 512),
        "fc2_b": u(ks[7], (num_classes,), 512),
    }


if __name__ == "__main__":
    B, C_IN, H, W = 2, 4, 16, 16
    HIDDEN, NUM_CLASSES = 8, 10

    key = jax.random.PRNGKey(0)
    k_x, k_p = jax.random.split(key)
    x = jax.random.normal(k_x, (B, C_IN, H, W), jnp.float32)
    params = init_params(k_p, C_IN, HIDDEN, NUM_CLASSES)
    kp = prepare_params(params, H, W)          # one-time weight folding

    fwd = jax.jit(two_cnn_forward)
    out = jax.block_until_ready(fwd(x, kp))
    assert out.shape == (B, NUM_CLASSES), out.shape
    assert bool(jnp.all(jnp.isfinite(out)))
    print("KERNEL_OK")
</pallas_src>

<mosaic_0001>
module attributes {stable_mosaic.version = 11 : i64} {
  func.func @_two_cnn_kernel(%arg0: i32, %arg1: memref<1x8x324xbf16, #tpu.memory_space<vmem>>, %arg2: memref<25x8x8xbf16, #tpu.memory_space<vmem>>, %arg3: memref<8x1xf32, #tpu.memory_space<vmem>>, %arg4: memref<4x248x128xbf16, #tpu.memory_space<vmem>>, %arg5: memref<25x16x8xbf16, #tpu.memory_space<vmem>>, %arg6: memref<16x1xf32, #tpu.memory_space<vmem>>, %arg7: memref<4x56x16xbf16, #tpu.memory_space<vmem>>, %arg8: memref<16x16x512xbf16, #tpu.memory_space<vmem>>, %arg9: memref<1x512xf32, #tpu.memory_space<vmem>>, %arg10: memref<512x10xbf16, #tpu.memory_space<vmem>>, %arg11: memref<1x10xf32, #tpu.memory_space<vmem>>, %arg12: memref<1x1x10xf32, #tpu.memory_space<vmem>>) attributes {dimension_semantics = [#tpu.dimension_semantics<parallel>], iteration_bounds = array<i64: 2>, scalar_prefetch = 0 : i64, scratch_operands = 0 : i64, tpu.core_type = #tpu.core_type<tc>, window_params = [{transform_indices = @transform_0, window_bounds = array<i64: 1, 8, 324>}, {pipeline_mode = #tpu.pipeline_mode<synchronous>, transform_indices = @transform_1, window_bounds = array<i64: 25, 8, 8>}, {pipeline_mode = #tpu.pipeline_mode<synchronous>, transform_indices = @transform_2, window_bounds = array<i64: 8, 1>}, {pipeline_mode = #tpu.pipeline_mode<synchronous>, transform_indices = @transform_3, window_bounds = array<i64: 4, 248, 128>}, {pipeline_mode = #tpu.pipeline_mode<synchronous>, transform_indices = @transform_4, window_bounds = array<i64: 25, 16, 8>}, {pipeline_mode = #tpu.pipeline_mode<synchronous>, transform_indices = @transform_5, window_bounds = array<i64: 16, 1>}, {pipeline_mode = #tpu.pipeline_mode<synchronous>, transform_indices = @transform_6, window_bounds = array<i64: 4, 56, 16>}, {pipeline_mode = #tpu.pipeline_mode<synchronous>, transform_indices = @transform_7, window_bounds = array<i64: 16, 16, 512>}, {pipeline_mode = #tpu.pipeline_mode<synchronous>, transform_indices = @transform_8, window_bounds = array<i64: 1, 512>}, {pipeline_mode = #tpu.pipeline_mode<synchronous>, transform_indices = @transform_9, window_bounds = array<i64: 512, 10>}, {pipeline_mode = #tpu.pipeline_mode<synchronous>, transform_indices = @transform_10, window_bounds = array<i64: 1, 10>}, {transform_indices = @transform_11, window_bounds = array<i64: 1, 1, 10>}]} {
    %c0 = arith.constant 0 : index
    %c0_0 = arith.constant 0 : index
    %c0_1 = arith.constant 0 : index
    %0 = vector.load %arg1[%c0, %c0_0, %c0_1] : memref<1x8x324xbf16, #tpu.memory_space<vmem>>, vector<1x8x324xbf16>
    %1 = vector.shape_cast %0 : vector<1x8x324xbf16> to vector<8x324xbf16>
    %c0_2 = arith.constant 0 : index
    %c0_3 = arith.constant 0 : index
    %c0_4 = arith.constant 0 : index
    %2 = vector.load %arg2[%c0_2, %c0_3, %c0_4] : memref<25x8x8xbf16, #tpu.memory_space<vmem>>, vector<1x8x8xbf16>
    %3 = vector.shape_cast %2 : vector<1x8x8xbf16> to vector<8x8xbf16>
    %4 = vector.extract_strided_slice %1 {offsets = [0, 0], sizes = [8, 248], strides = [1, 1]} : vector<8x324xbf16> to vector<8x248xbf16>
    %cst = arith.constant dense<0.000000e+00> : vector<8x248xf32>
    %5 = tpu.matmul %3, %4, %cst {dimension_numbers = #tpu.dot_dimension_numbers<[1], [0], [0], [1], [0, 0, 1, 1], [], []>} : vector<8x8xbf16>, vector<8x248xbf16>, vector<8x248xf32> -> vector<8x248xf32>
    %c1 = arith.constant 1 : index
    %c0_5 = arith.constant 0 : index
    %c0_6 = arith.constant 0 : index
    %6 = vector.load %arg2[%c1, %c0_5, %c0_6] : memref<25x8x8xbf16, #tpu.memory_space<vmem>>, vector<1x8x8xbf16>
    %7 = vector.shape_cast %6 : vector<1x8x8xbf16> to vector<8x8xbf16>
    %8 = vector.extract_strided_slice %1 {offsets = [0, 1], sizes = [8, 248], strides = [1, 1]} : vector<8x324xbf16> to vector<8x248xbf16>
    %cst_7 = arith.constant dense<0.000000e+00> : vector<8x248xf32>
    %9 = tpu.matmul %7, %8, %cst_7 {dimension_numbers = #tpu.dot_dimension_numbers<[1], [0], [0], [1], [0, 0, 1, 1], [], []>} : vector<8x8xbf16>, vector<8x248xbf16>, vector<8x248xf32> -> vector<8x248xf32>
    %10 = arith.addf %5, %9 : vector<8x248xf32>
    %c2 = arith.constant 2 : index
    %c0_8 = arith.constant 0 : index
    %c0_9 = arith.constant 0 : index
    %11 = vector.load %arg2[%c2, %c0_8, %c0_9] : memref<25x8x8xbf16, #tpu.memory_space<vmem>>, vector<1x8x8xbf16>
    %12 = vector.shape_cast %11 : vector<1x8x8xbf16> to vector<8x8xbf16>
    %13 = vector.extract_strided_slice %1 {offsets = [0, 2], sizes = [8, 248], strides = [1, 1]} : vector<8x324xbf16> to vector<8x248xbf16>
    %cst_10 = arith.constant dense<0.000000e+00> : vector<8x248xf32>
    %14 = tpu.matmul %12, %13, %cst_10 {dimension_numbers = #tpu.dot_dimension_numbers<[1], [0], [0], [1], [0, 0, 1, 1], [], []>} : vector<8x8xbf16>, vector<8x248xbf16>, vector<8x248xf32> -> vector<8x248xf32>
    %15 = arith.addf %10, %14 : vector<8x248xf32>
    %c3 = arith.constant 3 : index
    %c0_11 = arith.constant 0 : index
    %c0_12 = arith.constant 0 : index
    %16 = vector.load %arg2[%c3, %c0_11, %c0_12] : memref<25x8x8xbf16, #tpu.memory_space<vmem>>, vector<1x8x8xbf16>
    %17 = vector.shape_cast %16 : vector<1x8x8xbf16> to vector<8x8xbf16>
    %18 = vector.extract_strided_slice %1 {offsets = [0, 3], sizes = [8, 248], strides = [1, 1]} : vector<8x324xbf16> to vector<8x248xbf16>
    %cst_13 = arith.constant dense<0.000000e+00> : vector<8x248xf32>
    %19 = tpu.matmul %17, %18, %cst_13 {dimension_numbers = #tpu.dot_dimension_numbers<[1], [0], [0], [1], [0, 0, 1, 1], [], []>} : vector<8x8xbf16>, vector<8x248xbf16>, vector<8x248xf32> -> vector<8x248xf32>
    %20 = arith.addf %15, %19 : vector<8x248xf32>
    %c4 = arith.constant 4 : index
    %c0_14 = arith.constant 0 : index
    %c0_15 = arith.constant 0 : index
    %21 = vector.load %arg2[%c4, %c0_14, %c0_15] : memref<25x8x8xbf16, #tpu.memory_space<vmem>>, vector<1x8x8xbf16>
    %22 = vector.shape_cast %21 : vector<1x8x8xbf16> to vector<8x8xbf16>
    %23 = vector.extract_strided_slice %1 {offsets = [0, 4], sizes = [8, 248], strides = [1, 1]} : vector<8x324xbf16> to vector<8x248xbf16>
    %cst_16 = arith.constant dense<0.000000e+00> : vector<8x248xf32>
    %24 = tpu.matmul %22, %23, %cst_16 {dimension_numbers = #tpu.dot_dimension_numbers<[1], [0], [0], [1], [0, 0, 1, 1], [], []>} : vector<8x8xbf16>, vector<8x248xbf16>, vector<8x248xf32> -> vector<8x248xf32>
    %25 = arith.addf %20, %24 : vector<8x248xf32>
    %c5 = arith.constant 5 : index
    %c0_17 = arith.constant 0 : index
    %c0_18 = arith.constant 0 : index
    %26 = vector.load %arg2[%c5, %c0_17, %c0_18] : memref<25x8x8xbf16, #tpu.memory_space<vmem>>, vector<1x8x8xbf16>
    %27 = vector.shape_cast %26 : vector<1x8x8xbf16> to vector<8x8xbf16>
    %28 = vector.extract_strided_slice %1 {offsets = [0, 18], sizes = [8, 248], strides = [1, 1]} : vector<8x324xbf16> to vector<8x248xbf16>
    %cst_19 = arith.constant dense<0.000000e+00> : vector<8x248xf32>
    %29 = tpu.matmul %27, %28, %cst_19 {dimension_numbers = #tpu.dot_dimension_numbers<[1], [0], [0], [1], [0, 0, 1, 1], [], []>} : vector<8x8xbf16>, vector<8x248xbf16>, vector<8x248xf32> -> vector<8x248xf32>
    %30 = arith.addf %25, %29 : vector<8x248xf32>
    %c6 = arith.constant 6 : index
    %c0_20 = arith.constant 0 : index
    %c0_21 = arith.constant 0 : index
    %31 = vector.load %arg2[%c6, %c0_20, %c0_21] : memref<25x8x8xbf16, #tpu.memory_space<vmem>>, vector<1x8x8xbf16>
    %32 = vector.shape_cast %31 : vector<1x8x8xbf16> to vector<8x8xbf16>
    %33 = vector.extract_strided_slice %1 {offsets = [0, 19], sizes = [8, 248], strides = [1, 1]} : vector<8x324xbf16> to vector<8x248xbf16>
    %cst_22 = arith.constant dense<0.000000e+00> : vector<8x248xf32>
    %34 = tpu.matmul %32, %33, %cst_22 {dimension_numbers = #tpu.dot_dimension_numbers<[1], [0], [0], [1], [0, 0, 1, 1], [], []>} : vector<8x8xbf16>, vector<8x248xbf16>, vector<8x248xf32> -> vector<8x248xf32>
    %35 = arith.addf %30, %34 : vector<8x248xf32>
    %c7 = arith.constant 7 : index
    %c0_23 = arith.constant 0 : index
    %c0_24 = arith.constant 0 : index
    %36 = vector.load %arg2[%c7, %c0_23, %c0_24] : memref<25x8x8xbf16, #tpu.memory_space<vmem>>, vector<1x8x8xbf16>
    %37 = vector.shape_cast %36 : vector<1x8x8xbf16> to vector<8x8xbf16>
    %38 = vector.extract_strided_slice %1 {offsets = [0, 20], sizes = [8, 248], strides = [1, 1]} : vector<8x324xbf16> to vector<8x248xbf16>
    %cst_25 = arith.constant dense<0.000000e+00> : vector<8x248xf32>
    %39 = tpu.matmul %37, %38, %cst_25 {dimension_numbers = #tpu.dot_dimension_numbers<[1], [0], [0], [1], [0, 0, 1, 1], [], []>} : vector<8x8xbf16>, vector<8x248xbf16>, vector<8x248xf32> -> vector<8x248xf32>
    %40 = arith.addf %35, %39 : vector<8x248xf32>
    %c8 = arith.constant 8 : index
    %c0_26 = arith.constant 0 : index
    %c0_27 = arith.constant 0 : index
    %41 = vector.load %arg2[%c8, %c0_26, %c0_27] : memref<25x8x8xbf16, #tpu.memory_space<vmem>>, vector<1x8x8xbf16>
    %42 = vector.shape_cast %41 : vector<1x8x8xbf16> to vector<8x8xbf16>
    %43 = vector.extract_strided_slice %1 {offsets = [0, 21], sizes = [8, 248], strides = [1, 1]} : vector<8x324xbf16> to vector<8x248xbf16>
    %cst_28 = arith.constant dense<0.000000e+00> : vector<8x248xf32>
    %44 = tpu.matmul %42, %43, %cst_28 {dimension_numbers = #tpu.dot_dimension_numbers<[1], [0], [0], [1], [0, 0, 1, 1], [], []>} : vector<8x8xbf16>, vector<8x248xbf16>, vector<8x248xf32> -> vector<8x248xf32>
    %45 = arith.addf %40, %44 : vector<8x248xf32>
    %c9 = arith.constant 9 : index
    %c0_29 = arith.constant 0 : index
    %c0_30 = arith.constant 0 : index
    %46 = vector.load %arg2[%c9, %c0_29, %c0_30] : memref<25x8x8xbf16, #tpu.memory_space<vmem>>, vector<1x8x8xbf16>
    %47 = vector.shape_cast %46 : vector<1x8x8xbf16> to vector<8x8xbf16>
    %48 = vector.extract_strided_slice %1 {offsets = [0, 22], sizes = [8, 248], strides = [1, 1]} : vector<8x324xbf16> to vector<8x248xbf16>
    %cst_31 = arith.constant dense<0.000000e+00> : vector<8x248xf32>
    %49 = tpu.matmul %47, %48, %cst_31 {dimension_numbers = #tpu.dot_dimension_numbers<[1], [0], [0], [1], [0, 0, 1, 1], [], []>} : vector<8x8xbf16>, vector<8x248xbf16>, vector<8x248xf32> -> vector<8x248xf32>
    %50 = arith.addf %45, %49 : vector<8x248xf32>
    %c10 = arith.constant 10 : index
    %c0_32 = arith.constant 0 : index
    %c0_33 = arith.constant 0 : index
    %51 = vector.load %arg2[%c10, %c0_32, %c0_33] : memref<25x8x8xbf16, #tpu.memory_space<vmem>>, vector<1x8x8xbf16>
    %52 = vector.shape_cast %51 : vector<1x8x8xbf16> to vector<8x8xbf16>
    %53 = vector.extract_strided_slice %1 {offsets = [0, 36], sizes = [8, 248], strides = [1, 1]} : vector<8x324xbf16> to vector<8x248xbf16>
    %cst_34 = arith.constant dense<0.000000e+00> : vector<8x248xf32>
    %54 = tpu.matmul %52, %53, %cst_34 {dimension_numbers = #tpu.dot_dimension_numbers<[1], [0], [0], [1], [0, 0, 1, 1], [], []>} : vector<8x8xbf16>, vector<8x248xbf16>, vector<8x248xf32> -> vector<8x248xf32>
    %55 = arith.addf %50, %54 : vector<8x248xf32>
    %c11 = arith.constant 11 : index
    %c0_35 = arith.constant 0 : index
    %c0_36 = arith.constant 0 : index
    %56 = vector.load %arg2[%c11, %c0_35, %c0_36] : memref<25x8x8xbf16, #tpu.memory_space<vmem>>, vector<1x8x8xbf16>
    %57 = vector.shape_cast %56 : vector<1x8x8xbf16> to vector<8x8xbf16>
    %58 = vector.extract_strided_slice %1 {offsets = [0, 37], sizes = [8, 248], strides = [1, 1]} : vector<8x324xbf16> to vector<8x248xbf16>
    %cst_37 = arith.constant dense<0.000000e+00> : vector<8x248xf32>
    %59 = tpu.matmul %57, %58, %cst_37 {dimension_numbers = #tpu.dot_dimension_numbers<[1], [0], [0], [1], [0, 0, 1, 1], [], []>} : vector<8x8xbf16>, vector<8x248xbf16>, vector<8x248xf32> -> vector<8x248xf32>
    %60 = arith.addf %55, %59 : vector<8x248xf32>
    %c12 = arith.constant 12 : index
    %c0_38 = arith.constant 0 : index
    %c0_39 = arith.constant 0 : index
    %61 = vector.load %arg2[%c12, %c0_38, %c0_39] : memref<25x8x8xbf16, #tpu.memory_space<vmem>>, vector<1x8x8xbf16>
    %62 = vector.shape_cast %61 : vector<1x8x8xbf16> to vector<8x8xbf16>
    %63 = vector.extract_strided_slice %1 {offsets = [0, 38], sizes = [8, 248], strides = [1, 1]} : vector<8x324xbf16> to vector<8x248xbf16>
    %cst_40 = arith.constant dense<0.000000e+00> : vector<8x248xf32>
    %64 = tpu.matmul %62, %63, %cst_40 {dimension_numbers = #tpu.dot_dimension_numbers<[1], [0], [0], [1], [0, 0, 1, 1], [], []>} : vector<8x8xbf16>, vector<8x248xbf16>, vector<8x248xf32> -> vector<8x248xf32>
    %65 = arith.addf %60, %64 : vector<8x248xf32>
    %c13 = arith.constant 13 : index
    %c0_41 = arith.constant 0 : index
    %c0_42 = arith.constant 0 : index
    %66 = vector.load %arg2[%c13, %c0_41, %c0_42] : memref<25x8x8xbf16, #tpu.memory_space<vmem>>, vector<1x8x8xbf16>
    %67 = vector.shape_cast %66 : vector<1x8x8xbf16> to vector<8x8xbf16>
    %68 = vector.extract_strided_slice %1 {offsets = [0, 39], sizes = [8, 248], strides = [1, 1]} : vector<8x324xbf16> to vector<8x248xbf16>
    %cst_43 = arith.constant dense<0.000000e+00> : vector<8x248xf32>
    %69 = tpu.matmul %67, %68, %cst_43 {dimension_numbers = #tpu.dot_dimension_numbers<[1], [0], [0], [1], [0, 0, 1, 1], [], []>} : vector<8x8xbf16>, vector<8x248xbf16>, vector<8x248xf32> -> vector<8x248xf32>
    %70 = arith.addf %65, %69 : vector<8x248xf32>
    %c14 = arith.constant 14 : index
    %c0_44 = arith.constant 0 : index
    %c0_45 = arith.constant 0 : index
    %71 = vector.load %arg2[%c14, %c0_44, %c0_45] : memref<25x8x8xbf16, #tpu.memory_space<vmem>>, vector<1x8x8xbf16>
    %72 = vector.shape_cast %71 : vector<1x8x8xbf16> to vector<8x8xbf16>
    %73 = vector.extract_strided_slice %1 {offsets = [0, 40], sizes = [8, 248], strides = [1, 1]} : vector<8x324xbf16> to vector<8x248xbf16>
    %cst_46 = arith.constant dense<0.000000e+00> : vector<8x248xf32>
    %74 = tpu.matmul %72, %73, %cst_46 {dimension_numbers = #tpu.dot_dimension_numbers<[1], [0], [0], [1], [0, 0, 1, 1], [], []>} : vector<8x8xbf16>, vector<8x248xbf16>, vector<8x248xf32> -> vector<8x248xf32>
    %75 = arith.addf %70, %74 : vector<8x248xf32>
    %c15 = arith.constant 15 : index
    %c0_47 = arith.constant 0 : index
    %c0_48 = arith.constant 0 : index
    %76 = vector.load %arg2[%c15, %c0_47, %c0_48] : memref<25x8x8xbf16, #tpu.memory_space<vmem>>, vector<1x8x8xbf16>
    %77 = vector.shape_cast %76 : vector<1x8x8xbf16> to vector<8x8xbf16>
    %78 = vector.extract_strided_slice %1 {offsets = [0, 54], sizes = [8, 248], strides = [1, 1]} : vector<8x324xbf16> to vector<8x248xbf16>
    %cst_49 = arith.constant dense<0.000000e+00> : vector<8x248xf32>
    %79 = tpu.matmul %77, %78, %cst_49 {dimension_numbers = #tpu.dot_dimension_numbers<[1], [0], [0], [1], [0, 0, 1, 1], [], []>} : vector<8x8xbf16>, vector<8x248xbf16>, vector<8x248xf32> -> vector<8x248xf32>
    %80 = arith.addf %75, %79 : vector<8x248xf32>
    %c16 = arith.constant 16 : index
    %c0_50 = arith.constant 0 : index
    %c0_51 = arith.constant 0 : index
    %81 = vector.load %arg2[%c16, %c0_50, %c0_51] : memref<25x8x8xbf16, #tpu.memory_space<vmem>>, vector<1x8x8xbf16>
    %82 = vector.shape_cast %81 : vector<1x8x8xbf16> to vector<8x8xbf16>
    %83 = vector.extract_strided_slice %1 {offsets = [0, 55], sizes = [8, 248], strides = [1, 1]} : vector<8x324xbf16> to vector<8x248xbf16>
    %cst_52 = arith.constant dense<0.000000e+00> : vector<8x248xf32>
    %84 = tpu.matmul %82, %83, %cst_52 {dimension_numbers = #tpu.dot_dimension_numbers<[1], [0], [0], [1], [0, 0, 1, 1], [], []>} : vector<8x8xbf16>, vector<8x248xbf16>, vector<8x248xf32> -> vector<8x248xf32>
    %85 = arith.addf %80, %84 : vector<8x248xf32>
    %c17 = arith.constant 17 : index
    %c0_53 = arith.constant 0 : index
    %c0_54 = arith.constant 0 : index
    %86 = vector.load %arg2[%c17, %c0_53, %c0_54] : memref<25x8x8xbf16, #tpu.memory_space<vmem>>, vector<1x8x8xbf16>
    %87 = vector.shape_cast %86 : vector<1x8x8xbf16> to vector<8x8xbf16>
    %88 = vector.extract_strided_slice %1 {offsets = [0, 56], sizes = [8, 248], strides = [1, 1]} : vector<8x324xbf16> to vector<8x248xbf16>
    %cst_55 = arith.constant dense<0.000000e+00> : vector<8x248xf32>
    %89 = tpu.matmul %87, %88, %cst_55 {dimension_numbers = #tpu.dot_dimension_numbers<[1], [0], [0], [1], [0, 0, 1, 1], [], []>} : vector<8x8xbf16>, vector<8x248xbf16>, vector<8x248xf32> -> vector<8x248xf32>
    %90 = arith.addf %85, %89 : vector<8x248xf32>
    %c18 = arith.constant 18 : index
    %c0_56 = arith.constant 0 : index
    %c0_57 = arith.constant 0 : index
    %91 = vector.load %arg2[%c18, %c0_56, %c0_57] : memref<25x8x8xbf16, #tpu.memory_space<vmem>>, vector<1x8x8xbf16>
    %92 = vector.shape_cast %91 : vector<1x8x8xbf16> to vector<8x8xbf16>
    %93 = vector.extract_strided_slice %1 {offsets = [0, 57], sizes = [8, 248], strides = [1, 1]} : vector<8x324xbf16> to vector<8x248xbf16>
    %cst_58 = arith.constant dense<0.000000e+00> : vector<8x248xf32>
    %94 = tpu.matmul %92, %93, %cst_58 {dimension_numbers = #tpu.dot_dimension_numbers<[1], [0], [0], [1], [0, 0, 1, 1], [], []>} : vector<8x8xbf16>, vector<8x248xbf16>, vector<8x248xf32> -> vector<8x248xf32>
    %95 = arith.addf %90, %94 : vector<8x248xf32>
    %c19 = arith.constant 19 : index
    %c0_59 = arith.constant 0 : index
    %c0_60 = arith.constant 0 : index
    %96 = vector.load %arg2[%c19, %c0_59, %c0_60] : memref<25x8x8xbf16, #tpu.memory_space<vmem>>, vector<1x8x8xbf16>
    %97 = vector.shape_cast %96 : vector<1x8x8xbf16> to vector<8x8xbf16>
    %98 = vector.extract_strided_slice %1 {offsets = [0, 58], sizes = [8, 248], strides = [1, 1]} : vector<8x324xbf16> to vector<8x248xbf16>
    %cst_61 = arith.constant dense<0.000000e+00> : vector<8x248xf32>
    %99 = tpu.matmul %97, %98, %cst_61 {dimension_numbers = #tpu.dot_dimension_numbers<[1], [0], [0], [1], [0, 0, 1, 1], [], []>} : vector<8x8xbf16>, vector<8x248xbf16>, vector<8x248xf32> -> vector<8x248xf32>
    %100 = arith.addf %95, %99 : vector<8x248xf32>
    %c20 = arith.constant 20 : index
    %c0_62 = arith.constant 0 : index
    %c0_63 = arith.constant 0 : index
    %101 = vector.load %arg2[%c20, %c0_62, %c0_63] : memref<25x8x8xbf16, #tpu.memory_space<vmem>>, vector<1x8x8xbf16>
    %102 = vector.shape_cast %101 : vector<1x8x8xbf16> to vector<8x8xbf16>
    %103 = vector.extract_strided_slice %1 {offsets = [0, 72], sizes = [8, 248], strides = [1, 1]} : vector<8x324xbf16> to vector<8x248xbf16>
    %cst_64 = arith.constant dense<0.000000e+00> : vector<8x248xf32>
    %104 = tpu.matmul %102, %103, %cst_64 {dimension_numbers = #tpu.dot_dimension_numbers<[1], [0], [0], [1], [0, 0, 1, 1], [], []>} : vector<8x8xbf16>, vector<8x248xbf16>, vector<8x248xf32> -> vector<8x248xf32>
    %105 = arith.addf %100, %104 : vector<8x248xf32>
    %c21 = arith.constant 21 : index
    %c0_65 = arith.constant 0 : index
    %c0_66 = arith.constant 0 : index
    %106 = vector.load %arg2[%c21, %c0_65, %c0_66] : memref<25x8x8xbf16, #tpu.memory_space<vmem>>, vector<1x8x8xbf16>
    %107 = vector.shape_cast %106 : vector<1x8x8xbf16> to vector<8x8xbf16>
    %108 = vector.extract_strided_slice %1 {offsets = [0, 73], sizes = [8, 248], strides = [1, 1]} : vector<8x324xbf16> to vector<8x248xbf16>
    %cst_67 = arith.constant dense<0.000000e+00> : vector<8x248xf32>
    %109 = tpu.matmul %107, %108, %cst_67 {dimension_numbers = #tpu.dot_dimension_numbers<[1], [0], [0], [1], [0, 0, 1, 1], [], []>} : vector<8x8xbf16>, vector<8x248xbf16>, vector<8x248xf32> -> vector<8x248xf32>
    %110 = arith.addf %105, %109 : vector<8x248xf32>
    %c22 = arith.constant 22 : index
    %c0_68 = arith.constant 0 : index
    %c0_69 = arith.constant 0 : index
    %111 = vector.load %arg2[%c22, %c0_68, %c0_69] : memref<25x8x8xbf16, #tpu.memory_space<vmem>>, vector<1x8x8xbf16>
    %112 = vector.shape_cast %111 : vector<1x8x8xbf16> to vector<8x8xbf16>
    %113 = vector.extract_strided_slice %1 {offsets = [0, 74], sizes = [8, 248], strides = [1, 1]} : vector<8x324xbf16> to vector<8x248xbf16>
    %cst_70 = arith.constant dense<0.000000e+00> : vector<8x248xf32>
    %114 = tpu.matmul %112, %113, %cst_70 {dimension_numbers = #tpu.dot_dimension_numbers<[1], [0], [0], [1], [0, 0, 1, 1], [], []>} : vector<8x8xbf16>, vector<8x248xbf16>, vector<8x248xf32> -> vector<8x248xf32>
    %115 = arith.addf %110, %114 : vector<8x248xf32>
    %c23 = arith.constant 23 : index
    %c0_71 = arith.constant 0 : index
    %c0_72 = arith.constant 0 : index
    %116 = vector.load %arg2[%c23, %c0_71, %c0_72] : memref<25x8x8xbf16, #tpu.memory_space<vmem>>, vector<1x8x8xbf16>
    %117 = vector.shape_cast %116 : vector<1x8x8xbf16> to vector<8x8xbf16>
    %118 = vector.extract_strided_slice %1 {offsets = [0, 75], sizes = [8, 248], strides = [1, 1]} : vector<8x324xbf16> to vector<8x248xbf16>
    %cst_73 = arith.constant dense<0.000000e+00> : vector<8x248xf32>
    %119 = tpu.matmul %117, %118, %cst_73 {dimension_numbers = #tpu.dot_dimension_numbers<[1], [0], [0], [1], [0, 0, 1, 1], [], []>} : vector<8x8xbf16>, vector<8x248xbf16>, vector<8x248xf32> -> vector<8x248xf32>
    %120 = arith.addf %115, %119 : vector<8x248xf32>
    %c24 = arith.constant 24 : index
    %c0_74 = arith.constant 0 : index
    %c0_75 = arith.constant 0 : index
    %121 = vector.load %arg2[%c24, %c0_74, %c0_75] : memref<25x8x8xbf16, #tpu.memory_space<vmem>>, vector<1x8x8xbf16>
    %122 = vector.shape_cast %121 : vector<1x8x8xbf16> to vector<8x8xbf16>
    %123 = vector.extract_strided_slice %1 {offsets = [0, 76], sizes = [8, 248], strides = [1, 1]} : vector<8x324xbf16> to vector<8x248xbf16>
    %cst_76 = arith.constant dense<0.000000e+00> : vector<8x248xf32>
    %124 = tpu.matmul %122, %123, %cst_76 {dimension_numbers = #tpu.dot_dimension_numbers<[1], [0], [0], [1], [0, 0, 1, 1], [], []>} : vector<8x8xbf16>, vector<8x248xbf16>, vector<8x248xf32> -> vector<8x248xf32>
    %125 = arith.addf %120, %124 : vector<8x248xf32>
    %c0_77 = arith.constant 0 : index
    %c0_78 = arith.constant 0 : index
    %126 = vector.load %arg3[%c0_77, %c0_78] : memref<8x1xf32, #tpu.memory_space<vmem>>, vector<8x1xf32>
    %127 = vector.broadcast %126 : vector<8x1xf32> to vector<8x248xf32>
    %128 = arith.addf %125, %127 : vector<8x248xf32>
    %cst_79 = arith.constant 0.000000e+00 : f32
    %129 = vector.broadcast %cst_79 : f32 to vector<8x248xf32>
    %130 = arith.maximumf %128, %129 : vector<8x248xf32>
    %131 = arith.truncf %130 : vector<8x248xf32> to vector<8x248xbf16>
    %c0_80 = arith.constant 0 : index
    %c0_81 = arith.constant 0 : index
    %c0_82 = arith.constant 0 : index
    %132 = vector.load %arg4[%c0_80, %c0_81, %c0_82] : memref<4x248x128xbf16, #tpu.memory_space<vmem>>, vector<1x248x128xbf16>
    %133 = vector.shape_cast %132 : vector<1x248x128xbf16> to vector<248x128xbf16>
    %cst_83 = arith.constant dense<0.000000e+00> : vector<8x128xf32>
    %134 = tpu.matmul %131, %133, %cst_83 {dimension_numbers = #tpu.dot_dimension_numbers<[1], [0], [0], [1], [0, 0, 1, 1], [], []>} : vector<8x248xbf16>, vector<248x128xbf16>, vector<8x128xf32> -> vector<8x128xf32>
    %c1_84 = arith.constant 1 : index
    %c0_85 = arith.constant 0 : index
    %c0_86 = arith.constant 0 : index
    %135 = vector.load %arg4[%c1_84, %c0_85, %c0_86] : memref<4x248x128xbf16, #tpu.memory_space<vmem>>, vector<1x248x128xbf16>
    %136 = vector.shape_cast %135 : vector<1x248x128xbf16> to vector<248x128xbf16>
    %cst_87 = arith.constant dense<0.000000e+00> : vector<8x128xf32>
    %137 = tpu.matmul %131, %136, %cst_87 {dimension_numbers = #tpu.dot_dimension_numbers<[1], [0], [0], [1], [0, 0, 1, 1], [], []>} : vector<8x248xbf16>, vector<248x128xbf16>, vector<8x128xf32> -> vector<8x128xf32>
    %138 = arith.maximumf %134, %137 : vector<8x128xf32>
    %c2_88 = arith.constant 2 : index
    %c0_89 = arith.constant 0 : index
    %c0_90 = arith.constant 0 : index
    %139 = vector.load %arg4[%c2_88, %c0_89, %c0_90] : memref<4x248x128xbf16, #tpu.memory_space<vmem>>, vector<1x248x128xbf16>
    %140 = vector.shape_cast %139 : vector<1x248x128xbf16> to vector<248x128xbf16>
    %cst_91 = arith.constant dense<0.000000e+00> : vector<8x128xf32>
    %141 = tpu.matmul %131, %140, %cst_91 {dimension_numbers = #tpu.dot_dimension_numbers<[1], [0], [0], [1], [0, 0, 1, 1], [], []>} : vector<8x248xbf16>, vector<248x128xbf16>, vector<8x128xf32> -> vector<8x128xf32>
    %142 = arith.maximumf %138, %141 : vector<8x128xf32>
    %c3_92 = arith.constant 3 : index
    %c0_93 = arith.constant 0 : index
    %c0_94 = arith.constant 0 : index
    %143 = vector.load %arg4[%c3_92, %c0_93, %c0_94] : memref<4x248x128xbf16, #tpu.memory_space<vmem>>, vector<1x248x128xbf16>
    %144 = vector.shape_cast %143 : vector<1x248x128xbf16> to vector<248x128xbf16>
    %cst_95 = arith.constant dense<0.000000e+00> : vector<8x128xf32>
    %145 = tpu.matmul %131, %144, %cst_95 {dimension_numbers = #tpu.dot_dimension_numbers<[1], [0], [0], [1], [0, 0, 1, 1], [], []>} : vector<8x248xbf16>, vector<248x128xbf16>, vector<8x128xf32> -> vector<8x128xf32>
    %146 = arith.maximumf %142, %145 : vector<8x128xf32>
    %147 = arith.truncf %146 : vector<8x128xf32> to vector<8x128xbf16>
    %c0_96 = arith.constant 0 : index
    %c0_97 = arith.constant 0 : index
    %c0_98 = arith.constant 0 : index
    %148 = vector.load %arg5[%c0_96, %c0_97, %c0_98] : memref<25x16x8xbf16, #tpu.memory_space<vmem>>, vector<1x16x8xbf16>
    %149 = vector.shape_cast %148 : vector<1x16x8xbf16> to vector<16x8xbf16>
    %150 = vector.extract_strided_slice %147 {offsets = [0, 0], sizes = [8, 56], strides = [1, 1]} : vector<8x128xbf16> to vector<8x56xbf16>
    %cst_99 = arith.constant dense<0.000000e+00> : vector<16x56xf32>
    %151 = tpu.matmul %149, %150, %cst_99 {dimension_numbers = #tpu.dot_dimension_numbers<[1], [0], [0], [1], [0, 0, 1, 1], [], []>} : vector<16x8xbf16>, vector<8x56xbf16>, vector<16x56xf32> -> vector<16x56xf32>
    %c1_100 = arith.constant 1 : index
    %c0_101 = arith.constant 0 : index
    %c0_102 = arith.constant 0 : index
    %152 = vector.load %arg5[%c1_100, %c0_101, %c0_102] : memref<25x16x8xbf16, #tpu.memory_space<vmem>>, vector<1x16x8xbf16>
    %153 = vector.shape_cast %152 : vector<1x16x8xbf16> to vector<16x8xbf16>
    %154 = vector.extract_strided_slice %147 {offsets = [0, 1], sizes = [8, 56], strides = [1, 1]} : vector<8x128xbf16> to vector<8x56xbf16>
    %cst_103 = arith.constant dense<0.000000e+00> : vector<16x56xf32>
    %155 = tpu.matmul %153, %154, %cst_103 {dimension_numbers = #tpu.dot_dimension_numbers<[1], [0], [0], [1], [0, 0, 1, 1], [], []>} : vector<16x8xbf16>, vector<8x56xbf16>, vector<16x56xf32> -> vector<16x56xf32>
    %156 = arith.addf %151, %155 : vector<16x56xf32>
    %c2_104 = arith.constant 2 : index
    %c0_105 = arith.constant 0 : index
    %c0_106 = arith.constant 0 : index
    %157 = vector.load %arg5[%c2_104, %c0_105, %c0_106] : memref<25x16x8xbf16, #tpu.memory_space<vmem>>, vector<1x16x8xbf16>
    %158 = vector.shape_cast %157 : vector<1x16x8xbf16> to vector<16x8xbf16>
    %159 = vector.extract_strided_slice %147 {offsets = [0, 2], sizes = [8, 56], strides = [1, 1]} : vector<8x128xbf16> to vector<8x56xbf16>
    %cst_107 = arith.constant dense<0.000000e+00> : vector<16x56xf32>
    %160 = tpu.matmul %158, %159, %cst_107 {dimension_numbers = #tpu.dot_dimension_numbers<[1], [0], [0], [1], [0, 0, 1, 1], [], []>} : vector<16x8xbf16>, vector<8x56xbf16>, vector<16x56xf32> -> vector<16x56xf32>
    %161 = arith.addf %156, %160 : vector<16x56xf32>
    %c3_108 = arith.constant 3 : index
    %c0_109 = arith.constant 0 : index
    %c0_110 = arith.constant 0 : index
    %162 = vector.load %arg5[%c3_108, %c0_109, %c0_110] : memref<25x16x8xbf16, #tpu.memory_space<vmem>>, vector<1x16x8xbf16>
    %163 = vector.shape_cast %162 : vector<1x16x8xbf16> to vector<16x8xbf16>
    %164 = vector.extract_strided_slice %147 {offsets = [0, 3], sizes = [8, 56], strides = [1, 1]} : vector<8x128xbf16> to vector<8x56xbf16>
    %cst_111 = arith.constant dense<0.000000e+00> : vector<16x56xf32>
    %165 = tpu.matmul %163, %164, %cst_111 {dimension_numbers = #tpu.dot_dimension_numbers<[1], [0], [0], [1], [0, 0, 1, 1], [], []>} : vector<16x8xbf16>, vector<8x56xbf16>, vector<16x56xf32> -> vector<16x56xf32>
    %166 = arith.addf %161, %165 : vector<16x56xf32>
    %c4_112 = arith.constant 4 : index
    %c0_113 = arith.constant 0 : index
    %c0_114 = arith.constant 0 : index
    %167 = vector.load %arg5[%c4_112, %c0_113, %c0_114] : memref<25x16x8xbf16, #tpu.memory_space<vmem>>, vector<1x16x8xbf16>
    %168 = vector.shape_cast %167 : vector<1x16x8xbf16> to vector<16x8xbf16>
    %169 = vector.extract_strided_slice %147 {offsets = [0, 4], sizes = [8, 56], strides = [1, 1]} : vector<8x128xbf16> to vector<8x56xbf16>
    %cst_115 = arith.constant dense<0.000000e+00> : vector<16x56xf32>
    %170 = tpu.matmul %168, %169, %cst_115 {dimension_numbers = #tpu.dot_dimension_numbers<[1], [0], [0], [1], [0, 0, 1, 1], [], []>} : vector<16x8xbf16>, vector<8x56xbf16>, vector<16x56xf32> -> vector<16x56xf32>
    %171 = arith.addf %166, %170 : vector<16x56xf32>
    %c5_116 = arith.constant 5 : index
    %c0_117 = arith.constant 0 : index
    %c0_118 = arith.constant 0 : index
    %172 = vector.load %arg5[%c5_116, %c0_117, %c0_118] : memref<25x16x8xbf16, #tpu.memory_space<vmem>>, vector<1x16x8xbf16>
    %173 = vector.shape_cast %172 : vector<1x16x8xbf16> to vector<16x8xbf16>
    %174 = vector.extract_strided_slice %147 {offsets = [0, 10], sizes = [8, 56], strides = [1, 1]} : vector<8x128xbf16> to vector<8x56xbf16>
    %cst_119 = arith.constant dense<0.000000e+00> : vector<16x56xf32>
    %175 = tpu.matmul %173, %174, %cst_119 {dimension_numbers = #tpu.dot_dimension_numbers<[1], [0], [0], [1], [0, 0, 1, 1], [], []>} : vector<16x8xbf16>, vector<8x56xbf16>, vector<16x56xf32> -> vector<16x56xf32>
    %176 = arith.addf %171, %175 : vector<16x56xf32>
    %c6_120 = arith.constant 6 : index
    %c0_121 = arith.constant 0 : index
    %c0_122 = arith.constant 0 : index
    %177 = vector.load %arg5[%c6_120, %c0_121, %c0_122] : memref<25x16x8xbf16, #tpu.memory_space<vmem>>, vector<1x16x8xbf16>
    %178 = vector.shape_cast %177 : vector<1x16x8xbf16> to vector<16x8xbf16>
    %179 = vector.extract_strided_slice %147 {offsets = [0, 11], sizes = [8, 56], strides = [1, 1]} : vector<8x128xbf16> to vector<8x56xbf16>
    %cst_123 = arith.constant dense<0.000000e+00> : vector<16x56xf32>
    %180 = tpu.matmul %178, %179, %cst_123 {dimension_numbers = #tpu.dot_dimension_numbers<[1], [0], [0], [1], [0, 0, 1, 1], [], []>} : vector<16x8xbf16>, vector<8x56xbf16>, vector<16x56xf32> -> vector<16x56xf32>
    %181 = arith.addf %176, %180 : vector<16x56xf32>
    %c7_124 = arith.constant 7 : index
    %c0_125 = arith.constant 0 : index
    %c0_126 = arith.constant 0 : index
    %182 = vector.load %arg5[%c7_124, %c0_125, %c0_126] : memref<25x16x8xbf16, #tpu.memory_space<vmem>>, vector<1x16x8xbf16>
    %183 = vector.shape_cast %182 : vector<1x16x8xbf16> to vector<16x8xbf16>
    %184 = vector.extract_strided_slice %147 {offsets = [0, 12], sizes = [8, 56], strides = [1, 1]} : vector<8x128xbf16> to vector<8x56xbf16>
    %cst_127 = arith.constant dense<0.000000e+00> : vector<16x56xf32>
    %185 = tpu.matmul %183, %184, %cst_127 {dimension_numbers = #tpu.dot_dimension_numbers<[1], [0], [0], [1], [0, 0, 1, 1], [], []>} : vector<16x8xbf16>, vector<8x56xbf16>, vector<16x56xf32> -> vector<16x56xf32>
    %186 = arith.addf %181, %185 : vector<16x56xf32>
    %c8_128 = arith.constant 8 : index
    %c0_129 = arith.constant 0 : index
    %c0_130 = arith.constant 0 : index
    %187 = vector.load %arg5[%c8_128, %c0_129, %c0_130] : memref<25x16x8xbf16, #tpu.memory_space<vmem>>, vector<1x16x8xbf16>
    %188 = vector.shape_cast %187 : vector<1x16x8xbf16> to vector<16x8xbf16>
    %189 = vector.extract_strided_slice %147 {offsets = [0, 13], sizes = [8, 56], strides = [1, 1]} : vector<8x128xbf16> to vector<8x56xbf16>
    %cst_131 = arith.constant dense<0.000000e+00> : vector<16x56xf32>
    %190 = tpu.matmul %188, %189, %cst_131 {dimension_numbers = #tpu.dot_dimension_numbers<[1], [0], [0], [1], [0, 0, 1, 1], [], []>} : vector<16x8xbf16>, vector<8x56xbf16>, vector<16x56xf32> -> vector<16x56xf32>
    %191 = arith.addf %186, %190 : vector<16x56xf32>
    %c9_132 = arith.constant 9 : index
    %c0_133 = arith.constant 0 : index
    %c0_134 = arith.constant 0 : index
    %192 = vector.load %arg5[%c9_132, %c0_133, %c0_134] : memref<25x16x8xbf16, #tpu.memory_space<vmem>>, vector<1x16x8xbf16>
    %193 = vector.shape_cast %192 : vector<1x16x8xbf16> to vector<16x8xbf16>
    %194 = vector.extract_strided_slice %147 {offsets = [0, 14], sizes = [8, 56], strides = [1, 1]} : vector<8x128xbf16> to vector<8x56xbf16>
    %cst_135 = arith.constant dense<0.000000e+00> : vector<16x56xf32>
    %195 = tpu.matmul %193, %194, %cst_135 {dimension_numbers = #tpu.dot_dimension_numbers<[1], [0], [0], [1], [0, 0, 1, 1], [], []>} : vector<16x8xbf16>, vector<8x56xbf16>, vector<16x56xf32> -> vector<16x56xf32>
    %196 = arith.addf %191, %195 : vector<16x56xf32>
    %c10_136 = arith.constant 10 : index
    %c0_137 = arith.constant 0 : index
    %c0_138 = arith.constant 0 : index
    %197 = vector.load %arg5[%c10_136, %c0_137, %c0_138] : memref<25x16x8xbf16, #tpu.memory_space<vmem>>, vector<1x16x8xbf16>
    %198 = vector.shape_cast %197 : vector<1x16x8xbf16> to vector<16x8xbf16>
    %199 = vector.extract_strided_slice %147 {offsets = [0, 20], sizes = [8, 56], strides = [1, 1]} : vector<8x128xbf16> to vector<8x56xbf16>
    %cst_139 = arith.constant dense<0.000000e+00> : vector<16x56xf32>
    %200 = tpu.matmul %198, %199, %cst_139 {dimension_numbers = #tpu.dot_dimension_numbers<[1], [0], [0], [1], [0, 0, 1, 1], [], []>} : vector<16x8xbf16>, vector<8x56xbf16>, vector<16x56xf32> -> vector<16x56xf32>
    %201 = arith.addf %196, %200 : vector<16x56xf32>
    %c11_140 = arith.constant 11 : index
    %c0_141 = arith.constant 0 : index
    %c0_142 = arith.constant 0 : index
    %202 = vector.load %arg5[%c11_140, %c0_141, %c0_142] : memref<25x16x8xbf16, #tpu.memory_space<vmem>>, vector<1x16x8xbf16>
    %203 = vector.shape_cast %202 : vector<1x16x8xbf16> to vector<16x8xbf16>
    %204 = vector.extract_strided_slice %147 {offsets = [0, 21], sizes = [8, 56], strides = [1, 1]} : vector<8x128xbf16> to vector<8x56xbf16>
    %cst_143 = arith.constant dense<0.000000e+00> : vector<16x56xf32>
    %205 = tpu.matmul %203, %204, %cst_143 {dimension_numbers = #tpu.dot_dimension_numbers<[1], [0], [0], [1], [0, 0, 1, 1], [], []>} : vector<16x8xbf16>, vector<8x56xbf16>, vector<16x56xf32> -> vector<16x56xf32>
    %206 = arith.addf %201, %205 : vector<16x56xf32>
    %c12_144 = arith.constant 12 : index
    %c0_145 = arith.constant 0 : index
    %c0_146 = arith.constant 0 : index
    %207 = vector.load %arg5[%c12_144, %c0_145, %c0_146] : memref<25x16x8xbf16, #tpu.memory_space<vmem>>, vector<1x16x8xbf16>
    %208 = vector.shape_cast %207 : vector<1x16x8xbf16> to vector<16x8xbf16>
    %209 = vector.extract_strided_slice %147 {offsets = [0, 22], sizes = [8, 56], strides = [1, 1]} : vector<8x128xbf16> to vector<8x56xbf16>
    %cst_147 = arith.constant dense<0.000000e+00> : vector<16x56xf32>
    %210 = tpu.matmul %208, %209, %cst_147 {dimension_numbers = #tpu.dot_dimension_numbers<[1], [0], [0], [1], [0, 0, 1, 1], [], []>} : vector<16x8xbf16>, vector<8x56xbf16>, vector<16x56xf32> -> vector<16x56xf32>
    %211 = arith.addf %206, %210 : vector<16x56xf32>
    %c13_148 = arith.constant 13 : index
    %c0_149 = arith.constant 0 : index
    %c0_150 = arith.constant 0 : index
    %212 = vector.load %arg5[%c13_148, %c0_149, %c0_150] : memref<25x16x8xbf16, #tpu.memory_space<vmem>>, vector<1x16x8xbf16>
    %213 = vector.shape_cast %212 : vector<1x16x8xbf16> to vector<16x8xbf16>
    %214 = vector.extract_strided_slice %147 {offsets = [0, 23], sizes = [8, 56], strides = [1, 1]} : vector<8x128xbf16> to vector<8x56xbf16>
    %cst_151 = arith.constant dense<0.000000e+00> : vector<16x56xf32>
    %215 = tpu.matmul %213, %214, %cst_151 {dimension_numbers = #tpu.dot_dimension_numbers<[1], [0], [0], [1], [0, 0, 1, 1], [], []>} : vector<16x8xbf16>, vector<8x56xbf16>, vector<16x56xf32> -> vector<16x56xf32>
    %216 = arith.addf %211, %215 : vector<16x56xf32>
    %c14_152 = arith.constant 14 : index
    %c0_153 = arith.constant 0 : index
    %c0_154 = arith.constant 0 : index
    %217 = vector.load %arg5[%c14_152, %c0_153, %c0_154] : memref<25x16x8xbf16, #tpu.memory_space<vmem>>, vector<1x16x8xbf16>
    %218 = vector.shape_cast %217 : vector<1x16x8xbf16> to vector<16x8xbf16>
    %219 = vector.extract_strided_slice %147 {offsets = [0, 24], sizes = [8, 56], strides = [1, 1]} : vector<8x128xbf16> to vector<8x56xbf16>
    %cst_155 = arith.constant dense<0.000000e+00> : vector<16x56xf32>
    %220 = tpu.matmul %218, %219, %cst_155 {dimension_numbers = #tpu.dot_dimension_numbers<[1], [0], [0], [1], [0, 0, 1, 1], [], []>} : vector<16x8xbf16>, vector<8x56xbf16>, vector<16x56xf32> -> vector<16x56xf32>
    %221 = arith.addf %216, %220 : vector<16x56xf32>
    %c15_156 = arith.constant 15 : index
    %c0_157 = arith.constant 0 : index
    %c0_158 = arith.constant 0 : index
    %222 = vector.load %arg5[%c15_156, %c0_157, %c0_158] : memref<25x16x8xbf16, #tpu.memory_space<vmem>>, vector<1x16x8xbf16>
    %223 = vector.shape_cast %222 : vector<1x16x8xbf16> to vector<16x8xbf16>
    %224 = vector.extract_strided_slice %147 {offsets = [0, 30], sizes = [8, 56], strides = [1, 1]} : vector<8x128xbf16> to vector<8x56xbf16>
    %cst_159 = arith.constant dense<0.000000e+00> : vector<16x56xf32>
    %225 = tpu.matmul %223, %224, %cst_159 {dimension_numbers = #tpu.dot_dimension_numbers<[1], [0], [0], [1], [0, 0, 1, 1], [], []>} : vector<16x8xbf16>, vector<8x56xbf16>, vector<16x56xf32> -> vector<16x56xf32>
    %226 = arith.addf %221, %225 : vector<16x56xf32>
    %c16_160 = arith.constant 16 : index
    %c0_161 = arith.constant 0 : index
    %c0_162 = arith.constant 0 : index
    %227 = vector.load %arg5[%c16_160, %c0_161, %c0_162] : memref<25x16x8xbf16, #tpu.memory_space<vmem>>, vector<1x16x8xbf16>
    %228 = vector.shape_cast %227 : vector<1x16x8xbf16> to vector<16x8xbf16>
    %229 = vector.extract_strided_slice %147 {offsets = [0, 31], sizes = [8, 56], strides = [1, 1]} : vector<8x128xbf16> to vector<8x56xbf16>
    %cst_163 = arith.constant dense<0.000000e+00> : vector<16x56xf32>
    %230 = tpu.matmul %228, %229, %cst_163 {dimension_numbers = #tpu.dot_dimension_numbers<[1], [0], [0], [1], [0, 0, 1, 1], [], []>} : vector<16x8xbf16>, vector<8x56xbf16>, vector<16x56xf32> -> vector<16x56xf32>
    %231 = arith.addf %226, %230 : vector<16x56xf32>
    %c17_164 = arith.constant 17 : index
    %c0_165 = arith.constant 0 : index
    %c0_166 = arith.constant 0 : index
    %232 = vector.load %arg5[%c17_164, %c0_165, %c0_166] : memref<25x16x8xbf16, #tpu.memory_space<vmem>>, vector<1x16x8xbf16>
    %233 = vector.shape_cast %232 : vector<1x16x8xbf16> to vector<16x8xbf16>
    %234 = vector.extract_strided_slice %147 {offsets = [0, 32], sizes = [8, 56], strides = [1, 1]} : vector<8x128xbf16> to vector<8x56xbf16>
    %cst_167 = arith.constant dense<0.000000e+00> : vector<16x56xf32>
    %235 = tpu.matmul %233, %234, %cst_167 {dimension_numbers = #tpu.dot_dimension_numbers<[1], [0], [0], [1], [0, 0, 1, 1], [], []>} : vector<16x8xbf16>, vector<8x56xbf16>, vector<16x56xf32> -> vector<16x56xf32>
    %236 = arith.addf %231, %235 : vector<16x56xf32>
    %c18_168 = arith.constant 18 : index
    %c0_169 = arith.constant 0 : index
    %c0_170 = arith.constant 0 : index
    %237 = vector.load %arg5[%c18_168, %c0_169, %c0_170] : memref<25x16x8xbf16, #tpu.memory_space<vmem>>, vector<1x16x8xbf16>
    %238 = vector.shape_cast %237 : vector<1x16x8xbf16> to vector<16x8xbf16>
    %239 = vector.extract_strided_slice %147 {offsets = [0, 33], sizes = [8, 56], strides = [1, 1]} : vector<8x128xbf16> to vector<8x56xbf16>
    %cst_171 = arith.constant dense<0.000000e+00> : vector<16x56xf32>
    %240 = tpu.matmul %238, %239, %cst_171 {dimension_numbers = #tpu.dot_dimension_numbers<[1], [0], [0], [1], [0, 0, 1, 1], [], []>} : vector<16x8xbf16>, vector<8x56xbf16>, vector<16x56xf32> -> vector<16x56xf32>
    %241 = arith.addf %236, %240 : vector<16x56xf32>
    %c19_172 = arith.constant 19 : index
    %c0_173 = arith.constant 0 : index
    %c0_174 = arith.constant 0 : index
    %242 = vector.load %arg5[%c19_172, %c0_173, %c0_174] : memref<25x16x8xbf16, #tpu.memory_space<vmem>>, vector<1x16x8xbf16>
    %243 = vector.shape_cast %242 : vector<1x16x8xbf16> to vector<16x8xbf16>
    %244 = vector.extract_strided_slice %147 {offsets = [0, 34], sizes = [8, 56], strides = [1, 1]} : vector<8x128xbf16> to vector<8x56xbf16>
    %cst_175 = arith.constant dense<0.000000e+00> : vector<16x56xf32>
    %245 = tpu.matmul %243, %244, %cst_175 {dimension_numbers = #tpu.dot_dimension_numbers<[1], [0], [0], [1], [0, 0, 1, 1], [], []>} : vector<16x8xbf16>, vector<8x56xbf16>, vector<16x56xf32> -> vector<16x56xf32>
    %246 = arith.addf %241, %245 : vector<16x56xf32>
    %c20_176 = arith.constant 20 : index
    %c0_177 = arith.constant 0 : index
    %c0_178 = arith.constant 0 : index
    %247 = vector.load %arg5[%c20_176, %c0_177, %c0_178] : memref<25x16x8xbf16, #tpu.memory_space<vmem>>, vector<1x16x8xbf16>
    %248 = vector.shape_cast %247 : vector<1x16x8xbf16> to vector<16x8xbf16>
    %249 = vector.extract_strided_slice %147 {offsets = [0, 40], sizes = [8, 56], strides = [1, 1]} : vector<8x128xbf16> to vector<8x56xbf16>
    %cst_179 = arith.constant dense<0.000000e+00> : vector<16x56xf32>
    %250 = tpu.matmul %248, %249, %cst_179 {dimension_numbers = #tpu.dot_dimension_numbers<[1], [0], [0], [1], [0, 0, 1, 1], [], []>} : vector<16x8xbf16>, vector<8x56xbf16>, vector<16x56xf32> -> vector<16x56xf32>
    %251 = arith.addf %246, %250 : vector<16x56xf32>
    %c21_180 = arith.constant 21 : index
    %c0_181 = arith.constant 0 : index
    %c0_182 = arith.constant 0 : index
    %252 = vector.load %arg5[%c21_180, %c0_181, %c0_182] : memref<25x16x8xbf16, #tpu.memory_space<vmem>>, vector<1x16x8xbf16>
    %253 = vector.shape_cast %252 : vector<1x16x8xbf16> to vector<16x8xbf16>
    %254 = vector.extract_strided_slice %147 {offsets = [0, 41], sizes = [8, 56], strides = [1, 1]} : vector<8x128xbf16> to vector<8x56xbf16>
    %cst_183 = arith.constant dense<0.000000e+00> : vector<16x56xf32>
    %255 = tpu.matmul %253, %254, %cst_183 {dimension_numbers = #tpu.dot_dimension_numbers<[1], [0], [0], [1], [0, 0, 1, 1], [], []>} : vector<16x8xbf16>, vector<8x56xbf16>, vector<16x56xf32> -> vector<16x56xf32>
    %256 = arith.addf %251, %255 : vector<16x56xf32>
    %c22_184 = arith.constant 22 : index
    %c0_185 = arith.constant 0 : index
    %c0_186 = arith.constant 0 : index
    %257 = vector.load %arg5[%c22_184, %c0_185, %c0_186] : memref<25x16x8xbf16, #tpu.memory_space<vmem>>, vector<1x16x8xbf16>
    %258 = vector.shape_cast %257 : vector<1x16x8xbf16> to vector<16x8xbf16>
    %259 = vector.extract_strided_slice %147 {offsets = [0, 42], sizes = [8, 56], strides = [1, 1]} : vector<8x128xbf16> to vector<8x56xbf16>
    %cst_187 = arith.constant dense<0.000000e+00> : vector<16x56xf32>
    %260 = tpu.matmul %258, %259, %cst_187 {dimension_numbers = #tpu.dot_dimension_numbers<[1], [0], [0], [1], [0, 0, 1, 1], [], []>} : vector<16x8xbf16>, vector<8x56xbf16>, vector<16x56xf32> -> vector<16x56xf32>
    %261 = arith.addf %256, %260 : vector<16x56xf32>
    %c23_188 = arith.constant 23 : index
    %c0_189 = arith.constant 0 : index
    %c0_190 = arith.constant 0 : index
    %262 = vector.load %arg5[%c23_188, %c0_189, %c0_190] : memref<25x16x8xbf16, #tpu.memory_space<vmem>>, vector<1x16x8xbf16>
    %263 = vector.shape_cast %262 : vector<1x16x8xbf16> to vector<16x8xbf16>
    %264 = vector.extract_strided_slice %147 {offsets = [0, 43], sizes = [8, 56], strides = [1, 1]} : vector<8x128xbf16> to vector<8x56xbf16>
    %cst_191 = arith.constant dense<0.000000e+00> : vector<16x56xf32>
    %265 = tpu.matmul %263, %264, %cst_191 {dimension_numbers = #tpu.dot_dimension_numbers<[1], [0], [0], [1], [0, 0, 1, 1], [], []>} : vector<16x8xbf16>, vector<8x56xbf16>, vector<16x56xf32> -> vector<16x56xf32>
    %266 = arith.addf %261, %265 : vector<16x56xf32>
    %c24_192 = arith.constant 24 : index
    %c0_193 = arith.constant 0 : index
    %c0_194 = arith.constant 0 : index
    %267 = vector.load %arg5[%c24_192, %c0_193, %c0_194] : memref<25x16x8xbf16, #tpu.memory_space<vmem>>, vector<1x16x8xbf16>
    %268 = vector.shape_cast %267 : vector<1x16x8xbf16> to vector<16x8xbf16>
    %269 = vector.extract_strided_slice %147 {offsets = [0, 44], sizes = [8, 56], strides = [1, 1]} : vector<8x128xbf16> to vector<8x56xbf16>
    %cst_195 = arith.constant dense<0.000000e+00> : vector<16x56xf32>
    %270 = tpu.matmul %268, %269, %cst_195 {dimension_numbers = #tpu.dot_dimension_numbers<[1], [0], [0], [1], [0, 0, 1, 1], [], []>} : vector<16x8xbf16>, vector<8x56xbf16>, vector<16x56xf32> -> vector<16x56xf32>
    %271 = arith.addf %266, %270 : vector<16x56xf32>
    %c0_196 = arith.constant 0 : index
    %c0_197 = arith.constant 0 : index
    %272 = vector.load %arg6[%c0_196, %c0_197] : memref<16x1xf32, #tpu.memory_space<vmem>>, vector<16x1xf32>
    %273 = vector.broadcast %272 : vector<16x1xf32> to vector<16x56xf32>
    %274 = arith.addf %271, %273 : vector<16x56xf32>
    %cst_198 = arith.constant 0.000000e+00 : f32
    %275 = vector.broadcast %cst_198 : f32 to vector<16x56xf32>
    %276 = arith.maximumf %274, %275 : vector<16x56xf32>
    %277 = arith.truncf %276 : vector<16x56xf32> to vector<16x56xbf16>
    %c0_199 = arith.constant 0 : index
    %c0_200 = arith.constant 0 : index
    %c0_201 = arith.constant 0 : index
    %278 = vector.load %arg7[%c0_199, %c0_200, %c0_201] : memref<4x56x16xbf16, #tpu.memory_space<vmem>>, vector<1x56x16xbf16>
    %279 = vector.shape_cast %278 : vector<1x56x16xbf16> to vector<56x16xbf16>
    %cst_202 = arith.constant dense<0.000000e+00> : vector<16x16xf32>
    %280 = tpu.matmul %277, %279, %cst_202 {dimension_numbers = #tpu.dot_dimension_numbers<[1], [0], [0], [1], [0, 0, 1, 1], [], []>} : vector<16x56xbf16>, vector<56x16xbf16>, vector<16x16xf32> -> vector<16x16xf32>
    %c1_203 = arith.constant 1 : index
    %c0_204 = arith.constant 0 : index
    %c0_205 = arith.constant 0 : index
    %281 = vector.load %arg7[%c1_203, %c0_204, %c0_205] : memref<4x56x16xbf16, #tpu.memory_space<vmem>>, vector<1x56x16xbf16>
    %282 = vector.shape_cast %281 : vector<1x56x16xbf16> to vector<56x16xbf16>
    %cst_206 = arith.constant dense<0.000000e+00> : vector<16x16xf32>
    %283 = tpu.matmul %277, %282, %cst_206 {dimension_numbers = #tpu.dot_dimension_numbers<[1], [0], [0], [1], [0, 0, 1, 1], [], []>} : vector<16x56xbf16>, vector<56x16xbf16>, vector<16x16xf32> -> vector<16x16xf32>
    %284 = arith.maximumf %280, %283 : vector<16x16xf32>
    %c2_207 = arith.constant 2 : index
    %c0_208 = arith.constant 0 : index
    %c0_209 = arith.constant 0 : index
    %285 = vector.load %arg7[%c2_207, %c0_208, %c0_209] : memref<4x56x16xbf16, #tpu.memory_space<vmem>>, vector<1x56x16xbf16>
    %286 = vector.shape_cast %285 : vector<1x56x16xbf16> to vector<56x16xbf16>
    %cst_210 = arith.constant dense<0.000000e+00> : vector<16x16xf32>
    %287 = tpu.matmul %277, %286, %cst_210 {dimension_numbers = #tpu.dot_dimension_numbers<[1], [0], [0], [1], [0, 0, 1, 1], [], []>} : vector<16x56xbf16>, vector<56x16xbf16>, vector<16x16xf32> -> vector<16x16xf32>
    %288 = arith.maximumf %284, %287 : vector<16x16xf32>
    %c3_211 = arith.constant 3 : index
    %c0_212 = arith.constant 0 : index
    %c0_213 = arith.constant 0 : index
    %289 = vector.load %arg7[%c3_211, %c0_212, %c0_213] : memref<4x56x16xbf16, #tpu.memory_space<vmem>>, vector<1x56x16xbf16>
    %290 = vector.shape_cast %289 : vector<1x56x16xbf16> to vector<56x16xbf16>
    %cst_214 = arith.constant dense<0.000000e+00> : vector<16x16xf32>
    %291 = tpu.matmul %277, %290, %cst_214 {dimension_numbers = #tpu.dot_dimension_numbers<[1], [0], [0], [1], [0, 0, 1, 1], [], []>} : vector<16x56xbf16>, vector<56x16xbf16>, vector<16x16xf32> -> vector<16x16xf32>
    %292 = arith.maximumf %288, %291 : vector<16x16xf32>
    %293 = arith.truncf %292 : vector<16x16xf32> to vector<16x16xbf16>
    %294 = vector.extract_strided_slice %293 {offsets = [0, 0], sizes = [1, 16], strides = [1, 1]} : vector<16x16xbf16> to vector<1x16xbf16>
    %c0_215 = arith.constant 0 : index
    %c0_216 = arith.constant 0 : index
    %c0_217 = arith.constant 0 : index
    %295 = vector.load %arg8[%c0_215, %c0_216, %c0_217] : memref<16x16x512xbf16, #tpu.memory_space<vmem>>, vector<1x16x512xbf16>
    %296 = vector.shape_cast %295 : vector<1x16x512xbf16> to vector<16x512xbf16>
    %cst_218 = arith.constant dense<0.000000e+00> : vector<1x512xf32>
    %297 = tpu.matmul %294, %296, %cst_218 {dimension_numbers = #tpu.dot_dimension_numbers<[1], [0], [0], [1], [0, 0, 1, 1], [], []>} : vector<1x16xbf16>, vector<16x512xbf16>, vector<1x512xf32> -> vector<1x512xf32>
    %298 = vector.extract_strided_slice %293 {offsets = [1, 0], sizes = [1, 16], strides = [1, 1]} : vector<16x16xbf16> to vector<1x16xbf16>
    %c1_219 = arith.constant 1 : index
    %c0_220 = arith.constant 0 : index
    %c0_221 = arith.constant 0 : index
    %299 = vector.load %arg8[%c1_219, %c0_220, %c0_221] : memref<16x16x512xbf16, #tpu.memory_space<vmem>>, vector<1x16x512xbf16>
    %300 = vector.shape_cast %299 : vector<1x16x512xbf16> to vector<16x512xbf16>
    %cst_222 = arith.constant dense<0.000000e+00> : vector<1x512xf32>
    %301 = tpu.matmul %298, %300, %cst_222 {dimension_numbers = #tpu.dot_dimension_numbers<[1], [0], [0], [1], [0, 0, 1, 1], [], []>} : vector<1x16xbf16>, vector<16x512xbf16>, vector<1x512xf32> -> vector<1x512xf32>
    %302 = arith.addf %297, %301 : vector<1x512xf32>
    %303 = vector.extract_strided_slice %293 {offsets = [2, 0], sizes = [1, 16], strides = [1, 1]} : vector<16x16xbf16> to vector<1x16xbf16>
    %c2_223 = arith.constant 2 : index
    %c0_224 = arith.constant 0 : index
    %c0_225 = arith.constant 0 : index
    %304 = vector.load %arg8[%c2_223, %c0_224, %c0_225] : memref<16x16x512xbf16, #tpu.memory_space<vmem>>, vector<1x16x512xbf16>
    %305 = vector.shape_cast %304 : vector<1x16x512xbf16> to vector<16x512xbf16>
    %cst_226 = arith.constant dense<0.000000e+00> : vector<1x512xf32>
    %306 = tpu.matmul %303, %305, %cst_226 {dimension_numbers = #tpu.dot_dimension_numbers<[1], [0], [0], [1], [0, 0, 1, 1], [], []>} : vector<1x16xbf16>, vector<16x512xbf16>, vector<1x512xf32> -> vector<1x512xf32>
    %307 = arith.addf %302, %306 : vector<1x512xf32>
    %308 = vector.extract_strided_slice %293 {offsets = [3, 0], sizes = [1, 16], strides = [1, 1]} : vector<16x16xbf16> to vector<1x16xbf16>
    %c3_227 = arith.constant 3 : index
    %c0_228 = arith.constant 0 : index
    %c0_229 = arith.constant 0 : index
    %309 = vector.load %arg8[%c3_227, %c0_228, %c0_229] : memref<16x16x512xbf16, #tpu.memory_space<vmem>>, vector<1x16x512xbf16>
    %310 = vector.shape_cast %309 : vector<1x16x512xbf16> to vector<16x512xbf16>
    %cst_230 = arith.constant dense<0.000000e+00> : vector<1x512xf32>
    %311 = tpu.matmul %308, %310, %cst_230 {dimension_numbers = #tpu.dot_dimension_numbers<[1], [0], [0], [1], [0, 0, 1, 1], [], []>} : vector<1x16xbf16>, vector<16x512xbf16>, vector<1x512xf32> -> vector<1x512xf32>
    %312 = arith.addf %307, %311 : vector<1x512xf32>
    %313 = vector.extract_strided_slice %293 {offsets = [4, 0], sizes = [1, 16], strides = [1, 1]} : vector<16x16xbf16> to vector<1x16xbf16>
    %c4_231 = arith.constant 4 : index
    %c0_232 = arith.constant 0 : index
    %c0_233 = arith.constant 0 : index
    %314 = vector.load %arg8[%c4_231, %c0_232, %c0_233] : memref<16x16x512xbf16, #tpu.memory_space<vmem>>, vector<1x16x512xbf16>
    %315 = vector.shape_cast %314 : vector<1x16x512xbf16> to vector<16x512xbf16>
    %cst_234 = arith.constant dense<0.000000e+00> : vector<1x512xf32>
    %316 = tpu.matmul %313, %315, %cst_234 {dimension_numbers = #tpu.dot_dimension_numbers<[1], [0], [0], [1], [0, 0, 1, 1], [], []>} : vector<1x16xbf16>, vector<16x512xbf16>, vector<1x512xf32> -> vector<1x512xf32>
    %317 = arith.addf %312, %316 : vector<1x512xf32>
    %318 = vector.extract_strided_slice %293 {offsets = [5, 0], sizes = [1, 16], strides = [1, 1]} : vector<16x16xbf16> to vector<1x16xbf16>
    %c5_235 = arith.constant 5 : index
    %c0_236 = arith.constant 0 : index
    %c0_237 = arith.constant 0 : index
    %319 = vector.load %arg8[%c5_235, %c0_236, %c0_237] : memref<16x16x512xbf16, #tpu.memory_space<vmem>>, vector<1x16x512xbf16>
    %320 = vector.shape_cast %319 : vector<1x16x512xbf16> to vector<16x512xbf16>
    %cst_238 = arith.constant dense<0.000000e+00> : vector<1x512xf32>
    %321 = tpu.matmul %318, %320, %cst_238 {dimension_numbers = #tpu.dot_dimension_numbers<[1], [0], [0], [1], [0, 0, 1, 1], [], []>} : vector<1x16xbf16>, vector<16x512xbf16>, vector<1x512xf32> -> vector<1x512xf32>
    %322 = arith.addf %317, %321 : vector<1x512xf32>
    %323 = vector.extract_strided_slice %293 {offsets = [6, 0], sizes = [1, 16], strides = [1, 1]} : vector<16x16xbf16> to vector<1x16xbf16>
    %c6_239 = arith.constant 6 : index
    %c0_240 = arith.constant 0 : index
    %c0_241 = arith.constant 0 : index
    %324 = vector.load %arg8[%c6_239, %c0_240, %c0_241] : memref<16x16x512xbf16, #tpu.memory_space<vmem>>, vector<1x16x512xbf16>
    %325 = vector.shape_cast %324 : vector<1x16x512xbf16> to vector<16x512xbf16>
    %cst_242 = arith.constant dense<0.000000e+00> : vector<1x512xf32>
    %326 = tpu.matmul %323, %325, %cst_242 {dimension_numbers = #tpu.dot_dimension_numbers<[1], [0], [0], [1], [0, 0, 1, 1], [], []>} : vector<1x16xbf16>, vector<16x512xbf16>, vector<1x512xf32> -> vector<1x512xf32>
    %327 = arith.addf %322, %326 : vector<1x512xf32>
    %328 = vector.extract_strided_slice %293 {offsets = [7, 0], sizes = [1, 16], strides = [1, 1]} : vector<16x16xbf16> to vector<1x16xbf16>
    %c7_243 = arith.constant 7 : index
    %c0_244 = arith.constant 0 : index
    %c0_245 = arith.constant 0 : index
    %329 = vector.load %arg8[%c7_243, %c0_244, %c0_245] : memref<16x16x512xbf16, #tpu.memory_space<vmem>>, vector<1x16x512xbf16>
    %330 = vector.shape_cast %329 : vector<1x16x512xbf16> to vector<16x512xbf16>
    %cst_246 = arith.constant dense<0.000000e+00> : vector<1x512xf32>
    %331 = tpu.matmul %328, %330, %cst_246 {dimension_numbers = #tpu.dot_dimension_numbers<[1], [0], [0], [1], [0, 0, 1, 1], [], []>} : vector<1x16xbf16>, vector<16x512xbf16>, vector<1x512xf32> -> vector<1x512xf32>
    %332 = arith.addf %327, %331 : vector<1x512xf32>
    %333 = vector.extract_strided_slice %293 {offsets = [8, 0], sizes = [1, 16], strides = [1, 1]} : vector<16x16xbf16> to vector<1x16xbf16>
    %c8_247 = arith.constant 8 : index
    %c0_248 = arith.constant 0 : index
    %c0_249 = arith.constant 0 : index
    %334 = vector.load %arg8[%c8_247, %c0_248, %c0_249] : memref<16x16x512xbf16, #tpu.memory_space<vmem>>, vector<1x16x512xbf16>
    %335 = vector.shape_cast %334 : vector<1x16x512xbf16> to vector<16x512xbf16>
    %cst_250 = arith.constant dense<0.000000e+00> : vector<1x512xf32>
    %336 = tpu.matmul %333, %335, %cst_250 {dimension_numbers = #tpu.dot_dimension_numbers<[1], [0], [0], [1], [0, 0, 1, 1], [], []>} : vector<1x16xbf16>, vector<16x512xbf16>, vector<1x512xf32> -> vector<1x512xf32>
    %337 = arith.addf %332, %336 : vector<1x512xf32>
    %338 = vector.extract_strided_slice %293 {offsets = [9, 0], sizes = [1, 16], strides = [1, 1]} : vector<16x16xbf16> to vector<1x16xbf16>
    %c9_251 = arith.constant 9 : index
    %c0_252 = arith.constant 0 : index
    %c0_253 = arith.constant 0 : index
    %339 = vector.load %arg8[%c9_251, %c0_252, %c0_253] : memref<16x16x512xbf16, #tpu.memory_space<vmem>>, vector<1x16x512xbf16>
    %340 = vector.shape_cast %339 : vector<1x16x512xbf16> to vector<16x512xbf16>
    %cst_254 = arith.constant dense<0.000000e+00> : vector<1x512xf32>
    %341 = tpu.matmul %338, %340, %cst_254 {dimension_numbers = #tpu.dot_dimension_numbers<[1], [0], [0], [1], [0, 0, 1, 1], [], []>} : vector<1x16xbf16>, vector<16x512xbf16>, vector<1x512xf32> -> vector<1x512xf32>
    %342 = arith.addf %337, %341 : vector<1x512xf32>
    %343 = vector.extract_strided_slice %293 {offsets = [10, 0], sizes = [1, 16], strides = [1, 1]} : vector<16x16xbf16> to vector<1x16xbf16>
    %c10_255 = arith.constant 10 : index
    %c0_256 = arith.constant 0 : index
    %c0_257 = arith.constant 0 : index
    %344 = vector.load %arg8[%c10_255, %c0_256, %c0_257] : memref<16x16x512xbf16, #tpu.memory_space<vmem>>, vector<1x16x512xbf16>
    %345 = vector.shape_cast %344 : vector<1x16x512xbf16> to vector<16x512xbf16>
    %cst_258 = arith.constant dense<0.000000e+00> : vector<1x512xf32>
    %346 = tpu.matmul %343, %345, %cst_258 {dimension_numbers = #tpu.dot_dimension_numbers<[1], [0], [0], [1], [0, 0, 1, 1], [], []>} : vector<1x16xbf16>, vector<16x512xbf16>, vector<1x512xf32> -> vector<1x512xf32>
    %347 = arith.addf %342, %346 : vector<1x512xf32>
    %348 = vector.extract_strided_slice %293 {offsets = [11, 0], sizes = [1, 16], strides = [1, 1]} : vector<16x16xbf16> to vector<1x16xbf16>
    %c11_259 = arith.constant 11 : index
    %c0_260 = arith.constant 0 : index
    %c0_261 = arith.constant 0 : index
    %349 = vector.load %arg8[%c11_259, %c0_260, %c0_261] : memref<16x16x512xbf16, #tpu.memory_space<vmem>>, vector<1x16x512xbf16>
    %350 = vector.shape_cast %349 : vector<1x16x512xbf16> to vector<16x512xbf16>
    %cst_262 = arith.constant dense<0.000000e+00> : vector<1x512xf32>
    %351 = tpu.matmul %348, %350, %cst_262 {dimension_numbers = #tpu.dot_dimension_numbers<[1], [0], [0], [1], [0, 0, 1, 1], [], []>} : vector<1x16xbf16>, vector<16x512xbf16>, vector<1x512xf32> -> vector<1x512xf32>
    %352 = arith.addf %347, %351 : vector<1x512xf32>
    %353 = vector.extract_strided_slice %293 {offsets = [12, 0], sizes = [1, 16], strides = [1, 1]} : vector<16x16xbf16> to vector<1x16xbf16>
    %c12_263 = arith.constant 12 : index
    %c0_264 = arith.constant 0 : index
    %c0_265 = arith.constant 0 : index
    %354 = vector.load %arg8[%c12_263, %c0_264, %c0_265] : memref<16x16x512xbf16, #tpu.memory_space<vmem>>, vector<1x16x512xbf16>
    %355 = vector.shape_cast %354 : vector<1x16x512xbf16> to vector<16x512xbf16>
    %cst_266 = arith.constant dense<0.000000e+00> : vector<1x512xf32>
    %356 = tpu.matmul %353, %355, %cst_266 {dimension_numbers = #tpu.dot_dimension_numbers<[1], [0], [0], [1], [0, 0, 1, 1], [], []>} : vector<1x16xbf16>, vector<16x512xbf16>, vector<1x512xf32> -> vector<1x512xf32>
    %357 = arith.addf %352, %356 : vector<1x512xf32>
    %358 = vector.extract_strided_slice %293 {offsets = [13, 0], sizes = [1, 16], strides = [1, 1]} : vector<16x16xbf16> to vector<1x16xbf16>
    %c13_267 = arith.constant 13 : index
    %c0_268 = arith.constant 0 : index
    %c0_269 = arith.constant 0 : index
    %359 = vector.load %arg8[%c13_267, %c0_268, %c0_269] : memref<16x16x512xbf16, #tpu.memory_space<vmem>>, vector<1x16x512xbf16>
    %360 = vector.shape_cast %359 : vector<1x16x512xbf16> to vector<16x512xbf16>
    %cst_270 = arith.constant dense<0.000000e+00> : vector<1x512xf32>
    %361 = tpu.matmul %358, %360, %cst_270 {dimension_numbers = #tpu.dot_dimension_numbers<[1], [0], [0], [1], [0, 0, 1, 1], [], []>} : vector<1x16xbf16>, vector<16x512xbf16>, vector<1x512xf32> -> vector<1x512xf32>
    %362 = arith.addf %357, %361 : vector<1x512xf32>
    %363 = vector.extract_strided_slice %293 {offsets = [14, 0], sizes = [1, 16], strides = [1, 1]} : vector<16x16xbf16> to vector<1x16xbf16>
    %c14_271 = arith.constant 14 : index
    %c0_272 = arith.constant 0 : index
    %c0_273 = arith.constant 0 : index
    %364 = vector.load %arg8[%c14_271, %c0_272, %c0_273] : memref<16x16x512xbf16, #tpu.memory_space<vmem>>, vector<1x16x512xbf16>
    %365 = vector.shape_cast %364 : vector<1x16x512xbf16> to vector<16x512xbf16>
    %cst_274 = arith.constant dense<0.000000e+00> : vector<1x512xf32>
    %366 = tpu.matmul %363, %365, %cst_274 {dimension_numbers = #tpu.dot_dimension_numbers<[1], [0], [0], [1], [0, 0, 1, 1], [], []>} : vector<1x16xbf16>, vector<16x512xbf16>, vector<1x512xf32> -> vector<1x512xf32>
    %367 = arith.addf %362, %366 : vector<1x512xf32>
    %368 = vector.extract_strided_slice %293 {offsets = [15, 0], sizes = [1, 16], strides = [1, 1]} : vector<16x16xbf16> to vector<1x16xbf16>
    %c15_275 = arith.constant 15 : index
    %c0_276 = arith.constant 0 : index
    %c0_277 = arith.constant 0 : index
    %369 = vector.load %arg8[%c15_275, %c0_276, %c0_277] : memref<16x16x512xbf16, #tpu.memory_space<vmem>>, vector<1x16x512xbf16>
    %370 = vector.shape_cast %369 : vector<1x16x512xbf16> to vector<16x512xbf16>
    %cst_278 = arith.constant dense<0.000000e+00> : vector<1x512xf32>
    %371 = tpu.matmul %368, %370, %cst_278 {dimension_numbers = #tpu.dot_dimension_numbers<[1], [0], [0], [1], [0, 0, 1, 1], [], []>} : vector<1x16xbf16>, vector<16x512xbf16>, vector<1x512xf32> -> vector<1x512xf32>
    %372 = arith.addf %367, %371 : vector<1x512xf32>
    %c0_279 = arith.constant 0 : index
    %c0_280 = arith.constant 0 : index
    %373 = vector.load %arg9[%c0_279, %c0_280] : memref<1x512xf32, #tpu.memory_space<vmem>>, vector<1x512xf32>
    %374 = arith.addf %372, %373 : vector<1x512xf32>
    %cst_281 = arith.constant 0.000000e+00 : f32
    %375 = vector.broadcast %cst_281 : f32 to vector<1x512xf32>
    %376 = arith.maximumf %374, %375 : vector<1x512xf32>
    %377 = arith.truncf %376 : vector<1x512xf32> to vector<1x512xbf16>
    %c0_282 = arith.constant 0 : index
    %c0_283 = arith.constant 0 : index
    %378 = vector.load %arg10[%c0_282, %c0_283] : memref<512x10xbf16, #tpu.memory_space<vmem>>, vector<512x10xbf16>
    %cst_284 = arith.constant dense<0.000000e+00> : vector<1x10xf32>
    %379 = tpu.matmul %377, %378, %cst_284 {dimension_numbers = #tpu.dot_dimension_numbers<[1], [0], [0], [1], [0, 0, 1, 1], [], []>} : vector<1x512xbf16>, vector<512x10xbf16>, vector<1x10xf32> -> vector<1x10xf32>
    %c0_285 = arith.constant 0 : index
    %c0_286 = arith.constant 0 : index
    %380 = vector.load %arg11[%c0_285, %c0_286] : memref<1x10xf32, #tpu.memory_space<vmem>>, vector<1x10xf32>
    %381 = arith.addf %379, %380 : vector<1x10xf32>
    %c0_287 = arith.constant 0 : index
    %c0_288 = arith.constant 0 : index
    %c0_289 = arith.constant 0 : index
    %382 = vector.load %arg12[%c0_287, %c0_288, %c0_289] : memref<1x1x10xf32, #tpu.memory_space<vmem>>, vector<1x1x10xf32>
    %383 = vector.shape_cast %382 : vector<1x1x10xf32> to vector<1x10xf32>
    %384 = vector.shape_cast %381 : vector<1x10xf32> to vector<1x1x10xf32>
    tpu.vector_store %arg12[%c0_287, %c0_288, %c0_289], %384 {strides = array<i32>} : memref<1x1x10xf32, #tpu.memory_space<vmem>>, vector<1x1x10xf32>,
    return
  }
  func.func @transform_0(%arg0: i32) -> (i32, i32, i32) {
    %c0_i32 = arith.constant 0 : i32
    %c0_i32_0 = arith.constant 0 : i32
    %c0_i32_1 = arith.constant 0 : i32
    return %arg0, %c0_i32, %c0_i32_0 : i32, i32, i32
  }
  func.func @transform_1(%arg0: i32) -> (i32, i32, i32) {
    %c0_i32 = arith.constant 0 : i32
    %c0_i32_0 = arith.constant 0 : i32
    %c0_i32_1 = arith.constant 0 : i32
    %c0_i32_2 = arith.constant 0 : i32
    return %c0_i32, %c0_i32_0, %c0_i32_1 : i32, i32, i32
  }
  func.func @transform_2(%arg0: i32) -> (i32, i32) {
    %c0_i32 = arith.constant 0 : i32
    %c0_i32_0 = arith.constant 0 : i32
    %c0_i32_1 = arith.constant 0 : i32
    return %c0_i32, %c0_i32_0 : i32, i32
  }
  func.func @transform_3(%arg0: i32) -> (i32, i32, i32) {
    %c0_i32 = arith.constant 0 : i32
    %c0_i32_0 = arith.constant 0 : i32
    %c0_i32_1 = arith.constant 0 : i32
    %c0_i32_2 = arith.constant 0 : i32
    return %c0_i32, %c0_i32_0, %c0_i32_1 : i32, i32, i32
  }
  func.func @transform_4(%arg0: i32) -> (i32, i32, i32) {
    %c0_i32 = arith.constant 0 : i32
    %c0_i32_0 = arith.constant 0 : i32
    %c0_i32_1 = arith.constant 0 : i32
    %c0_i32_2 = arith.constant 0 : i32
    return %c0_i32, %c0_i32_0, %c0_i32_1 : i32, i32, i32
  }
  func.func @transform_5(%arg0: i32) -> (i32, i32) {
    %c0_i32 = arith.constant 0 : i32
    %c0_i32_0 = arith.constant 0 : i32
    %c0_i32_1 = arith.constant 0 : i32
    return %c0_i32, %c0_i32_0 : i32, i32
  }
  func.func @transform_6(%arg0: i32) -> (i32, i32, i32) {
    %c0_i32 = arith.constant 0 : i32
    %c0_i32_0 = arith.constant 0 : i32
    %c0_i32_1 = arith.constant 0 : i32
    %c0_i32_2 = arith.constant 0 : i32
    return %c0_i32, %c0_i32_0, %c0_i32_1 : i32, i32, i32
  }
  func.func @transform_7(%arg0: i32) -> (i32, i32, i32) {
    %c0_i32 = arith.constant 0 : i32
    %c0_i32_0 = arith.constant 0 : i32
    %c0_i32_1 = arith.constant 0 : i32
    %c0_i32_2 = arith.constant 0 : i32
    return %c0_i32, %c0_i32_0, %c0_i32_1 : i32, i32, i32
  }
  func.func @transform_8(%arg0: i32) -> (i32, i32) {
    %c0_i32 = arith.constant 0 : i32
    %c0_i32_0 = arith.constant 0 : i32
    %c0_i32_1 = arith.constant 0 : i32
    return %c0_i32, %c0_i32_0 : i32, i32
  }
  func.func @transform_9(%arg0: i32) -> (i32, i32) {
    %c0_i32 = arith.constant 0 : i32
    %c0_i32_0 = arith.constant 0 : i32
    %c0_i32_1 = arith.constant 0 : i32
    return %c0_i32, %c0_i32_0 : i32, i32
  }
  func.func @transform_10(%arg0: i32) -> (i32, i32) {
    %c0_i32 = arith.constant 0 : i32
    %c0_i32_0 = arith.constant 0 : i32
    %c0_i32_1 = arith.constant 0 : i32
    return %c0_i32, %c0_i32_0 : i32, i32
  }
  func.func @transform_11(%arg0: i32) -> (i32, i32, i32) {
    %c0_i32 = arith.constant 0 : i32
    %c0_i32_0 = arith.constant 0 : i32
    %c0_i32_1 = arith.constant 0 : i32
    return %arg0, %c0_i32, %c0_i32_0 : i32, i32, i32
  }
}

</mosaic_0001>

<bundles_post_ra>
// kernel: two_cnn_forward.1
= control target key start
LH: loop header
LB: loop body
LE: loop exit
PB: predicated region body
PF: predicated region fallthrough
CT: control target
= control target key end

     0   :  { %s9430_s0 = inlined_call_operand.vmem [shape: bf16[2,8,324], index: 0, kind: input, shape index: {}]   ;;  %s9431_s1 = inlined_call_operand.vmem [shape: bf16[25,8,8], index: 1, kind: input, shape index: {}]   ;;  %s9432_s2 = inlined_call_operand.vmem [shape: f32[8,1], index: 2, kind: input, shape index: {}]   ;;  %s9433_s3 = inlined_call_operand.vmem [shape: bf16[4,248,128], index: 3, kind: input, shape index: {}]   ;;  %s9434_s4 = inlined_call_operand.vmem [shape: bf16[25,16,8], index: 4, kind: input, shape index: {}]   ;;  %s9435_s5 = inlined_call_operand.vmem [shape: f32[16,1], index: 5, kind: input, shape index: {}]   ;;  %s9436_s6 = inlined_call_operand.vmem [shape: bf16[4,56,16], index: 6, kind: input, shape index: {}]   ;;  %s9437_s7 = inlined_call_operand.vmem [shape: bf16[16,16,512], index: 7, kind: input, shape index: {}]   ;;  %s9438_s8 = inlined_call_operand.vmem [shape: f32[1,512], index: 8, kind: input, shape index: {}]   ;;  %s9439_s9 = inlined_call_operand.vmem [shape: bf16[512,10], index: 9, kind: input, shape index: {}]   ;;  %s9440_s10 = inlined_call_operand.vmem [shape: f32[1,10], index: 10, kind: input, shape index: {}]   ;;  %s9441_s11 = inlined_call_operand.hbm [shape: f32[2,1,10], index: 11, kind: output, shape index: {}]  }
   0x1   :  { %9450 = sst [smem:[#allocation5_spill]] %s9430_s0 }
   0x2   :  { %9451 = sst [smem:[#allocation6_spill]] %s9431_s1 }
   0x3   :  { %16 = vsyncpa [#allocation3], 0 }
   0x4   :  { %18 = vsyncpa [#allocation3 + $0x1], 0  ;;  %s8165_s17 = smov 0   ;;  %s8167_s18 = smov 0  }
   0x5   :  { %s8169_s19 = smov 0   ;;  %s8171_s20 = smov 0  }
   0x6 LB: > { %s8186_s21 = sadd.s32 4294967295, %s8059_s20   ;;  %s6699_s22 = sadd.s32 4294967294, %s8059_s20   ;;  %s8059_s20 = sphi %s8171_s20, %s9467_s20   ;;  %s8055_s19 = sphi %s8169_s19, %s9466_s19   ;;  %s8051_s18 = sphi %s8167_s18, %s9465_s18   ;;  %s8047_s17 = sphi %s8165_s17, %s9464_s17  }
   0x7   : > { %s8190_s23 = sadd.s32 1, %s8059_s20   ;;  %s267_s24 = sadd.s32 1, %s8055_s19 }
   0x8   : > { %s264_s25 = ssub.s32 %s8059_s20, %s8190_s23  ;;  %p277_p0 = scmp.ne.s32.totalorder %s8055_s19, %s8051_s18 }
   0x9   : > { %p265_p1 = scmp.eq.s32.totalorder %s264_s25, 0  ;;  %p278_p2 = scmp.eq.s32.totalorder %s8186_s21, 1 }
   0xa   : > { %p283_p3 = scmp.ne.s32.totalorder %s8051_s18, %s8047_s17  ;;  %p284_p4 = scmp.eq.s32.totalorder %s6699_s22, 1 }
   0xb   : > { %s8201_s26 = scalar_select %p265_p1, %s8055_s19, %s267_s24  }
   0xc   : > { %p8203_p5 = por %p278_p2, %p277_p0  ;;  %p8207_p6 = por %p284_p4, %p283_p3 }
   0xd   : > { %p6702_p7 = scmp.ge.s32.totalorder %s8059_s20, 1  ;;  %p340_p8 = scmp.lt.s32.totalorder %s8059_s20, 3 }
   0xf   : > { %p341_p9 = pnand %p6702_p7, %p340_p8 }
  0x10   : > { %p379_p10 = scmp.lt.s32.totalorder (!%p341_p9), %s8186_s21, 1  ;;  %v8061_v0 = vmov (!%p341_p9), 0   ;;  %s9454_s0 = sld [smem:[#allocation5_spill]] (!%p341_p9)  ;;  %vm405_vm0 = vcmask (!%p341_p9), 1043456   ;;  %vm401_vm1 = vcmask (!%p341_p9), 64512   ;;  %vm399_vm2 = vcmask (!%p341_p9), 1039360  }
  0x11   : > { %344 = sbr.rel (%p341_p9) target bundleno = 2009 (0x7d9), region = 64  ;;  %444 = vmatprep.mubr.bf16.mxu0 (!%p341_p9), %v8061_v0  ;;  %494 = vmatprep.mubr.bf16.mxu1 (!%p341_p9), %v8061_v0  ;;  %s9447_s15 = smov (!%p341_p9), 126   ;;  %vm509_vm3 = vcmask (!%p341_p9), 1031168   ;;  %vm569_vm4 = vcmask (!%p341_p9), 1022976   ;;  %vm629_vm5 = vcmask (!%p341_p9), 1014784   ;;  %vm694_vm6 = vcmask (!%p341_p9), 900096  }
  0x12   : > { %7759 = vset.pattern.permute.xlu0 (!%p341_p9), %v8061_v0  ;;  %7760 = vset.pattern.permute.xlu1 (!%p341_p9), %v8061_v0  ;;  %s9448_s16 = smov (!%p341_p9), 127   ;;  %s9455_s1 = sld [smem:[#allocation6_spill]] (!%p341_p9)  ;;  %v1946_v29 = vld [vmem:[%s9432_s2] sm:$0xff] (!%p341_p9)  ;;  %vm757_vm7 = vcmask (!%p341_p9), 891904   ;;  %vm820_vm8 = vcmask (!%p341_p9), 883712   ;;  %vm883_vm9 = vcmask (!%p341_p9), 875520  }
  0x13   : > { %s9449_s25 = smov (!%p341_p9), 125   ;;  %s8067_s12 = smov (!%p341_p9), 109   ;;  %vm946_vm10 = vcmask (!%p341_p9), 867328   ;;  %vm1009_vm11 = vcmask (!%p341_p9), 752640   ;;  %vm1072_vm12 = vcmask (!%p341_p9), 744448   ;;  %vm1135_vm13 = vcmask (!%p341_p9), 736256  }
  0x14   : > { %s9442_s13 = smov (!%p341_p9), 108   ;;  %s9444_s22 = smov (!%p341_p9), 106   ;;  %vm1198_vm14 = vcmask (!%p341_p9), 728064   ;;  %vm1261_vm15 = vcmask (!%p341_p9), 719872  }
  0x15   : > { %s8071_s24 = smov (!%p341_p9), 92  }
  0x18   : > { %s380_s29 = scalar_select %p379_p10, %s8186_s21, 1  ;;  %v387_v5 = vld [vmem:[%s9455_s1] sm:$0xf]  ;;  %v6704_v13 = vld [vmem:[%s9455_s1 + $0x4] sm:$0xf] }
  0x19   : > { %v6714_v22 = vld [vmem:[%s9455_s1 + $0xc] sm:$0xf]  ;;  %v6711_v26 = vld [vmem:[%s9455_s1 + $0x8] sm:$0xf]  ;;  %v6720_v34 = vld [vmem:[%s9455_s1 + $0x14] sm:$0xf] }
  0x1a   : > { %s7676_s30 = smul.u32 12, %s380_s29  ;;  %s9446_s29 = smov 124   ;;  %v6717_v37 = vld [vmem:[%s9455_s1 + $0x10] sm:$0xf]  ;;  %v6724_v46 = vld [vmem:[%s9455_s1 + $0x18] sm:$0xf] }
  0x1b   : > { %v6727_v49 = vld [vmem:[%s9455_s1 + $0x1c] sm:$0xf]  ;;  %v6730_v57 = vld [vmem:[%s9455_s1 + $0x20] sm:$0xf]  ;;  %v6733_v63 = vld [vmem:[%s9455_s1 + $0x24] sm:$0xf] }
  0x1c   : > { %s383_s14 = scalar_lea.vmem %s9454_s0, %s7676_s30  ;;  %s8066_s30 = smov 110  }
  0x1d   : > { %v385_v1 = vld [vmem:[%s383_s14] sm:$0xff]  ;;  %v8251_v6 = vld [vmem:[%s383_s14 + $0x8] ss:$0 sps:$4 sm:$0xff]   ;;  %s9445_s14 = smov 107   ;;  %s9460_s0 = smov 107  }
  0x1e   : > { %v8222_v2 = vcombine.low %v385_v1, %v385_v1  ;;  %v8224_v3 = vcombine.high %v385_v1, %v385_v1 }
  0x20   : > { %505 = vrot.lane.b32.xlu1 %v8222_v2, %s9447_s15  ;;  %395 = vrot.lane.b32.xlu0 %v8222_v2, %s9448_s16  ;;  %v457_v4 = vsel %vm405_vm0, %v8222_v2, 0 }
  0x21   : > { %6709 = vmatprep.subr.msk.bf16.mxu1 %vm405_vm0, %v8224_v3 }
  0x22   : > { %463 = vmatpush1.bf16.msra.mxu1 %v457_v4 }
  0x24   : > { %507 = vrot.lane.b32.xlu1 %v8224_v3, %s9447_s15  ;;  %397 = vrot.lane.b32.xlu0 %v8224_v3, %s9448_s16  ;;  %s8089_s15 = smov 116   ;;  %s8090_s16 = smov 114  }
  0x25   : > { %6710 = vmatmul.mubr.msk.bf16.vlgmr.msra.gmra.mrb[0].mxu1 %vm401_vm1, %v387_v5 }
  0x26   : > { %612 = vmatprep.mubr.bf16.mxu1 %v8061_v0 }
  0x28   : > { %567 = vrot.lane.b32.xlu1 %v8224_v3, %s9449_s25  ;;  %565 = vrot.lane.b32.xlu0 %v8222_v2, %s9449_s25  ;;  %s8091_s25 = smov 117  }
  0x2c   : > { %627 = vrot.lane.b32.xlu1 %v8224_v3, %s9446_s29  ;;  %625 = vrot.lane.b32.xlu0 %v8222_v2, %s9446_s29  ;;  %s9459_s29 = smov 124  }
  0x30   : > { %690 = vrot.lane.b32.xlu1 %v8224_v3, %s8066_s30  ;;  %688 = vrot.lane.b32.xlu0 %v8222_v2, %s8066_s30 }
  0x34   : > { %751 = vrot.lane.b32.xlu1 %v8222_v2, %s8067_s12  ;;  %692 = vrot.lane.b32.xlu0 %v8251_v6, %s8066_s30  ;;  %s8072_s30 = smov 91  }
  0x38   : > { %755 = vrot.lane.b32.xlu1 %v8251_v6, %s8067_s12  ;;  %753 = vrot.lane.b32.xlu0 %v8224_v3, %s8067_s12  ;;  %s8073_s12 = smov 90  }
  0x3c   : > { %816 = vrot.lane.b32.xlu1 %v8224_v3, %s9442_s13  ;;  %814 = vrot.lane.b32.xlu0 %v8222_v2, %s9442_s13 }
  0x40   : > { %877 = vrot.lane.b32.xlu1 %v8222_v2, %s9445_s14  ;;  %818 = vrot.lane.b32.xlu0 %v8251_v6, %s9442_s13  ;;  %s8074_s13 = smov 89  }
  0x44   : > { %881 = vrot.lane.b32.xlu1 %v8251_v6, %s9445_s14  ;;  %879 = vrot.lane.b32.xlu0 %v8224_v3, %s9445_s14  ;;  %s8088_s14 = smov 118  }
  0x48   : > { %942 = vrot.lane.b32.xlu1 %v8224_v3, %s9444_s22  ;;  %940 = vrot.lane.b32.xlu0 %v8222_v2, %s9444_s22 }
  0x4c   : > { %1003 = vrot.lane.b32.xlu1 %v8222_v2, %s8071_s24  ;;  %944 = vrot.lane.b32.xlu0 %v8251_v6, %s9444_s22  ;;  %s8080_s22 = smov 70  }
  0x50   : > { %1007 = vrot.lane.b32.xlu1 %v8251_v6, %s8071_s24  ;;  %1005 = vrot.lane.b32.xlu0 %v8224_v3, %s8071_s24  ;;  %s9443_s24 = smov 88  }
  0x54   : > { %1068 = vrot.lane.b32.xlu1 %v8224_v3, %s8072_s30  ;;  %1066 = vrot.lane.b32.xlu0 %v8222_v2, %s8072_s30 }
  0x58   : > { %1129 = vrot.lane.b32.xlu1 %v8222_v2, %s8073_s12  ;;  %1070 = vrot.lane.b32.xlu0 %v8251_v6, %s8072_s30  ;;  %s8076_s30 = smov 74  }
  0x5c   : > { %1133 = vrot.lane.b32.xlu1 %v8251_v6, %s8073_s12  ;;  %1131 = vrot.lane.b32.xlu0 %v8224_v3, %s8073_s12  ;;  %s8077_s12 = smov 73  }
  0x60   : > { %1194 = vrot.lane.b32.xlu1 %v8224_v3, %s8074_s13  ;;  %1192 = vrot.lane.b32.xlu0 %v8222_v2, %s8074_s13 }
  0x64   : > { %1255 = vrot.lane.b32.xlu1 %v8222_v2, %s9443_s24  ;;  %1196 = vrot.lane.b32.xlu0 %v8251_v6, %s8074_s13  ;;  %s8078_s13 = smov 72  }
  0x68   : > { %1259 = vrot.lane.b32.xlu1 %v8251_v6, %s9443_s24  ;;  %1257 = vrot.lane.b32.xlu0 %v8224_v3, %s9443_s24  ;;  %s8079_s24 = smov 71  }
  0x6c   : > { %1320 = vrot.lane.b32.xlu1 %v8224_v3, %s8076_s30  ;;  %1318 = vrot.lane.b32.xlu0 %v8222_v2, %s8076_s30 }
  0x70   : > { %1381 = vrot.lane.b32.xlu1 %v8222_v2, %s8077_s12  ;;  %1322 = vrot.lane.b32.xlu0 %v8251_v6, %s8076_s30  ;;  %s8081_s30 = smov 56  }
  0x74   : > { %1385 = vrot.lane.b32.xlu1 %v8251_v6, %s8077_s12  ;;  %1383 = vrot.lane.b32.xlu0 %v8224_v3, %s8077_s12  ;;  %s8082_s12 = smov 55  }
  0x78   : > { %1446 = vrot.lane.b32.xlu1 %v8224_v3, %s8078_s13  ;;  %1444 = vrot.lane.b32.xlu0 %v8222_v2, %s8078_s13 }
  0x7c   : > { %1507 = vrot.lane.b32.xlu1 %v8222_v2, %s8079_s24  ;;  %1448 = vrot.lane.b32.xlu0 %v8251_v6, %s8078_s13  ;;  %s9457_s13 = smov 127  }
  0x80   : > { %1511 = vrot.lane.b32.xlu1 %v8251_v6, %s8079_s24  ;;  %1509 = vrot.lane.b32.xlu0 %v8224_v3, %s8079_s24  ;;  %s8083_s24 = smov 54  }
  0x84   : > { %1572 = vrot.lane.b32.xlu1 %v8224_v3, %s8080_s22  ;;  %1570 = vrot.lane.b32.xlu0 %v8222_v2, %s8080_s22 }
  0x88   : > { %1633 = vrot.lane.b32.xlu1 %v8222_v2, %s8081_s30  ;;  %1574 = vrot.lane.b32.xlu0 %v8251_v6, %s8080_s22  ;;  %s8085_s22 = smov 52  }
  0x8c   : > { %1637 = vrot.lane.b32.xlu1 %v8251_v6, %s8081_s30  ;;  %1635 = vrot.lane.b32.xlu0 %v8224_v3, %s8081_s30  ;;  %s8084_s30 = smov 53  }
  0x90   : > { %1698 = vrot.lane.b32.xlu1 %v8224_v3, %s8082_s12  ;;  %1696 = vrot.lane.b32.xlu0 %v8222_v2, %s8082_s12 }
  0x92   : > { %v506_v7 = vpop.permute.xlu1 %505  ;;  %v396_v8 = vpop.permute.xlu0 %395 }
  0x94   : > { %1759 = vrot.lane.b32.xlu1 %v8222_v2, %s8083_s24  ;;  %1700 = vrot.lane.b32.xlu0 %v8251_v6, %s8082_s12  ;;  %s9462_s12 = smov 106  }
  0x96   : > { %v508_v9 = vpop.permute.xlu1 %507  ;;  %v398_v10 = vpop.permute.xlu0 %397 }
  0x97   : > { %6707 = vmatprep.subr.msk.bf16.mxu0 %vm405_vm0, %v398_v10  ;;  %v400_v11 = vsel %vm399_vm2, %v396_v8, %v398_v10  ;;  %v510_v14 = vsel %vm509_vm3, %v506_v7, %v508_v9  ;;  %vm1324_vm2 = vcmask 605184   ;;  %vm1387_vm3 = vcmask 596992  }
  0x98   : > { %1763 = vrot.lane.b32.xlu1 %v8251_v6, %s8083_s24  ;;  %1761 = vrot.lane.b32.xlu0 %v8224_v3, %s8083_s24  ;;  %v407_v12 = vsel %vm405_vm0, %v400_v11, 0  ;;  %v515_v19 = vsel %vm405_vm0, %v510_v14, 0  ;;  %v6739_v14 = vld [vmem:[%s9455_s1 + $0x2c] sm:$0xf]  ;;  %s9458_s24 = smov 126  }
  0x99   : > { %413 = vmatpush1.bf16.msra.mxu0 %v407_v12 }
  0x9a   : > { %v568_v15 = vpop.permute.xlu1 %567  ;;  %6712 = vmatprep.subr.msk.bf16.mxu0 %vm405_vm0, %v508_v9  ;;  %v566_v16 = vpop.permute.xlu0 %565 }
  0x9b   : > { %v570_v17 = vsel %vm569_vm4, %v566_v16, %v568_v15  ;;  %6715 = vmatprep.subr.msk.bf16.mxu1 %vm405_vm0, %v568_v15  ;;  %vm1450_vm4 = vcmask 588800  }
  0x9c   : > { %v575_v18 = vsel %vm405_vm0, %v570_v17, 0  ;;  %1824 = vrot.lane.b32.xlu1 %v8224_v3, %s8084_s30  ;;  %1822 = vrot.lane.b32.xlu0 %v8222_v2, %s8084_s30 }
  0x9d   : > { %6708 = vmatmul.mubr.msk.bf16.vlgmr.msra.gmra.mrb[0].mxu0 %vm401_vm1, %v6704_v13  ;;  %581 = vmatpush1.bf16.msra.mxu1 %v575_v18 }
  0x9e   : > { %521 = vmatpush1.bf16.msra.mxu0 %v515_v19  ;;  %v628_v20 = vpop.permute.xlu1 %627  ;;  %v626_v21 = vpop.permute.xlu0 %625  ;;  %552 = vmatprep.mubr.bf16.mxu0 %v8061_v0 }
  0x9f   : > { %6718 = vmatprep.subr.msk.bf16.mxu0 %vm405_vm0, %v628_v20  ;;  %v630_v23 = vsel %vm629_vm5, %v626_v21, %v628_v20  ;;  %v6742_v20 = vld [vmem:[%s9455_s1 + $0x30] sm:$0xf]  ;;  %vm1513_vm5 = vcmask 580608  }
  0xa0   : > { %1885 = vrot.lane.b32.xlu1 %v8222_v2, %s8085_s22  ;;  %1826 = vrot.lane.b32.xlu0 %v8251_v6, %s8084_s30  ;;  %v635_v27 = vsel %vm405_vm0, %v630_v23, 0  ;;  %s8094_s30 = smov 98  }
  0xa1   : > { %6716 = vmatmul.mubr.msk.bf16.vlgmr.msra.gmra.mrb[4].mxu1 %vm401_vm1, %v6714_v22 }
  0xa2   : > { %v691_v24 = vpop.permute.xlu1 %690  ;;  %v689_v25 = vpop.permute.xlu0 %688  ;;  %738 = vmatprep.mubr.bf16.mxu1 %v8061_v0 }
  0xa3   : > { %v695_v28 = vsel %vm694_vm6, %v689_v25, %v691_v24 }
  0xa4   : > { %1889 = vrot.lane.b32.xlu1 %v8251_v6, %s8085_s22  ;;  %1887 = vrot.lane.b32.xlu0 %v8224_v3, %s8085_s22  ;;  %v701_v33 = vsel %vm405_vm0, %v695_v28, 0  ;;  %v6736_v6 = vld [vmem:[%s9455_s1 + $0x28] sm:$0xf]  ;;  %v6745_v28 = vld [vmem:[%s9455_s1 + $0x34] sm:$0xf]  ;;  %s9456_s22 = smov 125  }
  0xa5   : > { %6713 = vmatmul.mubr.msk.bf16.vlgmr.msra.gmra.mrb[4].mxu0 %vm401_vm1, %v6711_v26 }
  0xa6   : > { %641 = vmatpush1.bf16.msra.mxu0 %v635_v27  ;;  %v752_v30 = vpop.permute.xlu1 %751  ;;  %v693_v31 = vpop.permute.xlu0 %692  ;;  %672 = vmatprep.mubr.bf16.mxu0 %v8061_v0 }
  0xa7   : > { %v696_v32 = vsel %vm694_vm6, %v691_v24, %v693_v31  ;;  %vm1576_vm6 = vcmask 572416  }
  0xa8   : > { %6722 = vmatprep.subr.msk.bf16.mxu1 %vm405_vm0, %v696_v32  ;;  %1949 = vperm.xlu0 %7759, %v1946_v29  }
  0xa9   : > { %707 = vmatpush1.bf16.msra.mxu1 %v701_v33 }
  0xaa   : > { %v756_v35 = vpop.permute.xlu1 %755  ;;  %v754_v36 = vpop.permute.xlu0 %753 }
  0xab   : > { %v758_v38 = vsel %vm757_vm7, %v752_v30, %v754_v36  ;;  %v759_v39 = vsel %vm757_vm7, %v754_v36, %v756_v35  ;;  %vm1639_vm7 = vcmask 457728  }
  0xac   : > { %v764_v40 = vsel %vm405_vm0, %v758_v38, 0  ;;  %6725 = vmatprep.subr.msk.bf16.mxu0 %vm405_vm0, %v759_v39  ;;  %6723 = vmatmul.mubr.msk.bf16.vlgmr.msra.gmra.mrb[8].mxu1 %vm401_vm1, %v6720_v34  ;;  %v6748_v34 = vld [vmem:[%s9455_s1 + $0x38] sm:$0xf] }
  0xad   : > { %6719 = vmatmul.mubr.msk.bf16.vlgmr.msra.gmra.mrb[8].mxu0 %vm401_vm1, %v6717_v37  ;;  %864 = vmatprep.mubr.bf16.mxu1 %v8061_v0 }
  0xae   : > { %770 = vmatpush1.bf16.msra.mxu0 %v764_v40  ;;  %v817_v41 = vpop.permute.xlu1 %816  ;;  %v815_v42 = vpop.permute.xlu0 %814  ;;  %801 = vmatprep.mubr.bf16.mxu0 %v8061_v0 }
  0xaf   : > { %v821_v43 = vsel %vm820_vm8, %v815_v42, %v817_v41  ;;  %v6751_v42 = vld [vmem:[%s9455_s1 + $0x3c] sm:$0xf] }
  0xb0   : > { %v827_v48 = vsel %vm405_vm0, %v821_v43, 0 }
  0xb2   : > { %v878_v44 = vpop.permute.xlu1 %877  ;;  %v819_v45 = vpop.permute.xlu0 %818 }
  0xb3   : > { %v822_v47 = vsel %vm820_vm8, %v817_v41, %v819_v45  ;;  %vm1702_vm8 = vcmask 449536  }
  0xb4   : > { %6728 = vmatprep.subr.msk.bf16.mxu1 %vm405_vm0, %v822_v47 }
  0xb5   : > { %833 = vmatpush1.bf16.msra.mxu1 %v827_v48  ;;  %6726 = vmatmul.mubr.msk.bf16.vlgmr.msra.gmra.mrb[12].mxu0 %vm401_vm1, %v6724_v46  ;;  %v6754_v48 = vld [vmem:[%s9455_s1 + $0x40] sm:$0xf] }
  0xb6   : > { %v882_v50 = vpop.permute.xlu1 %881  ;;  %v880_v51 = vpop.permute.xlu0 %879  ;;  %927 = vmatprep.mubr.bf16.mxu0 %v8061_v0 }
  0xb7   : > { %v884_v52 = vsel %vm883_vm9, %v878_v44, %v880_v51  ;;  %v885_v53 = vsel %vm883_vm9, %v880_v51, %v882_v50  ;;  %vm1765_vm9 = vcmask 441344  }
  0xb8   : > { %v890_v54 = vsel %vm405_vm0, %v884_v52, 0  ;;  %6731 = vmatprep.subr.msk.bf16.mxu0 %vm405_vm0, %v885_v53  ;;  %6729 = vmatmul.mubr.msk.bf16.vlgmr.msra.gmra.mrb[12].mxu1 %vm401_vm1, %v6727_v49 }
  0xb9   : > { %896 = vmatpush1.bf16.msra.mxu0 %v890_v54  ;;  %990 = vmatprep.mubr.bf16.mxu1 %v8061_v0 }
  0xba   : > { %v943_v55 = vpop.permute.xlu1 %942  ;;  %v941_v56 = vpop.permute.xlu0 %940 }
  0xbb   : > { %v947_v58 = vsel %vm946_vm10, %v941_v56, %v943_v55  ;;  %v6757_v56 = vld [vmem:[%s9455_s1 + $0x44] sm:$0xf] }
  0xbc   : > { %v953_v62 = vsel %vm405_vm0, %v947_v58, 0 }
  0xbd   : > { %6732 = vmatmul.mubr.msk.bf16.vlgmr.msra.gmra.mrb[16].mxu0 %vm401_vm1, %v6730_v57 }
  0xbe   : > { %v1004_v59 = vpop.permute.xlu1 %1003  ;;  %v945_v60 = vpop.permute.xlu0 %944  ;;  %1053 = vmatprep.mubr.bf16.mxu0 %v8061_v0 }
  0xbf   : > { %v948_v61 = vsel %vm946_vm10, %v943_v55, %v945_v60  ;;  %vm1828_vm10 = vcmask 433152  }
  0xc0   : > { %6734 = vmatprep.subr.msk.bf16.mxu1 %vm405_vm0, %v948_v61 }
  0xc1   : > { %959 = vmatpush1.bf16.msra.mxu1 %v953_v62  ;;  %v6760_v62 = vld [vmem:[%s9455_s1 + $0x48] sm:$0xf] }
  0xc2   : > { %v1008_v1 = vpop.permute.xlu1 %1007  ;;  %v1006_v2 = vpop.permute.xlu0 %1005 }
  0xc3   : > { %v1010_v3 = vsel %vm1009_vm11, %v1004_v59, %v1006_v2  ;;  %v1011_v4 = vsel %vm1009_vm11, %v1006_v2, %v1008_v1  ;;  %vm1891_vm11 = vcmask 424960  }
  0xc4   : > { %v1016_v5 = vsel %vm405_vm0, %v1010_v3, 0  ;;  %6737 = vmatprep.subr.msk.bf16.mxu0 %vm405_vm0, %v1011_v4  ;;  %6735 = vmatmul.mubr.msk.bf16.vlgmr.msra.gmra.mrb[16].mxu1 %vm401_vm1, %v6733_v63 }
  0xc5   : > { %1022 = vmatpush1.bf16.msra.mxu0 %v1016_v5  ;;  %1116 = vmatprep.mubr.bf16.mxu1 %v8061_v0 }
  0xc6   : > { %v1069_v7 = vpop.permute.xlu1 %1068  ;;  %v1067_v8 = vpop.permute.xlu0 %1066 }
  0xc7   : > { %v1073_v9 = vsel %vm1072_vm12, %v1067_v8, %v1069_v7 }
  0xc8   : > { %6738 = vmatmul.mubr.msk.bf16.vlgmr.msra.gmra.mrb[20].mxu0 %vm401_vm1, %v6736_v6  ;;  %v1079_v13 = vsel %vm405_vm0, %v1073_v9, 0 }
  0xc9   : > { %1179 = vmatprep.mubr.bf16.mxu0 %v8061_v0 }
  0xca   : > { %v1130_v10 = vpop.permute.xlu1 %1129  ;;  %v1071_v11 = vpop.permute.xlu0 %1070 }
  0xcb   : > { %v1074_v12 = vsel %vm1072_vm12, %v1069_v7, %v1071_v11  ;;  %v6763_v11 = vld [vmem:[%s9455_s1 + $0x4c] sm:$0xf]  ;;  %vm2082_vm12 = vcmask 982016  }
  0xcc   : > { %6740 = vmatprep.subr.msk.bf16.mxu1 %vm405_vm0, %v1074_v12 }
  0xcd   : > { %1085 = vmatpush1.bf16.msra.mxu1 %v1079_v13 }
  0xce   : > { %v1134_v15 = vpop.permute.xlu1 %1133  ;;  %v1132_v16 = vpop.permute.xlu0 %1131 }
  0xcf   : > { %v1136_v17 = vsel %vm1135_vm13, %v1130_v10, %v1132_v16  ;;  %v1137_v18 = vsel %vm1135_vm13, %v1132_v16, %v1134_v15  ;;  %vm8087_vm13 = vmmov 0  }
  0xd0   : > { %v1142_v19 = vsel %vm405_vm0, %v1136_v17, 0  ;;  %6741 = vmatmul.mubr.msk.bf16.vlgmr.msra.gmra.mrb[20].mxu1 %vm401_vm1, %v6739_v14  ;;  %6743 = vmatprep.subr.msk.bf16.mxu0 %vm405_vm0, %v1137_v18  ;;  %v6766_v17 = vld [vmem:[%s9455_s1 + $0x50] sm:$0xf] }
  0xd1   : > { %1148 = vmatpush1.bf16.msra.mxu0 %v1142_v19  ;;  %1242 = vmatprep.mubr.bf16.mxu1 %v8061_v0 }
  0xd2   : > { %v1195_v21 = vpop.permute.xlu1 %1194  ;;  %v1193_v22 = vpop.permute.xlu0 %1192 }
  0xd3   : > { %v1199_v23 = vsel %vm1198_vm14, %v1193_v22, %v1195_v21 }
  0xd4   : > { %6744 = vmatmul.mubr.msk.bf16.vlgmr.msra.gmra.mrb[24].mxu0 %vm401_vm1, %v6742_v20  ;;  %v1205_v27 = vsel %vm405_vm0, %v1199_v23, 0 }
  0xd5   : > { %1305 = vmatprep.mubr.bf16.mxu0 %v8061_v0 }
  0xd6   : > { %v1256_v24 = vpop.permute.xlu1 %1255  ;;  %v1197_v25 = vpop.permute.xlu0 %1196 }
  0xd7   : > { %v1200_v26 = vsel %vm1198_vm14, %v1195_v21, %v1197_v25  ;;  %v6769_v25 = vld [vmem:[%s9455_s1 + $0x54] sm:$0xf] }
  0xd8   : > { %6746 = vmatprep.subr.msk.bf16.mxu1 %vm405_vm0, %v1200_v26 }
  0xd9   : > { %1211 = vmatpush1.bf16.msra.mxu1 %v1205_v27 }
  0xda   : > { %v1260_v29 = vpop.permute.xlu1 %1259  ;;  %v1258_v30 = vpop.permute.xlu0 %1257 }
  0xdb   : > { %v1262_v31 = vsel %vm1261_vm15, %v1256_v24, %v1258_v30  ;;  %v1263_v32 = vsel %vm1261_vm15, %v1258_v30, %v1260_v29 }
  0xdc   : > { %v1268_v33 = vsel %vm405_vm0, %v1262_v31, 0  ;;  %6747 = vmatmul.mubr.msk.bf16.vlgmr.msra.gmra.mrb[24].mxu1 %vm401_vm1, %v6745_v28  ;;  %6749 = vmatprep.subr.msk.bf16.mxu0 %vm405_vm0, %v1263_v32  ;;  %v6772_v31 = vld [vmem:[%s9455_s1 + $0x58] sm:$0xf] }
  0xdd   : > { %1274 = vmatpush1.bf16.msra.mxu0 %v1268_v33  ;;  %1368 = vmatprep.mubr.bf16.mxu1 %v8061_v0 }
  0xde   : > { %v1321_v35 = vpop.permute.xlu1 %1320  ;;  %v1319_v36 = vpop.permute.xlu0 %1318 }
  0xdf   : > { %v1325_v37 = vsel %vm1324_vm2, %v1319_v36, %v1321_v35 }
  0xe0   : > { %6750 = vmatmul.mubr.msk.bf16.vlgmr.msra.gmra.mrb[28].mxu0 %vm401_vm1, %v6748_v34  ;;  %v1331_v41 = vsel %vm405_vm0, %v1325_v37, 0 }
  0xe1   : > { %1431 = vmatprep.mubr.bf16.mxu0 %v8061_v0 }
  0xe2   : > { %v1382_v38 = vpop.permute.xlu1 %1381  ;;  %v1323_v39 = vpop.permute.xlu0 %1322 }
  0xe3   : > { %v1326_v40 = vsel %vm1324_vm2, %v1321_v35, %v1323_v39  ;;  %v6775_v39 = vld [vmem:[%s9455_s1 + $0x5c] sm:$0xf] }
  0xe4   : > { %6752 = vmatprep.subr.msk.bf16.mxu1 %vm405_vm0, %v1326_v40 }
  0xe5   : > { %1337 = vmatpush1.bf16.msra.mxu1 %v1331_v41 }
  0xe6   : > { %v1386_v43 = vpop.permute.xlu1 %1385  ;;  %v1384_v44 = vpop.permute.xlu0 %1383 }
  0xe7   : > { %v1388_v45 = vsel %vm1387_vm3, %v1382_v38, %v1384_v44  ;;  %v1389_v46 = vsel %vm1387_vm3, %v1384_v44, %v1386_v43 }
  0xe8   : > { %v1394_v47 = vsel %vm405_vm0, %v1388_v45, 0  ;;  %6753 = vmatmul.mubr.msk.bf16.vlgmr.msra.gmra.mrb[28].mxu1 %vm401_vm1, %v6751_v42  ;;  %6755 = vmatprep.subr.msk.bf16.mxu0 %vm405_vm0, %v1389_v46  ;;  %v6778_v45 = vld [vmem:[%s9455_s1 + $0x60] sm:$0xf]  ;;  %s8092_s1 = smov 115  }
  0xe9   : > { %1400 = vmatpush1.bf16.msra.mxu0 %v1394_v47  ;;  %1494 = vmatprep.mubr.bf16.mxu1 %v8061_v0  ;;  %v7764_v46 = vld [vmem:[%s9433_s3 + $0x40] sm:$0xff]  }
  0xea   : > { %v1447_v49 = vpop.permute.xlu1 %1446  ;;  %v1445_v50 = vpop.permute.xlu0 %1444  ;;  %v7765_v47 = vld [vmem:[%s9433_s3 + $0xbc] sm:$0xff]  }
  0xeb   : > { %v1451_v51 = vsel %vm1450_vm4, %v1445_v50, %v1447_v49  ;;  %v7768_v50 = vld [vmem:[%s9433_s3 + $0x48] sm:$0xff]  }
  0xec   : > { %6756 = vmatmul.mubr.msk.bf16.vlgmr.msra.gmra.mrb[32].mxu0 %vm401_vm1, %v6754_v48  ;;  %v1457_v55 = vsel %vm405_vm0, %v1451_v51, 0  ;;  %v7766_v48 = vld [vmem:[%s9433_s3] sm:$0xff]  }
  0xed   : > { %1557 = vmatprep.mubr.bf16.mxu0 %v8061_v0  ;;  %v7769_v51 = vld [vmem:[%s9433_s3 + $0xc4] sm:$0xff]  }
  0xee   : > { %v1508_v52 = vpop.permute.xlu1 %1507  ;;  %v1449_v53 = vpop.permute.xlu0 %1448 }
  0xef   : > { %v1452_v54 = vsel %vm1450_vm4, %v1447_v49, %v1449_v53  ;;  %v7767_v49 = vld [vmem:[%s9433_s3 + $0x7c] sm:$0xff]   ;;  %v7771_v53 = vld [vmem:[%s9433_s3 + $0x84] sm:$0xff]  }
  0xf0   : > { %6758 = vmatprep.subr.msk.bf16.mxu1 %vm405_vm0, %v1452_v54  ;;  %v7772_v54 = vld [vmem:[%s9433_s3 + $0x50] sm:$0xff]  }
  0xf1   : > { %1463 = vmatpush1.bf16.msra.mxu1 %v1457_v55  ;;  %v7773_v55 = vld [vmem:[%s9433_s3 + $0xcc] sm:$0xff]  }
  0xf2   : > { %v1512_v57 = vpop.permute.xlu1 %1511  ;;  %v1510_v58 = vpop.permute.xlu0 %1509 }
  0xf3   : > { %v1514_v59 = vsel %vm1513_vm5, %v1508_v52, %v1510_v58  ;;  %v1515_v60 = vsel %vm1513_vm5, %v1510_v58, %v1512_v57  ;;  %v7770_v52 = vld [vmem:[%s9433_s3 + $0x8] sm:$0xff]   ;;  %v7776_v58 = vld [vmem:[%s9433_s3 + $0x58] sm:$0xff]  }
  0xf4   : > { %v1520_v61 = vsel %vm405_vm0, %v1514_v59, 0  ;;  %6759 = vmatmul.mubr.msk.bf16.vlgmr.msra.gmra.mrb[32].mxu1 %vm401_vm1, %v6757_v56  ;;  %6761 = vmatprep.subr.msk.bf16.mxu0 %vm405_vm0, %v1515_v60  ;;  %v7774_v56 = vld [vmem:[%s9433_s3 + $0x10] sm:$0xff]   ;;  %v7778_v60 = vld [vmem:[%s9433_s3 + $0x18] sm:$0xff]  }
  0xf5   : > { %1526 = vmatpush1.bf16.msra.mxu0 %v1520_v61  ;;  %1620 = vmatprep.mubr.bf16.mxu1 %v8061_v0  ;;  %v7775_v57 = vld [vmem:[%s9433_s3 + $0x8c] sm:$0xff]   ;;  %v7777_v59 = vld [vmem:[%s9433_s3 + $0xd4] sm:$0xff]  }
  0xf6   : > { %v1573_v63 = vpop.permute.xlu1 %1572  ;;  %v1571_v1 = vpop.permute.xlu0 %1570  ;;  %v7779_v61 = vld [vmem:[%s9433_s3 + $0x94] sm:$0xff]  }
  0xf7   : > { %v1577_v3 = vsel %vm1576_vm6, %v1571_v1, %v1573_v63  ;;  %v7782_v1 = vld [vmem:[%s9433_s3 + $0x20] sm:$0xff]  }
  0xf8   : > { %6762 = vmatmul.mubr.msk.bf16.vlgmr.msra.gmra.mrb[36].mxu0 %vm401_vm1, %v6760_v62  ;;  %v8453_v2 = vpop.f32.mrb[0].mxu1  ;;  %v1583_v9 = vsel %vm405_vm0, %v1577_v3, 0  ;;  %v7780_v62 = vld [vmem:[%s9433_s3 + $0x60] sm:$0xff]  }
  0xf9   : > { %1683 = vmatprep.mubr.bf16.mxu0 %v8061_v0  ;;  %v8456_v4 = vpop.f32.mrb[1].mxu1  ;;  %v7783_v3 = vld [vmem:[%s9433_s3 + $0x9c] sm:$0xff]  }
  0xfa   : > { %v1634_v5 = vpop.permute.xlu1 %1633  ;;  %v1575_v6 = vpop.permute.xlu0 %1574 }
  0xfb   : > { %v1578_v7 = vsel %vm1576_vm6, %v1573_v63, %v1575_v6  ;;  %v500_v8 = vpop.f32.mrb[2].mxu1  ;;  %v7781_v63 = vld [vmem:[%s9433_s3 + $0xdc] sm:$0xff]   ;;  %v7785_v6 = vld [vmem:[%s9433_s3 + $0xe4] sm:$0xff]  }
  0xfc   : > { %6764 = vmatprep.subr.msk.bf16.mxu1 %vm405_vm0, %v1578_v7  ;;  %v501_v10 = vpop.f32.mrb[3].mxu1  ;;  %v7786_v7 = vld [vmem:[%s9433_s3 + $0x28] sm:$0xff]  }
  0xfd   : > { %1589 = vmatpush1.bf16.msra.mxu1 %v1583_v9  ;;  %v7787_v8 = vld [vmem:[%s9433_s3 + $0xa4] sm:$0xff]  }
  0xfe   : > { %v1638_v12 = vpop.permute.xlu1 %1637  ;;  %v1636_v13 = vpop.permute.xlu0 %1635 }
  0xff   : > { %v1640_v14 = vsel %vm1639_vm7, %v1634_v5, %v1636_v13  ;;  %v1641_v15 = vsel %vm1639_vm7, %v1636_v13, %v1638_v12  ;;  %v7784_v5 = vld [vmem:[%s9433_s3 + $0x68] sm:$0xff]   ;;  %v7789_v13 = vld [vmem:[%s9433_s3 + $0x70] sm:$0xff]  }
 0x100   : > { %v1646_v16 = vsel %vm405_vm0, %v1640_v14, 0  ;;  %6765 = vmatmul.mubr.msk.bf16.vlgmr.msra.gmra.mrb[36].mxu1 %vm401_vm1, %v6763_v11  ;;  %6767 = vmatprep.subr.msk.bf16.mxu0 %vm405_vm0, %v1641_v15  ;;  %v7788_v12 = vld [vmem:[%s9433_s3 + $0xec] sm:$0xff]  }
 0x101   : > { %1652 = vmatpush1.bf16.msra.mxu0 %v1646_v16  ;;  %1746 = vmatprep.mubr.bf16.mxu1 %v8061_v0  ;;  %v7790_v16 = vld [vmem:[%s9433_s3 + $0x30] sm:$0xff]  }
 0x102   : > { %v1699_v18 = vpop.permute.xlu1 %1698  ;;  %v1697_v19 = vpop.permute.xlu0 %1696 }
 0x103   : > { %v1703_v20 = vsel %vm1702_vm8, %v1697_v19, %v1699_v18 }
 0x104   : > { %6768 = vmatmul.mubr.msk.bf16.vlgmr.msra.gmra.mrb[40].mxu0 %vm401_vm1, %v6766_v17  ;;  %v1709_v24 = vsel %vm405_vm0, %v1703_v20, 0  ;;  %v7791_v17 = vld [vmem:[%s9433_s3 + $0xac] sm:$0xff]   ;;  %v7792_v20 = vld [vmem:[%s9433_s3 + $0x78] ss:$0 sps:$4 sm:$0xff]  }
 0x105   : > { %1809 = vmatprep.mubr.bf16.mxu0 %v8061_v0 }
 0x106   : > { %v1760_v21 = vpop.permute.xlu1 %1759  ;;  %v1701_v22 = vpop.permute.xlu0 %1700 }
 0x107   : > { %v1704_v23 = vsel %vm1702_vm8, %v1699_v18, %v1701_v22  ;;  %v7794_v22 = vld [vmem:[%s9433_s3 + $0x38] sm:$0xff]  }
 0x108   : > { %6770 = vmatprep.subr.msk.bf16.mxu1 %vm405_vm0, %v1704_v23  ;;  %v7795_v23 = vld [vmem:[%s9433_s3 + $0xb4] sm:$0xff]  }
 0x109   : > { %1715 = vmatpush1.bf16.msra.mxu1 %v1709_v24 }
 0x10a   : > { %v1764_v26 = vpop.permute.xlu1 %1763  ;;  %v1762_v27 = vpop.permute.xlu0 %1761 }
 0x10b   : > { %v1766_v28 = vsel %vm1765_vm9, %v1760_v21, %v1762_v27  ;;  %v1767_v29 = vsel %vm1765_vm9, %v1762_v27, %v1764_v26 }
 0x10c   : > { %v1772_v30 = vsel %vm405_vm0, %v1766_v28, 0  ;;  %6771 = vmatmul.mubr.msk.bf16.vlgmr.msra.gmra.mrb[40].mxu1 %vm401_vm1, %v6769_v25  ;;  %6773 = vmatprep.subr.msk.bf16.mxu0 %vm405_vm0, %v1767_v29  ;;  %v7796_v28 = vld [vmem:[%s9433_s3 + $0x138] sm:$0xff]  }
 0x10d   : > { %1778 = vmatpush1.bf16.msra.mxu0 %v1772_v30  ;;  %1872 = vmatprep.mubr.bf16.mxu1 %v8061_v0  ;;  %v7797_v29 = vld [vmem:[%s9433_s3 + $0x1b4] sm:$0xff]  }
 0x10e   : > { %v1825_v32 = vpop.permute.xlu1 %1824  ;;  %v1823_v33 = vpop.permute.xlu0 %1822 }
 0x10f   : > { %v1829_v34 = vsel %vm1828_vm10, %v1823_v33, %v1825_v32 }
 0x110   : > { %6774 = vmatmul.mubr.msk.bf16.vlgmr.msra.gmra.mrb[44].mxu0 %vm401_vm1, %v6772_v31  ;;  %v1835_v38 = vsel %vm405_vm0, %v1829_v34, 0 }
 0x111   : > { %1935 = vmatprep.mubr.bf16.mxu0 %v8061_v0 }
 0x112   : > { %v1886_v35 = vpop.permute.xlu1 %1885  ;;  %v1827_v36 = vpop.permute.xlu0 %1826 }
 0x113   : > { %v1830_v37 = vsel %vm1828_vm10, %v1825_v32, %v1827_v36 }
 0x114   : > { %6776 = vmatprep.subr.msk.bf16.mxu1 %vm405_vm0, %v1830_v37 }
 0x115   : > { %1841 = vmatpush1.bf16.msra.mxu1 %v1835_v38 }
 0x116   : > { %v1890_v40 = vpop.permute.xlu1 %1889  ;;  %v1888_v41 = vpop.permute.xlu0 %1887  ;;  %7272 = vmatprep.subr.bf16.mxu1 %v7764_v46 }
 0x117   : > { %v1892_v42 = vsel %vm1891_vm11, %v1886_v35, %v1888_v41  ;;  %v1893_v43 = vsel %vm1891_vm11, %v1888_v41, %v1890_v40 }
 0x118   : > { %v1898_v44 = vsel %vm405_vm0, %v1892_v42, 0  ;;  %6777 = vmatmul.mubr.msk.bf16.vlgmr.msra.gmra.mrb[44].mxu1 %vm401_vm1, %v6775_v39  ;;  %6779 = vmatprep.subr.msk.bf16.mxu0 %vm405_vm0, %v1893_v43 }
 0x119   : > { %1904 = vmatpush1.bf16.msra.mxu0 %v1898_v44  ;;  %7273 = vmatpush3.bf16.msra.mxu1 %v7766_v48 }
 0x11a   : > { %7294 = vmatprep.subr.bf16.mxu0 %v7765_v47  ;;  %7274 = vmatprep.subr.bf16.mxu1 %v7768_v50 }
 0x11c   : > { %6780 = vmatmul.mubr.msk.bf16.vlgmr.msra.gmra.mrb[48].mxu0 %vm401_vm1, %v6778_v45 }
 0x11d   : > { %7295 = vmatpush3.bf16.msra.mxu0 %v7767_v49  ;;  %7275 = vmatpush3.bf16.msra.mxu1 %v7770_v52 }
 0x11e   : > { %7296 = vmatprep.subr.bf16.mxu0 %v7769_v51  ;;  %7276 = vmatprep.subr.bf16.mxu1 %v7772_v54 }
 0x121   : > { %7297 = vmatpush3.bf16.msra.mxu0 %v7771_v53  ;;  %7277 = vmatpush3.bf16.msra.mxu1 %v7774_v56 }
 0x122   : > { %7298 = vmatprep.subr.bf16.mxu0 %v7773_v55  ;;  %7278 = vmatprep.subr.bf16.mxu1 %v7776_v58 }
 0x125   : > { %7299 = vmatpush3.bf16.msra.mxu0 %v7775_v57  ;;  %7279 = vmatpush3.bf16.msra.mxu1 %v7778_v60 }
 0x126   : > { %7300 = vmatprep.subr.bf16.mxu0 %v7777_v59  ;;  %7280 = vmatprep.subr.bf16.mxu1 %v7780_v62 }
 0x129   : > { %7301 = vmatpush3.bf16.msra.mxu0 %v7779_v61  ;;  %7281 = vmatpush3.bf16.msra.mxu1 %v7782_v1 }
 0x12a   : > { %7302 = vmatprep.subr.bf16.mxu0 %v7781_v63  ;;  %7282 = vmatprep.subr.bf16.mxu1 %v7784_v5 }
 0x12d   : > { %7303 = vmatpush3.bf16.msra.mxu0 %v7783_v3  ;;  %7283 = vmatpush3.bf16.msra.mxu1 %v7786_v7 }
 0x12e   : > { %7304 = vmatprep.subr.bf16.mxu0 %v7785_v6  ;;  %7284 = vmatprep.subr.bf16.mxu1 %v7789_v13 }
 0x131   : > { %7305 = vmatpush3.bf16.msra.mxu0 %v7787_v8  ;;  %7285 = vmatpush3.bf16.msra.mxu1 %v7790_v16 }
 0x132   : > { %7306 = vmatprep.subr.bf16.mxu0 %v7788_v12  ;;  %7672 = vmatprep.subr.msk.bf16.mxu1 %vm405_vm0, %v7792_v20 }
 0x135   : > { %7307 = vmatpush3.bf16.msra.mxu0 %v7791_v17  ;;  %7287 = vmatpush3.bf16.msra.mxu1 %v7794_v22 }
 0x136   : > { %7316 = vmatprep.subr.bf16.mxu1 %v7796_v28 }
 0x170   : > { %v446_v9 = vpop.f32.mrb[0].mxu0 }
 0x171   : > { %v448_v10 = vpop.f32.mrb[1].mxu0  ;;  %v497_v11 = vadd.f32 %v8453_v2, %v446_v9 }
 0x172   : > { %v450_v14 = vpop.f32.mrb[2].mxu0  ;;  %v499_v15 = vadd.f32 %v8456_v4, %v448_v10  ;;  %v7793_v4 = vld [vmem:[%s9433_s3 + $0xf4] ss:$0 sps:$4 sm:$0xff]  }
 0x173   : > { %v451_v2 = vpop.f32.mrb[3].mxu0  ;;  %7673 = vmatprep.subr.msk.bf16.mxu0 %vm405_vm0, %v7793_v4 }
 0x174   : > { %v614_v18 = vpop.f32.mrb[4].mxu1  ;;  %7309 = vmatpush3.bf16.msra.mxu0 %v7795_v23 }
 0x175   : > { %v616_v19 = vpop.f32.mrb[5].mxu1  ;;  %7338 = vmatprep.subr.bf16.mxu0 %v7797_v29 }
 0x176   : > { %v618_v21 = vpop.f32.mrb[6].mxu1 }
 0x177   : > { %v619_v24 = vpop.f32.mrb[7].mxu1 }
 0x178   : > { %v554_v25 = vpop.f32.mrb[4].mxu0 }
 0x179   : > { %v561_v26 = vadd.f32 %v554_v25, %v497_v11  ;;  %v556_v27 = vpop.f32.mrb[5].mxu0 }
 0x17a   : > { %v562_v30 = vadd.f32 %v556_v27, %v499_v15  ;;  %v558_v31 = vpop.f32.mrb[6].mxu0 }
 0x17b   : > { %v621_v32 = vadd.f32 %v614_v18, %v561_v26  ;;  %v559_v33 = vpop.f32.mrb[7].mxu0 }
 0x17c   : > { %v622_v34 = vadd.f32 %v616_v19, %v562_v30 }
 0x17f   : > { %v740_v35 = vpop.f32.mrb[8].mxu1 }
 0x180   : > { %v674_v36 = vpop.f32.mrb[8].mxu0  ;;  %v742_v37 = vpop.f32.mrb[9].mxu1 }
 0x181   : > { %v681_v38 = vadd.f32 %v674_v36, %v621_v32  ;;  %v676_v39 = vpop.f32.mrb[9].mxu0  ;;  %v744_v40 = vpop.f32.mrb[10].mxu1 }
 0x182   : > { %v682_v41 = vadd.f32 %v676_v39, %v622_v34  ;;  %v678_v42 = vpop.f32.mrb[10].mxu0  ;;  %v745_v43 = vpop.f32.mrb[11].mxu1 }
 0x183   : > { %v747_v44 = vadd.f32 %v740_v35, %v681_v38  ;;  %v679_v45 = vpop.f32.mrb[11].mxu0 }
 0x184   : > { %v748_v46 = vadd.f32 %v742_v37, %v682_v41 }
 0x188   : > { %v803_v47 = vpop.f32.mrb[12].mxu0 }
 0x189   : > { %v810_v48 = vadd.f32 %v803_v47, %v747_v44  ;;  %v805_v49 = vpop.f32.mrb[13].mxu0 }
 0x18a   : > { %v811_v50 = vadd.f32 %v805_v49, %v748_v46  ;;  %v807_v51 = vpop.f32.mrb[14].mxu0 }
 0x18b   : > { %v866_v52 = vpop.f32.mrb[12].mxu1  ;;  %v808_v53 = vpop.f32.mrb[15].mxu0 }
 0x18c   : > { %v873_v54 = vadd.f32 %v866_v52, %v810_v48  ;;  %v868_v55 = vpop.f32.mrb[13].mxu1 }
 0x18d   : > { %v874_v56 = vadd.f32 %v868_v55, %v811_v50  ;;  %v870_v57 = vpop.f32.mrb[14].mxu1 }
 0x18e   : > { %v871_v58 = vpop.f32.mrb[15].mxu1 }
 0x190   : > { %v929_v59 = vpop.f32.mrb[16].mxu0 }
 0x191   : > { %v936_v60 = vadd.f32 %v929_v59, %v873_v54  ;;  %v931_v61 = vpop.f32.mrb[17].mxu0 }
 0x192   : > { %v937_v62 = vadd.f32 %v931_v61, %v874_v56  ;;  %v933_v63 = vpop.f32.mrb[18].mxu0 }
 0x193   : > { %v934_v1 = vpop.f32.mrb[19].mxu0 }
 0x197   : > { %v992_v3 = vpop.f32.mrb[16].mxu1 }
 0x198   : > { %v999_v5 = vadd.f32 %v992_v3, %v936_v60  ;;  %v994_v6 = vpop.f32.mrb[17].mxu1 }
 0x199   : > { %v1000_v7 = vadd.f32 %v994_v6, %v937_v62  ;;  %v996_v8 = vpop.f32.mrb[18].mxu1 }
 0x19a   : > { %v997_v9 = vpop.f32.mrb[19].mxu1 }
 0x19b   : > { %v1055_v10 = vpop.f32.mrb[20].mxu0 }
 0x19c   : > { %v1062_v11 = vadd.f32 %v1055_v10, %v999_v5  ;;  %v1057_v12 = vpop.f32.mrb[21].mxu0 }
 0x19d   : > { %v1063_v13 = vadd.f32 %v1057_v12, %v1000_v7  ;;  %v1059_v14 = vpop.f32.mrb[22].mxu0 }
 0x19e   : > { %v1060_v15 = vpop.f32.mrb[23].mxu0 }
 0x1a3   : > { %v1118_v16 = vpop.f32.mrb[20].mxu1 }
 0x1a4   : > { %v1125_v17 = vadd.f32 %v1118_v16, %v1062_v11  ;;  %v1120_v2 = vpop.f32.mrb[21].mxu1 }
 0x1a5   : > { %v1126_v18 = vadd.f32 %v1120_v2, %v1063_v13  ;;  %v1122_v19 = vpop.f32.mrb[22].mxu1 }
 0x1a6   : > { %v1123_v20 = vpop.f32.mrb[23].mxu1 }
 0x1a7   : > { %v1181_v4 = vpop.f32.mrb[24].mxu0 }
 0x1a8   : > { %v1188_v21 = vadd.f32 %v1181_v4, %v1125_v17  ;;  %v1183_v22 = vpop.f32.mrb[25].mxu0 }
 0x1a9   : > { %v1189_v23 = vadd.f32 %v1183_v22, %v1126_v18  ;;  %v1185_v24 = vpop.f32.mrb[26].mxu0 }
 0x1aa   : > { %v1186_v25 = vpop.f32.mrb[27].mxu0 }
 0x1af   : > { %v1244_v26 = vpop.f32.mrb[24].mxu1 }
 0x1b0   : > { %v1251_v27 = vadd.f32 %v1244_v26, %v1188_v21  ;;  %v1246_v28 = vpop.f32.mrb[25].mxu1 }
 0x1b1   : > { %v1252_v29 = vadd.f32 %v1246_v28, %v1189_v23  ;;  %v1248_v30 = vpop.f32.mrb[26].mxu1 }
 0x1b2   : > { %v1249_v31 = vpop.f32.mrb[27].mxu1  ;;  %v1950_v30 = vpop.permute.xlu0 %1949 }
 0x1b3   : > { %v1307_v32 = vpop.f32.mrb[28].mxu0 }
 0x1b4   : > { %v1314_v33 = vadd.f32 %v1307_v32, %v1251_v27  ;;  %v1309_v34 = vpop.f32.mrb[29].mxu0 }
 0x1b5   : > { %v1315_v35 = vadd.f32 %v1309_v34, %v1252_v29  ;;  %v1311_v36 = vpop.f32.mrb[30].mxu0 }
 0x1b6   : > { %v1312_v37 = vpop.f32.mrb[31].mxu0 }
 0x1bb   : > { %v1370_v38 = vpop.f32.mrb[28].mxu1 }
 0x1bc   : > { %v1377_v39 = vadd.f32 %v1370_v38, %v1314_v33  ;;  %v1372_v40 = vpop.f32.mrb[29].mxu1 }
 0x1bd   : > { %v1378_v41 = vadd.f32 %v1372_v40, %v1315_v35  ;;  %v1374_v42 = vpop.f32.mrb[30].mxu1 }
 0x1be   : > { %v1375_v43 = vpop.f32.mrb[31].mxu1  ;;  %v7799_v42 = vld [vmem:[%s9433_s3 + $0x174] sm:$0xff]  }
 0x1bf   : > { %v1433_v44 = vpop.f32.mrb[32].mxu0 }
 0x1c0   : > { %v1440_v45 = vadd.f32 %v1433_v44, %v1377_v39  ;;  %v1435_v46 = vpop.f32.mrb[33].mxu0  ;;  %v7800_v44 = vld [vmem:[%s9433_s3 + $0x140] sm:$0xff]  }
 0x1c1   : > { %v1441_v47 = vadd.f32 %v1435_v46, %v1378_v41  ;;  %v1437_v48 = vpop.f32.mrb[34].mxu0  ;;  %v7798_v41 = vld [vmem:[%s9433_s3 + $0xf8] sm:$0xff]   ;;  %v7802_v46 = vld [vmem:[%s9433_s3 + $0x100] sm:$0xff]  }
 0x1c2   : > { %v1438_v49 = vpop.f32.mrb[35].mxu0  ;;  %v7804_v48 = vld [vmem:[%s9433_s3 + $0x148] sm:$0xff]  }
 0x1c3   : > { %v7805_v49 = vld [vmem:[%s9433_s3 + $0x1c4] sm:$0xff]  }
 0x1c7   : > { %v1496_v50 = vpop.f32.mrb[32].mxu1 }
 0x1c8   : > { %v1503_v51 = vadd.f32 %v1496_v50, %v1440_v45  ;;  %v1498_v52 = vpop.f32.mrb[33].mxu1  ;;  %v7801_v45 = vld [vmem:[%s9433_s3 + $0x1bc] sm:$0xff]   ;;  %v7806_v50 = vld [vmem:[%s9433_s3 + $0x108] sm:$0xff]  }
 0x1c9   : > { %v1504_v53 = vadd.f32 %v1498_v52, %v1441_v47  ;;  %v1500_v54 = vpop.f32.mrb[34].mxu1  ;;  %v7803_v47 = vld [vmem:[%s9433_s3 + $0x17c] sm:$0xff]   ;;  %v7808_v52 = vld [vmem:[%s9433_s3 + $0x150] sm:$0xff]  }
 0x1ca   : > { %v1501_v55 = vpop.f32.mrb[35].mxu1  ;;  %v7810_v54 = vld [vmem:[%s9433_s3 + $0x110] sm:$0xff]  }
 0x1cb   : > { %v1559_v56 = vpop.f32.mrb[36].mxu0  ;;  %v7811_v55 = vld [vmem:[%s9433_s3 + $0x18c] sm:$0xff]  }
 0x1cc   : > { %v1566_v57 = vadd.f32 %v1559_v56, %v1503_v51  ;;  %v1561_v58 = vpop.f32.mrb[37].mxu0  ;;  %v7807_v51 = vld [vmem:[%s9433_s3 + $0x184] sm:$0xff]   ;;  %v7812_v56 = vld [vmem:[%s9433_s3 + $0x158] sm:$0xff]  }
 0x1cd   : > { %v1567_v59 = vadd.f32 %v1561_v58, %v1504_v53  ;;  %v1563_v60 = vpop.f32.mrb[38].mxu0  ;;  %v7809_v53 = vld [vmem:[%s9433_s3 + $0x1cc] sm:$0xff]   ;;  %v7814_v58 = vld [vmem:[%s9433_s3 + $0x118] sm:$0xff]  }
 0x1ce   : > { %v1564_v61 = vpop.f32.mrb[39].mxu0  ;;  %v7816_v60 = vld [vmem:[%s9433_s3 + $0x160] sm:$0xff]  }
 0x1cf   : > { %v7817_v61 = vld [vmem:[%s9433_s3 + $0x1dc] sm:$0xff]  }
 0x1d3   : > { %v1622_v62 = vpop.f32.mrb[36].mxu1 }
 0x1d4   : > { %v1629_v63 = vadd.f32 %v1622_v62, %v1566_v57  ;;  %v1624_v1 = vpop.f32.mrb[37].mxu1  ;;  %v7813_v57 = vld [vmem:[%s9433_s3 + $0x1d4] sm:$0xff]   ;;  %v7818_v62 = vld [vmem:[%s9433_s3 + $0x120] sm:$0xff]  }
 0x1d5   : > { %v1630_v3 = vadd.f32 %v1624_v1, %v1567_v59  ;;  %v1626_v5 = vpop.f32.mrb[38].mxu1  ;;  %v7815_v59 = vld [vmem:[%s9433_s3 + $0x194] sm:$0xff]   ;;  %v7820_v1 = vld [vmem:[%s9433_s3 + $0x168] sm:$0xff]  }
 0x1d6   : > { %v1627_v6 = vpop.f32.mrb[39].mxu1  ;;  %v7822_v5 = vld [vmem:[%s9433_s3 + $0x128] sm:$0xff]  }
 0x1d7   : > { %v1685_v7 = vpop.f32.mrb[40].mxu0  ;;  %v7823_v6 = vld [vmem:[%s9433_s3 + $0x1a4] sm:$0xff]  }
 0x1d8   : > { %v1692_v8 = vadd.f32 %v1685_v7, %v1629_v63  ;;  %v1687_v9 = vpop.f32.mrb[41].mxu0  ;;  %v7819_v63 = vld [vmem:[%s9433_s3 + $0x19c] sm:$0xff]   ;;  %v7824_v7 = vld [vmem:[%s9433_s3 + $0x170] ss:$0 sps:$4 sm:$0xff]  }
 0x1d9   : > { %v1693_v10 = vadd.f32 %v1687_v9, %v1630_v3  ;;  %v1689_v11 = vpop.f32.mrb[42].mxu0  ;;  %v7821_v3 = vld [vmem:[%s9433_s3 + $0x1e4] sm:$0xff]   ;;  %v7826_v9 = vld [vmem:[%s9433_s3 + $0x130] sm:$0xff]  }
 0x1da   : > { %v1690_v12 = vpop.f32.mrb[43].mxu0  ;;  %v8086_v11 = vmov 0.0  }
 0x1df   : > { %v1748_v13 = vpop.f32.mrb[40].mxu1 }
 0x1e0   : > { %v1755_v14 = vadd.f32 %v1748_v13, %v1692_v8  ;;  %v1750_v15 = vpop.f32.mrb[41].mxu1  ;;  %v7825_v8 = vld [vmem:[%s9433_s3 + $0x1ec] ss:$0 sps:$4 sm:$0xff]  }
 0x1e1   : > { %v1756_v16 = vadd.f32 %v1750_v15, %v1693_v10  ;;  %v1752_v17 = vpop.f32.mrb[42].mxu1  ;;  %v7827_v10 = vld [vmem:[%s9433_s3 + $0x1ac] sm:$0xff]  }
 0x1e2   : > { %v1753_v2 = vpop.f32.mrb[43].mxu1 }
 0x1e3   : > { %v1811_v18 = vpop.f32.mrb[44].mxu0 }
 0x1e4   : > { %v1818_v19 = vadd.f32 %v1811_v18, %v1755_v14  ;;  %v1813_v20 = vpop.f32.mrb[45].mxu0 }
 0x1e5   : > { %v1819_v4 = vadd.f32 %v1813_v20, %v1756_v16  ;;  %v1815_v21 = vpop.f32.mrb[46].mxu0 }
 0x1e6   : > { %v1816_v22 = vpop.f32.mrb[47].mxu0 }
 0x1eb   : > { %v1874_v23 = vpop.f32.mrb[44].mxu1 }
 0x1ec   : > { %v1881_v24 = vadd.f32 %v1874_v23, %v1818_v19  ;;  %v1876_v25 = vpop.f32.mrb[45].mxu1 }
 0x1ed   : > { %v1882_v26 = vadd.f32 %v1876_v25, %v1819_v4  ;;  %v1878_v27 = vpop.f32.mrb[46].mxu1 }
 0x1ee   : > { %v1879_v28 = vpop.f32.mrb[47].mxu1 }
 0x1ef   : > { %v1937_v29 = vpop.f32.mrb[48].mxu0 }
 0x1f0   : > { %v1944_v31 = vadd.f32 %v1937_v29, %v1881_v24  ;;  %v1939_v32 = vpop.f32.mrb[49].mxu0 }
 0x1f1   : > { %v1945_v33 = vadd.f32 %v1939_v32, %v1882_v26  ;;  %v1941_v34 = vpop.f32.mrb[50].mxu0 }
 0x1f2   : > { %v1952_v35 = vadd.f32 %v1950_v30, %v1944_v31  ;;  %v1942_v36 = vpop.f32.mrb[51].mxu0 }
 0x1f3   : > { %v1953_v37 = vadd.f32 %v1950_v30, %v1945_v33  ;;  %v4106_v36 = vld [vmem:[%s9435_s5] sm:$0xff] }
 0x1f4   : > { %v1954_v38 = vmax.f32 %v1952_v35, 0.0  ;;  %v7828_v35 = vld [vmem:[%s9434_s4] sm:$0xff]  }
 0x1f5   : > { %v1955_v39 = vmax.f32 %v1953_v37, 0.0  ;;  %v4107_v37 = vld [vmem:[%s9435_s5 + $0x8] sm:$0xff] }
 0x1f6   : > { %v8612_v43 = vpack.c.bf16 %v1954_v38, %v1954_v38 }
 0x1f7   : > { %v1957_v40 = vpack.c.bf16 %v1955_v39, %v1955_v39 }
 0x1f9   : > { %6797 = vmatprep.mubr.msk.bf16.mxu1 %vm2082_vm12, %v1957_v40  ;;  %6845 = vmatprep.mubr.msk.bf16.mxu0 %vm2082_vm12, %v1957_v40 }
 0x1fa   : > { %2122 = vmatmul.mubr.bf16.vlgmr.msra.gmra.mrb[48].mxu1 %v8612_v43  ;;  %2290 = vmatmul.mubr.bf16.vlgmr.msra.gmra.mrb[52].mxu0 %v8612_v43 }
 0x1fb   : > { %7317 = vmatpush3.bf16.msra.mxu1 %v7798_v41  ;;  %7339 = vmatpush3.bf16.msra.mxu0 %v7799_v42  ;;  %v7829_v42 = vld [vmem:[%s9434_s4 + $0x8] sm:$0xff]  }
 0x1fc   : > { %6893 = vmatprep.mubr.msk.bf16.mxu1 %vm2082_vm12, %v1957_v40  ;;  %6941 = vmatprep.mubr.msk.bf16.mxu0 %vm2082_vm12, %v1957_v40 }
 0x1fd   : > { %7318 = vmatprep.subr.bf16.mxu1 %v7800_v44  ;;  %7340 = vmatprep.subr.bf16.mxu0 %v7801_v45 }
 0x1ff   : > { %7319 = vmatpush3.bf16.msra.mxu1 %v7802_v46  ;;  %7341 = vmatpush3.bf16.msra.mxu0 %v7803_v47 }
 0x200   : > { %7320 = vmatprep.subr.bf16.mxu1 %v7804_v48  ;;  %7342 = vmatprep.subr.bf16.mxu0 %v7805_v49  ;;  %v7831_v48 = vld [vmem:[%s9434_s4 + $0x10] sm:$0xff]   ;;  %v7832_v49 = vld [vmem:[%s9434_s4 + $0x28] sm:$0xff]  }
 0x203   : > { %7321 = vmatpush3.bf16.msra.mxu1 %v7806_v50  ;;  %7343 = vmatpush3.bf16.msra.mxu0 %v7807_v51 }
 0x204   : > { %7322 = vmatprep.subr.bf16.mxu1 %v7808_v52  ;;  %7344 = vmatprep.subr.bf16.mxu0 %v7809_v53 }
 0x207   : > { %7323 = vmatpush3.bf16.msra.mxu1 %v7810_v54  ;;  %7345 = vmatpush3.bf16.msra.mxu0 %v7811_v55  ;;  %v7833_v54 = vld [vmem:[%s9434_s4 + $0x20] sm:$0xff]   ;;  %v7834_v55 = vld [vmem:[%s9434_s4 + $0x38] sm:$0xff]  }
 0x208   : > { %7324 = vmatprep.subr.bf16.mxu1 %v7812_v56  ;;  %7346 = vmatprep.subr.bf16.mxu0 %v7813_v57 }
 0x20b   : > { %7325 = vmatpush3.bf16.msra.mxu1 %v7814_v58  ;;  %7347 = vmatpush3.bf16.msra.mxu0 %v7815_v59 }
 0x20c   : > { %7326 = vmatprep.subr.bf16.mxu1 %v7816_v60  ;;  %7348 = vmatprep.subr.bf16.mxu0 %v7817_v61  ;;  %v7835_v60 = vld [vmem:[%s9434_s4 + $0x30] sm:$0xff]   ;;  %v7836_v61 = vld [vmem:[%s9434_s4 + $0x48] sm:$0xff]  }
 0x20f   : > { %7327 = vmatpush3.bf16.msra.mxu1 %v7818_v62  ;;  %7349 = vmatpush3.bf16.msra.mxu0 %v7819_v63 }
 0x210   : > { %7328 = vmatprep.subr.bf16.mxu1 %v7820_v1  ;;  %7350 = vmatprep.subr.bf16.mxu0 %v7821_v3 }
 0x213   : > { %7329 = vmatpush3.bf16.msra.mxu1 %v7822_v5  ;;  %7351 = vmatpush3.bf16.msra.mxu0 %v7823_v6  ;;  %v7837_v5 = vld [vmem:[%s9434_s4 + $0x40] sm:$0xff]   ;;  %v7838_v6 = vld [vmem:[%s9434_s4 + $0x58] sm:$0xff]  }
 0x214   : > { %7674 = vmatprep.subr.msk.bf16.mxu1 %vm405_vm0, %v7824_v7  ;;  %7675 = vmatprep.subr.msk.bf16.mxu0 %vm405_vm0, %v7825_v8 }
 0x217   : > { %7331 = vmatpush3.bf16.msra.mxu1 %v7826_v9  ;;  %7353 = vmatpush3.bf16.msra.mxu0 %v7827_v10 }
 0x218   : > { %7480 = vmatprep.subr.bf16.mxu0 %v8086_v11  ;;  %7474 = vmatprep.subr.bf16.mxu1 %v8086_v11 }
 0x21a   : > { %2459 = vmatmul.mubr.bf16.vlgmr.msra.gmra.mrb[52].mxu1 %v8612_v43  ;;  %2628 = vmatmul.mubr.bf16.vlgmr.msra.gmra.mrb[56].mxu0 %v8612_v43  ;;  %v7830_v43 = vld [vmem:[%s9434_s4 + $0x18] sm:$0xff]  }
 0x21b   : > { %7482 = vmatprep.mubr.msk.bf16.mxu0 %vm8087_vm13, %v8086_v11  ;;  %7476 = vmatprep.mubr.msk.bf16.mxu1 %vm8087_vm13, %v8086_v11 }
 0x2cd   : > { %v7288_v12 = vpop.f32.mrb[48].mxu1  ;;  %v7310_v13 = vpop.f32.mrb[52].mxu0 }
 0x2ce   : > { %v7289_v14 = vpop.f32.mrb[49].mxu1  ;;  %v7311_v15 = vpop.f32.mrb[53].mxu0 }
 0x2cf   : > { %v7290_v16 = vadd.f32 %v7289_v14, %v7288_v12  ;;  %v7312_v17 = vadd.f32 %v7311_v15, %v7310_v13  ;;  %v7291_v2 = vpop.f32.mrb[50].mxu1  ;;  %v7313_v18 = vpop.f32.mrb[54].mxu0  ;;  %v7839_v12 = vld [vmem:[%s9434_s4 + $0x50] sm:$0xff]   ;;  %v7840_v13 = vld [vmem:[%s9434_s4 + $0x68] sm:$0xff]  }
 0x2d0   : > { %v7292_v19 = vpop.f32.mrb[51].mxu1  ;;  %v7314_v20 = vpop.f32.mrb[55].mxu0  ;;  %v7841_v2 = vld [vmem:[%s9434_s4 + $0x60] sm:$0xff]   ;;  %v7842_v18 = vld [vmem:[%s9434_s4 + $0x78] sm:$0xff]  }
 0x2d1   : > { %v2297_v4 = vmax.f32 %v7290_v16, %v7312_v17 }
 0x2ed   : > { %v7332_v21 = vpop.f32.mrb[52].mxu1  ;;  %v7354_v22 = vpop.f32.mrb[56].mxu0 }
 0x2ee   : > { %v7333_v23 = vpop.f32.mrb[53].mxu1  ;;  %v7355_v24 = vpop.f32.mrb[57].mxu0 }
 0x2ef   : > { %v7334_v25 = vadd.f32 %v7333_v23, %v7332_v21  ;;  %v7356_v26 = vadd.f32 %v7355_v24, %v7354_v22  ;;  %v7335_v27 = vpop.f32.mrb[54].mxu1  ;;  %v7357_v28 = vpop.f32.mrb[58].mxu0  ;;  %v7843_v22 = vld [vmem:[%s9434_s4 + $0x70] sm:$0xff]   ;;  %v7844_v23 = vld [vmem:[%s9434_s4 + $0x88] sm:$0xff]  }
 0x2f0   : > { %v7336_v29 = vpop.f32.mrb[55].mxu1  ;;  %v7358_v30 = vpop.f32.mrb[59].mxu0  ;;  %v7845_v28 = vld [vmem:[%s9434_s4 + $0x80] sm:$0xff]  }
 0x2f1   : > { %v2466_v31 = vmax.f32 %v2297_v4, %v7334_v25  ;;  %v7846_v29 = vld [vmem:[%s9434_s4 + $0x98] sm:$0xff]  }
 0x2f3   : > { %v2635_v32 = vmax.f32 %v2466_v31, %v7356_v26 }
 0x2f5   : > { %v2636_v33 = vpack.c.bf16 %v2635_v32, %v2635_v32 }
 0x2f7   : > { %2816 = vrot.lane.b32.xlu0 %v2636_v33, %s9456_s22  ;;  %2648 = vrot.lane.b32.xlu1 %v2636_v33, %s9457_s13  ;;  %v2706_v34 = vsel %vm405_vm0, %v2636_v33, 0  ;;  %s8093_s22 = smov 105   ;;  %s9461_s13 = smov 108  }
 0x2f8   : > { %7481 = vmatpush3.bf16.msra.mxu0 %v2706_v34  ;;  %v7847_v34 = vld [vmem:[%s9434_s4 + $0x90] sm:$0xff]  }
 0x2f9   : > { %7492 = vmatprep.subr.bf16.mxu0 %v8086_v11 }
 0x2fb   : > { %2934 = vrot.lane.b32.xlu0 %v2636_v33, %s8088_s14  ;;  %2757 = vrot.lane.b32.xlu1 %v2636_v33, %s9458_s24  ;;  %s8095_s14 = smov 96   ;;  %s8096_s24 = smov 104  }
 0x2fc   : > { %7483 = vmatmul.mubr.msk.bf16.vlgmr.msra.gmra.mrb[60].mxu0 %vm401_vm1, %v7828_v35  ;;  %v7848_v35 = vld [vmem:[%s9434_s4 + $0xa8] sm:$0xff]  }
 0x2fd   : > { %7494 = vmatprep.mubr.msk.bf16.mxu0 %vm8087_vm13, %v8086_v11 }
 0x2ff   : > { %3052 = vrot.lane.b32.xlu0 %v2636_v33, %s8089_s15  ;;  %2875 = vrot.lane.b32.xlu1 %v2636_v33, %s9459_s29  ;;  %s8097_s15 = smov 94   ;;  %s8098_s29 = smov 97  }
 0x303   : > { %3170 = vrot.lane.b32.xlu0 %v2636_v33, %s8090_s16  ;;  %2993 = vrot.lane.b32.xlu1 %v2636_v33, %s8091_s25  ;;  %s8099_s16 = smov 87   ;;  %s8100_s25 = smov 95  }
 0x307   : > { %3288 = vrot.lane.b32.xlu0 %v2636_v33, %s9460_s0  ;;  %3111 = vrot.lane.b32.xlu1 %v2636_v33, %s8092_s1  ;;  %s8101_s0 = smov 85   ;;  %s9463_s1 = smov 88  }
 0x30b   : > { %3406 = vrot.lane.b32.xlu0 %v2636_v33, %s8093_s22  ;;  %3229 = vrot.lane.b32.xlu1 %v2636_v33, %s9461_s13 }
 0x30f   : > { %3524 = vrot.lane.b32.xlu0 %v2636_v33, %s8094_s30  ;;  %3347 = vrot.lane.b32.xlu1 %v2636_v33, %s9462_s12  ;;  %s8102_s30 = smov 86   ;;  %s8103_s12 = smov 84  }
 0x313   : > { %3642 = vrot.lane.b32.xlu0 %v2636_v33, %s8095_s14  ;;  %3465 = vrot.lane.b32.xlu1 %v2636_v33, %s8096_s24  ;;  %s377_s14 = sand.u32 1, %s8051_s18  }
 0x314   : > { %s6632_s13 = scalar_lea.sflag [#allocation3], %s377_s14 }
 0x317   : > { %3760 = vrot.lane.b32.xlu0 %v2636_v33, %s8097_s15  ;;  %3583 = vrot.lane.b32.xlu1 %v2636_v33, %s8098_s29  ;;  %s7269_s29 = sshll.u32 %s8186_s21, 4  ;;  %s8104_s21 = smov [#allocation2]  }
 0x318   : > { %s9388_s22 = scalar_lea.hbm %s9441_s11, %s7269_s29 }
 0x31b   : > { %3878 = vrot.lane.b32.xlu0 %v2636_v33, %s8099_s16  ;;  %3701 = vrot.lane.b32.xlu1 %v2636_v33, %s8100_s25  ;;  %s378_s16 = scalar_lea.vmem [#allocation2], %s377_s14 }
 0x31c   : > { %s6644_s25 = sshll.u32 %s378_s16, 4  ;;  %s9390_s25 = int_to_ptr.vmem [resolvable:$true] %s6644_s25 }
 0x31f   : > { %3996 = vrot.lane.b32.xlu0 %v2636_v33, %s8101_s0  ;;  %3819 = vrot.lane.b32.xlu1 %v2636_v33, %s9463_s1 }
 0x323   : > { %4110 = vperm.xlu0 %7759, %v4106_v36   ;;  %3937 = vrot.lane.b32.xlu1 %v2636_v33, %s8102_s30  ;;  %s7997_s30 = scalar_lea.vmem %s9390_s25, 16 }
 0x324   : > { %p7998_p11 = scmp.ne.s32.totalorder %s9390_s25, %s7997_s30 }
 0x326   : > { %p7999_p12 = pnand %p7998_p11, %p8203_p5 }
 0x327   : > { %4055 = vrot.lane.b32.xlu1 %v2636_v33, %s8103_s12  ;;  %s8001_s12 = sshll.u32 %s8104_s21, 4  ;;  %s8002_s12 = int_to_ptr.vmem [resolvable:$false] %s8001_s12 }
 0x328   : > { %p8000_p13 = pneg %p7999_p12  ;;  %s8003_s24 = scalar_lea.vmem %s8002_s12, 32 }
 0x329   : > { %p8004_p0 = scmp.lt.s32.totalorder %s9390_s25, %s8002_s12  ;;  %p8005_p1 = scmp.lt.s32.totalorder %s8003_s24, %s7997_s30 }
 0x32b   : > { %4115 = vperm.xlu1 %7760, %v4107_v37   ;;  %p8006_p2 = por %p8005_p1, %p8004_p0 }
 0x32d   : > { %p8007_p3 = pnand %p8006_p2, %p8000_p13 }
 0x369   : > { %v2817_v38 = vpop.permute.xlu0 %2816  ;;  %v2649_v39 = vpop.permute.xlu1 %2648 }
 0x36a   : > { %v2822_v40 = vsel %vm405_vm0, %v2817_v38, 0  ;;  %v2654_v41 = vsel %vm405_vm0, %v2649_v39, 0 }
 0x36b   : > { %7475 = vmatpush3.bf16.msra.mxu1 %v2654_v41  ;;  %7493 = vmatpush3.bf16.msra.mxu0 %v2822_v40  ;;  %v7849_v40 = vld [vmem:[%s9434_s4 + $0xa0] sm:$0xff]   ;;  %v7851_v41 = vld [vmem:[%s9434_s4 + $0xb8] sm:$0xff]  }
 0x36c   : > { %7486 = vmatprep.subr.bf16.mxu1 %v8086_v11  ;;  %7504 = vmatprep.subr.bf16.mxu0 %v8086_v11 }
 0x36d   : > { %v2935_v44 = vpop.permute.xlu0 %2934  ;;  %v2758_v45 = vpop.permute.xlu1 %2757 }
 0x36e   : > { %v2940_v46 = vsel %vm405_vm0, %v2935_v44, 0  ;;  %v2763_v47 = vsel %vm405_vm0, %v2758_v45, 0  ;;  %7477 = vmatmul.mubr.msk.bf16.vlgmr.msra.gmra.mrb[56].mxu1 %vm401_vm1, %v7829_v42  ;;  %7495 = vmatmul.mubr.msk.bf16.vlgmr.msra.gmra.mrb[64].mxu0 %vm401_vm1, %v7830_v43  ;;  %v7850_v44 = vld [vmem:[%s9434_s4 + $0xb0] sm:$0xff]  }
 0x36f   : > { %7487 = vmatpush3.bf16.msra.mxu1 %v2763_v47  ;;  %7505 = vmatpush3.bf16.msra.mxu0 %v2940_v46  ;;  %v7852_v47 = vld [vmem:[%s9434_s4 + $0xc0] sm:$0xff]  }
 0x370   : > { %7488 = vmatprep.mubr.msk.bf16.mxu1 %vm8087_vm13, %v8086_v11  ;;  %7498 = vmatprep.subr.bf16.mxu1 %v8086_v11 }
 0x371   : > { %7506 = vmatprep.mubr.msk.bf16.mxu0 %vm8087_vm13, %v8086_v11  ;;  %7516 = vmatprep.subr.bf16.mxu0 %v8086_v11  ;;  %v3053_v50 = vpop.permute.xlu0 %3052  ;;  %v2876_v51 = vpop.permute.xlu1 %2875 }
 0x372   : > { %v3058_v52 = vsel %vm405_vm0, %v3053_v50, 0  ;;  %v2881_v53 = vsel %vm405_vm0, %v2876_v51, 0 }
 0x375   : > { %v3171_v56 = vpop.permute.xlu0 %3170  ;;  %v2994_v57 = vpop.permute.xlu1 %2993 }
 0x376   : > { %7489 = vmatmul.mubr.msk.bf16.vlgmr.msra.gmra.mrb[60].mxu1 %vm401_vm1, %v7831_v48  ;;  %7507 = vmatmul.mubr.msk.bf16.vlgmr.msra.gmra.mrb[68].mxu0 %vm401_vm1, %v7832_v49  ;;  %v3176_v58 = vsel %vm405_vm0, %v3171_v56, 0  ;;  %v2999_v59 = vsel %vm405_vm0, %v2994_v57, 0  ;;  %v7857_v56 = vld [vmem:[%s9436_s6 + $0x10] sm:$0xff]  }
 0x377   : > { %7499 = vmatpush3.bf16.msra.mxu1 %v2881_v53  ;;  %7517 = vmatpush3.bf16.msra.mxu0 %v3058_v52  ;;  %v7853_v52 = vld [vmem:[%s9436_s6] sm:$0xff]   ;;  %v7858_v57 = vld [vmem:[%s9436_s6 + $0x2c] sm:$0xff]  }
 0x378   : > { %7500 = vmatprep.mubr.msk.bf16.mxu1 %vm8087_vm13, %v8086_v11  ;;  %7510 = vmatprep.subr.bf16.mxu1 %v8086_v11  ;;  %v7854_v53 = vld [vmem:[%s9436_s6 + $0x1c] sm:$0xff]  }
 0x379   : > { %7518 = vmatprep.mubr.msk.bf16.mxu0 %vm8087_vm13, %v8086_v11  ;;  %7528 = vmatprep.subr.bf16.mxu0 %v8086_v11  ;;  %v3289_v62 = vpop.permute.xlu0 %3288  ;;  %v3112_v63 = vpop.permute.xlu1 %3111 }
 0x37a   : > { %v3294_v1 = vsel %vm405_vm0, %v3289_v62, 0  ;;  %v3117_v3 = vsel %vm405_vm0, %v3112_v63, 0 }
 0x37d   : > { %v3407_v7 = vpop.permute.xlu0 %3406  ;;  %v3230_v8 = vpop.permute.xlu1 %3229 }
 0x37e   : > { %7501 = vmatmul.mubr.msk.bf16.vlgmr.msra.gmra.mrb[64].mxu1 %vm401_vm1, %v7833_v54  ;;  %7519 = vmatmul.mubr.msk.bf16.vlgmr.msra.gmra.mrb[72].mxu0 %vm401_vm1, %v7834_v55  ;;  %v3412_v9 = vsel %vm405_vm0, %v3407_v7, 0  ;;  %v3235_v10 = vsel %vm405_vm0, %v3230_v8, 0  ;;  %v7855_v54 = vld [vmem:[%s9436_s6 + $0x8] sm:$0xff]  }
 0x37f   : > { %7511 = vmatpush3.bf16.msra.mxu1 %v2999_v59  ;;  %7529 = vmatpush3.bf16.msra.mxu0 %v3176_v58  ;;  %v7856_v55 = vld [vmem:[%s9436_s6 + $0x24] sm:$0xff]   ;;  %v7859_v58 = vld [vmem:[%s9436_s6 + $0x18] ss:$0 sps:$4 sm:$0xff]   ;;  %v7860_v59 = vld [vmem:[%s9436_s6 + $0x34] ss:$0 sps:$4 sm:$0xff]  }
 0x380   : > { %7512 = vmatprep.mubr.msk.bf16.mxu1 %vm8087_vm13, %v8086_v11  ;;  %7522 = vmatprep.subr.bf16.mxu1 %v8086_v11 }
 0x381   : > { %7530 = vmatprep.mubr.msk.bf16.mxu0 %vm8087_vm13, %v8086_v11  ;;  %7540 = vmatprep.subr.bf16.mxu0 %v8086_v11  ;;  %v3525_v14 = vpop.permute.xlu0 %3524  ;;  %v3348_v15 = vpop.permute.xlu1 %3347 }
 0x382   : > { %v3530_v16 = vsel %vm405_vm0, %v3525_v14, 0  ;;  %v3353_v17 = vsel %vm405_vm0, %v3348_v15, 0 }
 0x385   : > { %v3643_v19 = vpop.permute.xlu0 %3642  ;;  %v3466_v20 = vpop.permute.xlu1 %3465 }
 0x386   : > { %7513 = vmatmul.mubr.msk.bf16.vlgmr.msra.gmra.mrb[68].mxu1 %vm401_vm1, %v7835_v60  ;;  %7531 = vmatmul.mubr.msk.bf16.vlgmr.msra.gmra.mrb[76].mxu0 %vm401_vm1, %v7836_v61  ;;  %v3648_v4 = vsel %vm405_vm0, %v3643_v19, 0  ;;  %v3471_v21 = vsel %vm405_vm0, %v3466_v20, 0  ;;  %v4156_v60 = vsel %vm405_vm0, %v7859_v58, 0  ;;  %v4229_v61 = vsel %vm405_vm0, %v7860_v59, 0 }
 0x387   : > { %7523 = vmatpush3.bf16.msra.mxu1 %v3117_v3  ;;  %7541 = vmatpush3.bf16.msra.mxu0 %v3294_v1 }
 0x388   : > { %7524 = vmatprep.mubr.msk.bf16.mxu1 %vm8087_vm13, %v8086_v11  ;;  %7534 = vmatprep.subr.bf16.mxu1 %v8086_v11 }
 0x389   : > { %7542 = vmatprep.mubr.msk.bf16.mxu0 %vm8087_vm13, %v8086_v11  ;;  %7552 = vmatprep.subr.bf16.mxu0 %v8086_v11  ;;  %v3761_v24 = vpop.permute.xlu0 %3760  ;;  %v3584_v25 = vpop.permute.xlu1 %3583 }
 0x38a   : > { %v3766_v26 = vsel %vm405_vm0, %v3761_v24, 0  ;;  %v3589_v27 = vsel %vm405_vm0, %v3584_v25, 0 }
 0x38d   : > { %v3879_v30 = vpop.permute.xlu0 %3878  ;;  %v3702_v31 = vpop.permute.xlu1 %3701 }
 0x38e   : > { %7525 = vmatmul.mubr.msk.bf16.vlgmr.msra.gmra.mrb[72].mxu1 %vm401_vm1, %v7837_v5  ;;  %7543 = vmatmul.mubr.msk.bf16.vlgmr.msra.gmra.mrb[80].mxu0 %vm401_vm1, %v7838_v6  ;;  %v3884_v32 = vsel %vm405_vm0, %v3879_v30, 0  ;;  %v3707_v33 = vsel %vm405_vm0, %v3702_v31, 0 }
 0x38f   : > { %7535 = vmatpush3.bf16.msra.mxu1 %v3235_v10  ;;  %7553 = vmatpush3.bf16.msra.mxu0 %v3412_v9 }
 0x390   : > { %7536 = vmatprep.mubr.msk.bf16.mxu1 %vm8087_vm13, %v8086_v11  ;;  %7546 = vmatprep.subr.bf16.mxu1 %v8086_v11 }
 0x391   : > { %7554 = vmatprep.mubr.msk.bf16.mxu0 %vm8087_vm13, %v8086_v11  ;;  %7564 = vmatprep.subr.bf16.mxu0 %v8086_v11  ;;  %v3997_v36 = vpop.permute.xlu0 %3996  ;;  %v3820_v37 = vpop.permute.xlu1 %3819 }
 0x392   : > { %v4002_v38 = vsel %vm405_vm0, %v3997_v36, 0  ;;  %v3825_v39 = vsel %vm405_vm0, %v3820_v37, 0 }
 0x395   : > { %v3938_v42 = vpop.permute.xlu1 %3937 }
 0x396   : > { %7537 = vmatmul.mubr.msk.bf16.vlgmr.msra.gmra.mrb[76].mxu1 %vm401_vm1, %v7839_v12  ;;  %7555 = vmatmul.mubr.msk.bf16.vlgmr.msra.gmra.mrb[84].mxu0 %vm401_vm1, %v7840_v13  ;;  %v3943_v43 = vsel %vm405_vm0, %v3938_v42, 0 }
 0x397   : > { %7547 = vmatpush3.bf16.msra.mxu1 %v3353_v17  ;;  %7565 = vmatpush3.bf16.msra.mxu0 %v3530_v16 }
 0x398   : > { %7548 = vmatprep.mubr.msk.bf16.mxu1 %vm8087_vm13, %v8086_v11  ;;  %7558 = vmatprep.subr.bf16.mxu1 %v8086_v11 }
 0x399   : > { %7566 = vmatprep.mubr.msk.bf16.mxu0 %vm8087_vm13, %v8086_v11  ;;  %7576 = vmatprep.subr.bf16.mxu0 %v8086_v11  ;;  %v4056_v45 = vpop.permute.xlu1 %4055 }
 0x39a   : > { %v4061_v46 = vsel %vm405_vm0, %v4056_v45, 0 }
 0x39e   : > { %7549 = vmatmul.mubr.msk.bf16.vlgmr.msra.gmra.mrb[80].mxu1 %vm401_vm1, %v7841_v2  ;;  %7567 = vmatmul.mubr.msk.bf16.vlgmr.msra.gmra.mrb[88].mxu0 %vm401_vm1, %v7842_v18 }
 0x39f   : > { %7559 = vmatpush3.bf16.msra.mxu1 %v3471_v21  ;;  %7577 = vmatpush3.bf16.msra.mxu0 %v3648_v4 }
 0x3a0   : > { %7560 = vmatprep.mubr.msk.bf16.mxu1 %vm8087_vm13, %v8086_v11  ;;  %7570 = vmatprep.subr.bf16.mxu1 %v8086_v11 }
 0x3a1   : > { %7578 = vmatprep.mubr.msk.bf16.mxu0 %vm8087_vm13, %v8086_v11  ;;  %7588 = vmatprep.subr.bf16.mxu0 %v8086_v11 }
 0x3a6   : > { %7561 = vmatmul.mubr.msk.bf16.vlgmr.msra.gmra.mrb[84].mxu1 %vm401_vm1, %v7843_v22  ;;  %7579 = vmatmul.mubr.msk.bf16.vlgmr.msra.gmra.mrb[92].mxu0 %vm401_vm1, %v7844_v23 }
 0x3a7   : > { %7571 = vmatpush3.bf16.msra.mxu1 %v3589_v27  ;;  %7589 = vmatpush3.bf16.msra.mxu0 %v3766_v26 }
 0x3a8   : > { %7572 = vmatprep.mubr.msk.bf16.mxu1 %vm8087_vm13, %v8086_v11  ;;  %7582 = vmatprep.subr.bf16.mxu1 %v8086_v11 }
 0x3a9   : > { %7590 = vmatprep.mubr.msk.bf16.mxu0 %vm8087_vm13, %v8086_v11  ;;  %7600 = vmatprep.subr.bf16.mxu0 %v8086_v11 }
 0x3ae   : > { %7573 = vmatmul.mubr.msk.bf16.vlgmr.msra.gmra.mrb[88].mxu1 %vm401_vm1, %v7845_v28  ;;  %7591 = vmatmul.mubr.msk.bf16.vlgmr.msra.gmra.mrb[96].mxu0 %vm401_vm1, %v7846_v29 }
 0x3af   : > { %7583 = vmatpush3.bf16.msra.mxu1 %v3707_v33  ;;  %7601 = vmatpush3.bf16.msra.mxu0 %v3884_v32 }
 0x3b0   : > { %7584 = vmatprep.mubr.msk.bf16.mxu1 %vm8087_vm13, %v8086_v11  ;;  %7594 = vmatprep.subr.bf16.mxu1 %v8086_v11 }
 0x3b1   : > { %7602 = vmatprep.mubr.msk.bf16.mxu0 %vm8087_vm13, %v8086_v11  ;;  %7612 = vmatprep.subr.bf16.mxu0 %v8086_v11 }
 0x3b6   : > { %7585 = vmatmul.mubr.msk.bf16.vlgmr.msra.gmra.mrb[92].mxu1 %vm401_vm1, %v7847_v34  ;;  %7603 = vmatmul.mubr.msk.bf16.vlgmr.msra.gmra.mrb[100].mxu0 %vm401_vm1, %v7848_v35 }
 0x3b7   : > { %7595 = vmatpush3.bf16.msra.mxu1 %v3825_v39  ;;  %7613 = vmatpush3.bf16.msra.mxu0 %v4002_v38 }
 0x3b8   : > { %7596 = vmatprep.mubr.msk.bf16.mxu1 %vm8087_vm13, %v8086_v11  ;;  %7606 = vmatprep.subr.bf16.mxu1 %v8086_v11 }
 0x3b9   : > { %7614 = vmatprep.mubr.msk.bf16.mxu0 %vm8087_vm13, %v8086_v11  ;;  %7624 = vmatprep.subr.bf16.mxu0 %v8086_v11 }
 0x3be   : > { %7597 = vmatmul.mubr.msk.bf16.vlgmr.msra.gmra.mrb[96].mxu1 %vm401_vm1, %v7849_v40  ;;  %7615 = vmatmul.mubr.msk.bf16.vlgmr.msra.gmra.mrb[104].mxu0 %vm401_vm1, %v7851_v41 }
 0x3bf   : > { %7607 = vmatpush3.bf16.msra.mxu1 %v3943_v43  ;;  %7608 = vmatprep.mubr.msk.bf16.mxu1 %vm8087_vm13, %v8086_v11 }
 0x3c0   : > { %7618 = vmatprep.subr.bf16.mxu1 %v8086_v11  ;;  %7632 = vmatprep.mubr.msk.bf16.mxu0 %vm8087_vm13, %v8086_v11 }
 0x3c1   : > { %7625 = vmatpush3.bf16.msra.mxu0 %v7853_v52 }
 0x3c2   : > { %7626 = vmatprep.subr.bf16.mxu0 %v8086_v11 }
 0x3c5   : > { %7627 = vmatpush3.bf16.msra.mxu0 %v7855_v54 }
 0x3c6   : > { %7609 = vmatmul.mubr.msk.bf16.vlgmr.msra.gmra.mrb[100].mxu1 %vm401_vm1, %v7850_v44  ;;  %7628 = vmatprep.subr.bf16.mxu0 %v8086_v11 }
 0x3c7   : > { %7619 = vmatpush3.bf16.msra.mxu1 %v4061_v46  ;;  %7620 = vmatprep.mubr.msk.bf16.mxu1 %vm8087_vm13, %v8086_v11 }
 0x3c8   : > { %7636 = vmatprep.subr.bf16.mxu1 %v8086_v11 }
 0x3c9   : > { %7629 = vmatpush3.bf16.msra.mxu0 %v7857_v56 }
 0x3ca   : > { %7630 = vmatprep.subr.bf16.mxu0 %v8086_v11 }
 0x3cd   : > { %7631 = vmatpush3.bf16.msra.mxu0 %v4156_v60 }
 0x3ce   : > { %7621 = vmatmul.mubr.msk.bf16.vlgmr.msra.gmra.mrb[104].mxu1 %vm401_vm1, %v7852_v47  ;;  %7648 = vmatprep.subr.bf16.mxu0 %v8086_v11  ;;  %vm6629_vm1 = vcmask 73728  }
 0x3cf   : > { %v2742_v48 = vpop.f32.mrb[60].mxu0  ;;  %7644 = vmatprep.mubr.msk.bf16.mxu1 %vm8087_vm13, %v8086_v11  ;;  %7637 = vmatpush3.bf16.msra.mxu1 %v7854_v53 }
 0x3d0   : > { %v7484_v49 = vpop.f32.mrb[61].mxu0  ;;  %7638 = vmatprep.subr.bf16.mxu1 %v8086_v11 }
 0x3d1   : > { %v2745_v50 = vpop.f32.mrb[62].mxu0 }
 0x3d2   : > { %v7485_v51 = vpop.f32.mrb[63].mxu0 }
 0x3d3   : > { %7639 = vmatpush3.bf16.msra.mxu1 %v7856_v55 }
 0x3d4   : > { %7640 = vmatprep.subr.bf16.mxu1 %v8086_v11 }
 0x3d7   : > { %7641 = vmatpush3.bf16.msra.mxu1 %v7858_v57 }
 0x3d8   : > { %7642 = vmatprep.subr.bf16.mxu1 %v8086_v11 }
 0x3db   : > { %7643 = vmatpush3.bf16.msra.mxu1 %v4229_v61 }
 0x3dc   : > { %7660 = vmatprep.subr.bf16.mxu1 %v8086_v11 }
 0x441   : > { %v2690_v62 = vpop.f32.mrb[56].mxu1  ;;  %v2858_v63 = vpop.f32.mrb[64].mxu0 }
 0x442   : > { %v7478_v1 = vpop.f32.mrb[57].mxu1  ;;  %v2743_v3 = vadd.f32 %v2742_v48, %v2690_v62  ;;  %v7496_v5 = vpop.f32.mrb[65].mxu0 }
 0x443   : > { %v2693_v6 = vpop.f32.mrb[58].mxu1  ;;  %v2861_v7 = vpop.f32.mrb[66].mxu0 }
 0x444   : > { %v7479_v8 = vpop.f32.mrb[59].mxu1  ;;  %v2746_v9 = vadd.f32 %v2745_v50, %v2693_v6  ;;  %v7497_v10 = vpop.f32.mrb[67].mxu0 }
 0x449   : > { %v2799_v12 = vpop.f32.mrb[60].mxu1  ;;  %v2976_v13 = vpop.f32.mrb[68].mxu0 }
 0x44a   : > { %v2806_v14 = vadd.f32 %v2799_v12, %v2743_v3  ;;  %v7490_v15 = vpop.f32.mrb[61].mxu1  ;;  %v7508_v16 = vpop.f32.mrb[69].mxu0 }
 0x44b   : > { %v2802_v17 = vpop.f32.mrb[62].mxu1  ;;  %v2979_v2 = vpop.f32.mrb[70].mxu0 }
 0x44c   : > { %v2807_v18 = vadd.f32 %v2802_v17, %v2746_v9  ;;  %v2865_v19 = vadd.f32 %v2858_v63, %v2806_v14  ;;  %v7491_v20 = vpop.f32.mrb[63].mxu1  ;;  %v7509_v4 = vpop.f32.mrb[71].mxu0 }
 0x44e   : > { %v2866_v21 = vadd.f32 %v2861_v7, %v2807_v18 }
 0x451   : > { %v2917_v22 = vpop.f32.mrb[64].mxu1  ;;  %v3094_v23 = vpop.f32.mrb[72].mxu0 }
 0x452   : > { %v2924_v24 = vadd.f32 %v2917_v22, %v2865_v19  ;;  %v7502_v25 = vpop.f32.mrb[65].mxu1  ;;  %v7520_v26 = vpop.f32.mrb[73].mxu0 }
 0x453   : > { %v2920_v27 = vpop.f32.mrb[66].mxu1  ;;  %v3097_v28 = vpop.f32.mrb[74].mxu0 }
 0x454   : > { %v2925_v29 = vadd.f32 %v2920_v27, %v2866_v21  ;;  %v2983_v30 = vadd.f32 %v2976_v13, %v2924_v24  ;;  %v7503_v31 = vpop.f32.mrb[67].mxu1  ;;  %v7521_v32 = vpop.f32.mrb[75].mxu0 }
 0x456   : > { %v2984_v33 = vadd.f32 %v2979_v2, %v2925_v29 }
 0x459   : > { %v3035_v34 = vpop.f32.mrb[68].mxu1  ;;  %v3212_v35 = vpop.f32.mrb[76].mxu0 }
 0x45a   : > { %v3042_v36 = vadd.f32 %v3035_v34, %v2983_v30  ;;  %v7514_v37 = vpop.f32.mrb[69].mxu1  ;;  %v7532_v38 = vpop.f32.mrb[77].mxu0 }
 0x45b   : > { %v3038_v39 = vpop.f32.mrb[70].mxu1  ;;  %v3215_v40 = vpop.f32.mrb[78].mxu0 }
 0x45c   : > { %v3043_v41 = vadd.f32 %v3038_v39, %v2984_v33  ;;  %v3101_v42 = vadd.f32 %v3094_v23, %v3042_v36  ;;  %v7515_v43 = vpop.f32.mrb[71].mxu1  ;;  %v7533_v44 = vpop.f32.mrb[79].mxu0 }
 0x45e   : > { %v3102_v45 = vadd.f32 %v3097_v28, %v3043_v41 }
 0x461   : > { %v3153_v46 = vpop.f32.mrb[72].mxu1  ;;  %v3330_v47 = vpop.f32.mrb[80].mxu0 }
 0x462   : > { %v3160_v48 = vadd.f32 %v3153_v46, %v3101_v42  ;;  %v7526_v49 = vpop.f32.mrb[73].mxu1  ;;  %v7544_v50 = vpop.f32.mrb[81].mxu0 }
 0x463   : > { %v3156_v51 = vpop.f32.mrb[74].mxu1  ;;  %v3333_v52 = vpop.f32.mrb[82].mxu0 }
 0x464   : > { %v3161_v53 = vadd.f32 %v3156_v51, %v3102_v45  ;;  %v3219_v54 = vadd.f32 %v3212_v35, %v3160_v48  ;;  %v7527_v55 = vpop.f32.mrb[75].mxu1  ;;  %v7545_v56 = vpop.f32.mrb[83].mxu0 }
 0x466   : > { %v3220_v57 = vadd.f32 %v3215_v40, %v3161_v53 }
 0x469   : > { %v3271_v58 = vpop.f32.mrb[76].mxu1  ;;  %v3448_v59 = vpop.f32.mrb[84].mxu0 }
 0x46a   : > { %v3278_v60 = vadd.f32 %v3271_v58, %v3219_v54  ;;  %v7538_v61 = vpop.f32.mrb[77].mxu1  ;;  %v7556_v62 = vpop.f32.mrb[85].mxu0 }
 0x46b   : > { %v3274_v63 = vpop.f32.mrb[78].mxu1  ;;  %v3451_v1 = vpop.f32.mrb[86].mxu0 }
 0x46c   : > { %v3279_v3 = vadd.f32 %v3274_v63, %v3220_v57  ;;  %v3337_v5 = vadd.f32 %v3330_v47, %v3278_v60  ;;  %v7539_v6 = vpop.f32.mrb[79].mxu1  ;;  %v7557_v7 = vpop.f32.mrb[87].mxu0 }
 0x46e   : > { %v3338_v8 = vadd.f32 %v3333_v52, %v3279_v3 }
 0x471   : > { %v3389_v9 = vpop.f32.mrb[80].mxu1  ;;  %v3566_v10 = vpop.f32.mrb[88].mxu0 }
 0x472   : > { %v3396_v12 = vadd.f32 %v3389_v9, %v3337_v5  ;;  %v7550_v13 = vpop.f32.mrb[81].mxu1  ;;  %v7568_v14 = vpop.f32.mrb[89].mxu0 }
 0x473   : > { %v3392_v15 = vpop.f32.mrb[82].mxu1  ;;  %v3569_v16 = vpop.f32.mrb[90].mxu0 }
 0x474   : > { %v3397_v17 = vadd.f32 %v3392_v15, %v3338_v8  ;;  %v3455_v2 = vadd.f32 %v3448_v59, %v3396_v12  ;;  %v7551_v18 = vpop.f32.mrb[83].mxu1  ;;  %v7569_v19 = vpop.f32.mrb[91].mxu0 }
 0x476   : > { %v3456_v20 = vadd.f32 %v3451_v1, %v3397_v17  ;;  %v4111_v17 = vpop.permute.xlu0 %4110 }
 0x479   : > { %v3507_v4 = vpop.f32.mrb[84].mxu1  ;;  %v3684_v21 = vpop.f32.mrb[92].mxu0 }
 0x47a   : > { %v3514_v22 = vadd.f32 %v3507_v4, %v3455_v2  ;;  %v7562_v23 = vpop.f32.mrb[85].mxu1  ;;  %v7580_v24 = vpop.f32.mrb[93].mxu0 }
 0x47b   : > { %v3510_v25 = vpop.f32.mrb[86].mxu1  ;;  %v3687_v26 = vpop.f32.mrb[94].mxu0 }
 0x47c   : > { %v3515_v27 = vadd.f32 %v3510_v25, %v3456_v20  ;;  %v3573_v28 = vadd.f32 %v3566_v10, %v3514_v22  ;;  %v7563_v29 = vpop.f32.mrb[87].mxu1  ;;  %v7581_v30 = vpop.f32.mrb[95].mxu0 }
 0x47d   : > { %v4116_v20 = vpop.permute.xlu1 %4115  ;;  %v7863_v29 = vld [vmem:[%s9436_s6 + $0x40] sm:$0xff]  }
 0x47e   : > { %v3574_v31 = vadd.f32 %v3569_v16, %v3515_v27  ;;  %v7862_v27 = vld [vmem:[%s9436_s6 + $0x54] sm:$0xff]   ;;  %v7864_v30 = vld [vmem:[%s9436_s6 + $0x5c] sm:$0xff]  }
 0x481   : > { %v3625_v32 = vpop.f32.mrb[88].mxu1  ;;  %v3802_v33 = vpop.f32.mrb[96].mxu0 }
 0x482   : > { %v3632_v34 = vadd.f32 %v3625_v32, %v3573_v28  ;;  %v7574_v35 = vpop.f32.mrb[89].mxu1  ;;  %v7592_v36 = vpop.f32.mrb[97].mxu0  ;;  %v7866_v32 = vld [vmem:[%s9436_s6 + $0x64] sm:$0xff]  }
 0x483   : > { %v3628_v37 = vpop.f32.mrb[90].mxu1  ;;  %v3805_v38 = vpop.f32.mrb[98].mxu0 }
 0x484   : > { %v3633_v39 = vadd.f32 %v3628_v37, %v3574_v31  ;;  %v3691_v40 = vadd.f32 %v3684_v21, %v3632_v34  ;;  %v7575_v41 = vpop.f32.mrb[91].mxu1  ;;  %v7593_v42 = vpop.f32.mrb[99].mxu0  ;;  %v7865_v31 = vld [vmem:[%s9436_s6 + $0x48] sm:$0xff]   ;;  %v7871_v37 = vld [vmem:[%s9437_s7 + $0x24] ss:$16 sps:$4 sm:$0xff]  }
 0x485   : > { %v7868_v34 = vld [vmem:[%s9436_s6 + $0x6c] ss:$0 sps:$4 sm:$0xff]  }
 0x486   : > { %v3692_v43 = vadd.f32 %v3687_v26, %v3633_v39  ;;  %v7861_v26 = vld [vmem:[%s9436_s6 + $0x38] sm:$0xff]   ;;  %v4379_v36 = vsel %vm405_vm0, %v7868_v34, 0 }
 0x487   : > { %v7872_v39 = vld [vmem:[%s9437_s7 + $0x28] ss:$16 sps:$4 sm:$0xff]   ;;  %v7880_v41 = vld [vmem:[%s9437_s7 + $0xc] ss:$16 sps:$4 sm:$0xff]  }
 0x489   : > { %v3743_v44 = vpop.f32.mrb[92].mxu1  ;;  %v3920_v45 = vpop.f32.mrb[100].mxu0 }
 0x48a   : > { %v3750_v46 = vadd.f32 %v3743_v44, %v3691_v40  ;;  %v7586_v47 = vpop.f32.mrb[93].mxu1  ;;  %v7604_v48 = vpop.f32.mrb[101].mxu0  ;;  %v7877_v40 = vld [vmem:[%s9437_s7 + $0x4] ss:$16 sps:$4 sm:$0xff]  }
 0x48b   : > { %v3746_v49 = vpop.f32.mrb[94].mxu1  ;;  %v3923_v50 = vpop.f32.mrb[102].mxu0 }
 0x48c   : > { %v3751_v51 = vadd.f32 %v3746_v49, %v3692_v43  ;;  %v3809_v52 = vadd.f32 %v3802_v33, %v3750_v46  ;;  %v7587_v53 = vpop.f32.mrb[95].mxu1  ;;  %v7605_v54 = vpop.f32.mrb[103].mxu0  ;;  %v7867_v33 = vld [vmem:[%s9436_s6 + $0x50] ss:$0 sps:$4 sm:$0xff]  }
 0x48d   : > { %v4304_v35 = vsel %vm405_vm0, %v7867_v33, 0  ;;  %vm4457_vm0 = vcmask 130048   ;;  %v7914_v33 = vld [vmem:[%s9437_s7 + $0xe8] ss:$16 sps:$4 sm:$0xff]  }
 0x48e   : > { %v3810_v55 = vadd.f32 %v3805_v38, %v3751_v51  ;;  %v7869_v38 = vld [vmem:[%s9437_s7 + $0x20] ss:$16 sps:$4 sm:$0xff]  }
 0x491   : > { %v3861_v56 = vpop.f32.mrb[96].mxu1  ;;  %v4038_v57 = vpop.f32.mrb[104].mxu0 }
 0x492   : > { %v3868_v58 = vadd.f32 %v3861_v56, %v3809_v52  ;;  %v7598_v59 = vpop.f32.mrb[97].mxu1  ;;  %v7616_v60 = vpop.f32.mrb[105].mxu0 }
 0x493   : > { %v3864_v61 = vpop.f32.mrb[98].mxu1  ;;  %v4041_v62 = vpop.f32.mrb[106].mxu0 }
 0x494   : > { %v3869_v63 = vadd.f32 %v3864_v61, %v3810_v55  ;;  %v3927_v1 = vadd.f32 %v3920_v45, %v3868_v58  ;;  %v7599_v3 = vpop.f32.mrb[99].mxu1  ;;  %v7617_v5 = vpop.f32.mrb[107].mxu0 }
 0x495   : > { %v7875_v3 = vld [vmem:[%s9437_s7] ss:$16 sps:$4 sm:$0xff]   ;;  %v7878_v5 = vld [vmem:[%s9437_s7 + $0x8] ss:$16 sps:$4 sm:$0xff]  }
 0x496   : > { %v3928_v6 = vadd.f32 %v3923_v50, %v3869_v63 }
 0x499   : > { %v3979_v7 = vpop.f32.mrb[100].mxu1 }
 0x49a   : > { %v3986_v8 = vadd.f32 %v3979_v7, %v3927_v1  ;;  %v7610_v9 = vpop.f32.mrb[101].mxu1  ;;  %v7883_v7 = vld [vmem:[%s9437_s7 + $0x44] ss:$16 sps:$4 sm:$0xff]  }
 0x49b   : > { %v3982_v10 = vpop.f32.mrb[102].mxu1  ;;  %v7881_v9 = vld [vmem:[%s9437_s7 + $0x40] ss:$16 sps:$4 sm:$0xff]  }
 0x49c   : > { %v3987_v12 = vadd.f32 %v3982_v10, %v3928_v6  ;;  %v4045_v13 = vadd.f32 %v4038_v57, %v3986_v8  ;;  %v7611_v14 = vpop.f32.mrb[103].mxu1  ;;  %v7886_v8 = vld [vmem:[%s9437_s7 + $0x4c] ss:$16 sps:$4 sm:$0xff]   ;;  %v7884_v10 = vld [vmem:[%s9437_s7 + $0x48] ss:$16 sps:$4 sm:$0xff]  }
 0x49d   : > { %v7887_v14 = vld [vmem:[%s9437_s7 + $0x60] ss:$16 sps:$4 sm:$0xff]  }
 0x49e   : > { %v4046_v15 = vadd.f32 %v4041_v62, %v3987_v12  ;;  %v7889_v12 = vld [vmem:[%s9437_s7 + $0x64] ss:$16 sps:$4 sm:$0xff]  }
 0x4a1   : > { %v4097_v16 = vpop.f32.mrb[104].mxu1 }
 0x4a2   : > { %v4104_v2 = vadd.f32 %v4097_v16, %v4045_v13  ;;  %v7622_v18 = vpop.f32.mrb[105].mxu1  ;;  %v7892_v13 = vld [vmem:[%s9437_s7 + $0x6c] ss:$16 sps:$4 sm:$0xff]  }
 0x4a3   : > { %v4100_v19 = vpop.f32.mrb[106].mxu1  ;;  %v7893_v18 = vld [vmem:[%s9437_s7 + $0x80] ss:$16 sps:$4 sm:$0xff]  }
 0x4a4   : > { %v4118_v4 = vadd.f32 %v4111_v17, %v4104_v2  ;;  %v4105_v21 = vadd.f32 %v4100_v19, %v4046_v15  ;;  %v7623_v22 = vpop.f32.mrb[107].mxu1  ;;  %v7890_v15 = vld [vmem:[%s9437_s7 + $0x68] ss:$16 sps:$4 sm:$0xff]   ;;  %v7895_v17 = vld [vmem:[%s9437_s7 + $0x84] ss:$16 sps:$4 sm:$0xff]  }
 0x4a5   : > { %v7898_v2 = vld [vmem:[%s9437_s7 + $0x8c] ss:$16 sps:$4 sm:$0xff]   ;;  %v7896_v19 = vld [vmem:[%s9437_s7 + $0x88] ss:$16 sps:$4 sm:$0xff]   ;;  %v7899_v22 = vld [vmem:[%s9437_s7 + $0xa0] ss:$16 sps:$4 sm:$0xff]  }
 0x4a6   : > { %v4119_v23 = vadd.f32 %v4116_v20, %v4105_v21  ;;  %v4120_v24 = vmax.f32 %v4118_v4, 0.0  ;;  %v7901_v4 = vld [vmem:[%s9437_s7 + $0xa4] ss:$16 sps:$4 sm:$0xff]   ;;  %v7904_v21 = vld [vmem:[%s9437_s7 + $0xac] ss:$16 sps:$4 sm:$0xff]  }
 0x4a8   : > { %v4121_v25 = vmax.f32 %v4119_v23, 0.0  ;;  %v7902_v23 = vld [vmem:[%s9437_s7 + $0xa8] ss:$16 sps:$4 sm:$0xff]  }
 0x4aa   : > { %v4122_v28 = vpack.c.bf16 %v4121_v25, %v4120_v24  ;;  %v7907_v25 = vld [vmem:[%s9437_s7 + $0xc4] ss:$16 sps:$4 sm:$0xff]  }
 0x4ac   : > { %7633 = vmatmul.mubr.msk.bf16.vlgmr.msra.gmra.mrb[108].mxu0 %vm1639_vm7, %v4122_v28  ;;  %7645 = vmatmul.mubr.msk.bf16.vlgmr.msra.gmra.mrb[108].mxu1 %vm1639_vm7, %v4122_v28 }
 0x4ad   : > { %7649 = vmatpush3.bf16.msra.mxu0 %v7861_v26  ;;  %7661 = vmatpush3.bf16.msra.mxu1 %v7862_v27  ;;  %v7910_v26 = vld [vmem:[%s9437_s7 + $0xcc] ss:$16 sps:$4 sm:$0xff]   ;;  %v7905_v27 = vld [vmem:[%s9437_s7 + $0xc0] ss:$16 sps:$4 sm:$0xff]  }
 0x4ae   : > { %7650 = vmatprep.subr.bf16.mxu0 %v8086_v11  ;;  %7662 = vmatprep.subr.bf16.mxu1 %v8086_v11 }
 0x4af   : > { %7656 = vmatprep.mubr.msk.bf16.mxu0 %vm8087_vm13, %v8086_v11  ;;  %7668 = vmatprep.mubr.msk.bf16.mxu1 %vm8087_vm13, %v8086_v11 }
 0x4b1   : > { %7651 = vmatpush3.bf16.msra.mxu0 %v7863_v29  ;;  %7663 = vmatpush3.bf16.msra.mxu1 %v7864_v30  ;;  %v7913_v30 = vld [vmem:[%s9437_s7 + $0xe4] ss:$16 sps:$4 sm:$0xff]  }
 0x4b2   : > { %7652 = vmatprep.subr.bf16.mxu0 %v8086_v11  ;;  %7664 = vmatprep.subr.bf16.mxu1 %v8086_v11 }
 0x4b5   : > { %7653 = vmatpush3.bf16.msra.mxu0 %v7865_v31  ;;  %7665 = vmatpush3.bf16.msra.mxu1 %v7866_v32  ;;  %v7916_v31 = vld [vmem:[%s9437_s7 + $0xec] ss:$16 sps:$4 sm:$0xff]   ;;  %v7911_v32 = vld [vmem:[%s9437_s7 + $0xe0] ss:$16 sps:$4 sm:$0xff]  }
 0x4b6   : > { %7654 = vmatprep.subr.bf16.mxu0 %v8086_v11  ;;  %7666 = vmatprep.subr.bf16.mxu1 %v8086_v11  ;;  %v7874_v11 = vld [vmem:[%s9437_s7 + $0x2c] ss:$16 sps:$4 sm:$0xff]  }
 0x4b9   : > { %7655 = vmatpush3.bf16.msra.mxu0 %v4304_v35  ;;  %7667 = vmatpush3.bf16.msra.mxu1 %v4379_v36  ;;  %v7919_v35 = vld [vmem:[%s9437_s7 + $0x104] ss:$16 sps:$4 sm:$0xff]   ;;  %v7922_v36 = vld [vmem:[%s9437_s7 + $0x10c] ss:$16 sps:$4 sm:$0xff]  }
 0x4ba   : > { %4461 = vmatprep.subr.bf16.mxu0 %v7871_v37  ;;  %4502 = vmatprep.subr.bf16.mxu1 %v7874_v11  ;;  %v7917_v37 = vld [vmem:[%s9437_s7 + $0x100] ss:$16 sps:$4 sm:$0xff]   ;;  %v7920_v11 = vld [vmem:[%s9437_s7 + $0x108] ss:$16 sps:$4 sm:$0xff]  }
 0x4bc   : > { %7657 = vmatmul.mubr.msk.bf16.vlgmr.msra.gmra.mrb[112].mxu0 %vm1639_vm7, %v4122_v28  ;;  %7669 = vmatmul.mubr.msk.bf16.vlgmr.msra.gmra.mrb[112].mxu1 %vm1639_vm7, %v4122_v28  ;;  %v7908_v28 = vld [vmem:[%s9437_s7 + $0xc8] ss:$16 sps:$4 sm:$0xff]  }
 0x4bd   : > { %4493 = vmatprep.mubr.bf16.mxu0 %v8061_v0  ;;  %4534 = vmatprep.mubr.bf16.mxu1 %v8061_v0 }
 0x4be   : > { %4462 = vmatpush1.bf16.msra.mxu0 %v7869_v38  ;;  %4503 = vmatpush1.bf16.msra.mxu1 %v7872_v39  ;;  %v7925_v39 = vld [vmem:[%s9437_s7 + $0x124] ss:$16 sps:$4 sm:$0xff]  }
 0x4bf   : > { %4565 = vmatprep.subr.bf16.mxu0 %v7877_v40  ;;  %4606 = vmatprep.subr.bf16.mxu1 %v7880_v41  ;;  %v7928_v40 = vld [vmem:[%s9437_s7 + $0x12c] ss:$16 sps:$4 sm:$0xff]   ;;  %v7923_v41 = vld [vmem:[%s9437_s7 + $0x120] ss:$16 sps:$4 sm:$0xff]  }
 0x57f   : > { %v4192_v42 = vpop.f32.mrb[108].mxu0  ;;  %v4265_v43 = vpop.f32.mrb[108].mxu1 }
 0x580   : > { %v4272_v44 = vmax.f32 %v4192_v42, %v4265_v43  ;;  %v7634_v45 = vpop.f32.mrb[109].mxu0  ;;  %v7646_v46 = vpop.f32.mrb[109].mxu1  ;;  %v7926_v42 = vld [vmem:[%s9437_s7 + $0x128] ss:$16 sps:$4 sm:$0xff]  }
 0x581   : > { %v4195_v47 = vpop.f32.mrb[110].mxu0  ;;  %v4268_v48 = vpop.f32.mrb[110].mxu1  ;;  %v7934_v45 = vld [vmem:[%s9437_s7 + $0x14c] ss:$16 sps:$4 sm:$0xff]   ;;  %v7929_v46 = vld [vmem:[%s9437_s7 + $0x140] ss:$16 sps:$4 sm:$0xff]  }
 0x582   : > { %v4273_v49 = vmax.f32 %v4195_v47, %v4268_v48  ;;  %v7635_v50 = vpop.f32.mrb[111].mxu0  ;;  %v7647_v51 = vpop.f32.mrb[111].mxu1  ;;  %v7932_v47 = vld [vmem:[%s9437_s7 + $0x148] ss:$16 sps:$4 sm:$0xff]  }
 0x583   : > { %v7940_v50 = vld [vmem:[%s9437_s7 + $0x16c] ss:$16 sps:$4 sm:$0xff]   ;;  %v7935_v51 = vld [vmem:[%s9437_s7 + $0x160] ss:$16 sps:$4 sm:$0xff]  }
 0x58f   : > { %v4340_v52 = vpop.f32.mrb[112].mxu0  ;;  %v4415_v53 = vpop.f32.mrb[112].mxu1 }
 0x590   : > { %v4347_v54 = vmax.f32 %v4272_v44, %v4340_v52  ;;  %v7658_v55 = vpop.f32.mrb[113].mxu0  ;;  %v7670_v56 = vpop.f32.mrb[113].mxu1  ;;  %v7931_v44 = vld [vmem:[%s9437_s7 + $0x144] ss:$16 sps:$4 sm:$0xff]   ;;  %v7938_v52 = vld [vmem:[%s9437_s7 + $0x168] ss:$16 sps:$4 sm:$0xff]  }
 0x591   : > { %v4343_v57 = vpop.f32.mrb[114].mxu0  ;;  %v4418_v58 = vpop.f32.mrb[114].mxu1  ;;  %v7946_v55 = vld [vmem:[%s9437_s7 + $0x18c] ss:$16 sps:$4 sm:$0xff]   ;;  %v7941_v56 = vld [vmem:[%s9437_s7 + $0x180] ss:$16 sps:$4 sm:$0xff]  }
 0x592   : > { %v4422_v59 = vmax.f32 %v4347_v54, %v4415_v53  ;;  %v4348_v60 = vmax.f32 %v4273_v49, %v4343_v57  ;;  %v7659_v61 = vpop.f32.mrb[115].mxu0  ;;  %v7671_v62 = vpop.f32.mrb[115].mxu1  ;;  %v7937_v49 = vld [vmem:[%s9437_s7 + $0x164] ss:$16 sps:$4 sm:$0xff]   ;;  %v7944_v57 = vld [vmem:[%s9437_s7 + $0x188] ss:$16 sps:$4 sm:$0xff]  }
 0x593   : > { %v7943_v54 = vld [vmem:[%s9437_s7 + $0x184] ss:$16 sps:$4 sm:$0xff]   ;;  %v7947_v61 = vld [vmem:[%s9437_s7 + $0x1a0] ss:$16 sps:$4 sm:$0xff]   ;;  %v7950_v62 = vld [vmem:[%s9437_s7 + $0x1a8] ss:$16 sps:$4 sm:$0xff]  }
 0x594   : > { %v4423_v63 = vmax.f32 %v4348_v60, %v4418_v58  ;;  %v7952_v60 = vld [vmem:[%s9437_s7 + $0x1ac] ss:$16 sps:$4 sm:$0xff]  }
 0x596   : > { %v9022_v1 = vpack.c.bf16 %v4423_v63, %v4422_v59  ;;  %v7949_v59 = vld [vmem:[%s9437_s7 + $0x1a4] ss:$16 sps:$4 sm:$0xff]  }
 0x598   : > { %v9031_v6 = vshrl.u32 %v9022_v1, 16  ;;  %v4653_v16 = vrot.slane %v9022_v1, 1  ;;  %v4883_v24 = vrot.slane %v9022_v1, 2  ;;  %v5113_v34 = vrot.slane %v9022_v1, 3 }
 0x599   : > { %v5343_v43 = vrot.slane %v9022_v1, 4  ;;  %v5573_v53 = vrot.slane %v9022_v1, 5  ;;  %v5803_v63 = vrot.slane %v9022_v1, 6 }
 0x59a   : > { %7089 = vmatmul.mubr.msk.bf16.vlgmr.msra.gmra.mrb[116].mxu0 %vm4457_vm0, %v9031_v6  ;;  %7090 = vmatmul.mubr.msk.bf16.vlgmr.msra.gmra.mrb[116].mxu1 %vm4457_vm0, %v9031_v6  ;;  %v4768_v20 = vrot.slane %v9031_v6, 1  ;;  %v4998_v29 = vrot.slane %v9031_v6, 2  ;;  %v5228_v38 = vrot.slane %v9031_v6, 3  ;;  %v5458_v48 = vrot.slane %v9031_v6, 4 }
 0x59b   : > { %4566 = vmatpush1.bf16.msra.mxu0 %v7875_v3  ;;  %4607 = vmatpush1.bf16.msra.mxu1 %v7878_v5  ;;  %v5688_v58 = vrot.slane %v9031_v6, 5  ;;  %v7955_v3 = vld [vmem:[%s9437_s7 + $0x1c4] ss:$16 sps:$4 sm:$0xff]   ;;  %v7958_v5 = vld [vmem:[%s9437_s7 + $0x1cc] ss:$16 sps:$4 sm:$0xff]  }
 0x59c   : > { %4597 = vmatprep.mubr.bf16.mxu0 %v8061_v0  ;;  %4638 = vmatprep.mubr.bf16.mxu1 %v8061_v0 }
 0x59d   : > { %4677 = vmatprep.subr.bf16.mxu0 %v7883_v7  ;;  %4718 = vmatprep.subr.bf16.mxu1 %v7886_v8  ;;  %v7953_v7 = vld [vmem:[%s9437_s7 + $0x1c0] ss:$16 sps:$4 sm:$0xff]   ;;  %v7956_v8 = vld [vmem:[%s9437_s7 + $0x1c8] ss:$16 sps:$4 sm:$0xff]  }
 0x5a2   : > { %7095 = vmatmul.mubr.msk.bf16.vlgmr.msra.gmra.mrb[120].mxu0 %vm4457_vm0, %v9022_v1  ;;  %7096 = vmatmul.mubr.msk.bf16.vlgmr.msra.gmra.mrb[120].mxu1 %vm4457_vm0, %v9022_v1 }
 0x5a3   : > { %4678 = vmatpush1.bf16.msra.mxu0 %v7881_v9  ;;  %4719 = vmatpush1.bf16.msra.mxu1 %v7884_v10  ;;  %v5918_v9 = vrot.slane %v9031_v6, 6  ;;  %v7961_v10 = vld [vmem:[%s9437_s7 + $0x1e4] ss:$16 sps:$4 sm:$0xff]  }
 0x5a4   : > { %4709 = vmatprep.mubr.bf16.mxu0 %v8061_v0  ;;  %4750 = vmatprep.mubr.bf16.mxu1 %v8061_v0 }
 0x5a5   : > { %4792 = vmatprep.subr.bf16.mxu0 %v7889_v12  ;;  %4833 = vmatprep.subr.bf16.mxu1 %v7892_v13  ;;  %v7964_v12 = vld [vmem:[%s9437_s7 + $0x1ec] ss:$16 sps:$4 sm:$0xff]   ;;  %v7959_v13 = vld [vmem:[%s9437_s7 + $0x1e0] ss:$16 sps:$4 sm:$0xff]  }
 0x5aa   : > { %7105 = vmatmul.mubr.msk.bf16.vlgmr.msra.gmra.mrb[124].mxu0 %vm4457_vm0, %v4653_v16  ;;  %7106 = vmatmul.mubr.msk.bf16.vlgmr.msra.gmra.mrb[124].mxu1 %vm4457_vm0, %v4653_v16  ;;  %v6148_v16 = vrot.slane %v9031_v6, 7  ;;  %v7969_v6 = vld [vmem:[%s9439_s9 + $0x48] sm:$0xff]  }
 0x5ab   : > { %4793 = vmatpush1.bf16.msra.mxu0 %v7887_v14  ;;  %4834 = vmatpush1.bf16.msra.mxu1 %v7890_v15  ;;  %v7962_v14 = vld [vmem:[%s9437_s7 + $0x1e8] ss:$16 sps:$4 sm:$0xff]   ;;  %v6033_v15 = vrot.slane %v9022_v1, 7  ;;  %v7965_v1 = vld [vmem:[%s9439_s9 + $0x40] sm:$0xff]  }
 0x5ac   : > { %4824 = vmatprep.mubr.bf16.mxu0 %v8061_v0  ;;  %4865 = vmatprep.mubr.bf16.mxu1 %v8061_v0 }
 0x5ad   : > { %4907 = vmatprep.subr.bf16.mxu0 %v7895_v17  ;;  %4948 = vmatprep.subr.bf16.mxu1 %v7898_v2  ;;  %v7966_v17 = vld [vmem:[%s9439_s9 + $0xc0] sm:$0xff]  }
 0x5ae   : > { %v7967_v2 = vld [vmem:[%s9439_s9] sm:$0xff]  }
 0x5b2   : > { %7115 = vmatmul.mubr.msk.bf16.vlgmr.msra.gmra.mrb[128].mxu0 %vm4457_vm0, %v4768_v20  ;;  %7116 = vmatmul.mubr.msk.bf16.vlgmr.msra.gmra.mrb[128].mxu1 %vm4457_vm0, %v4768_v20  ;;  %v7972_v20 = vld [vmem:[%s9439_s9 + $0x88] sm:$0xff]  }
 0x5b3   : > { %4908 = vmatpush1.bf16.msra.mxu0 %v7893_v18  ;;  %4949 = vmatpush1.bf16.msra.mxu1 %v7896_v19  ;;  %v7970_v18 = vld [vmem:[%s9439_s9 + $0xc8] sm:$0xff]  }
 0x5b4   : > { %4939 = vmatprep.mubr.bf16.mxu0 %v8061_v0  ;;  %4980 = vmatprep.mubr.bf16.mxu1 %v8061_v0  ;;  %v7971_v19 = vld [vmem:[%s9439_s9 + $0x8] sm:$0xff]  }
 0x5b5   : > { %5022 = vmatprep.subr.bf16.mxu0 %v7901_v4  ;;  %5063 = vmatprep.subr.bf16.mxu1 %v7904_v21  ;;  %v7973_v4 = vld [vmem:[%s9439_s9 + $0x50] sm:$0xff]  }
 0x5b6   : > { %v7974_v21 = vld [vmem:[%s9439_s9 + $0xd0] sm:$0xff]  }
 0x5ba   : > { %7125 = vmatmul.mubr.msk.bf16.vlgmr.msra.gmra.mrb[132].mxu0 %vm4457_vm0, %v4883_v24  ;;  %7126 = vmatmul.mubr.msk.bf16.vlgmr.msra.gmra.mrb[132].mxu1 %vm4457_vm0, %v4883_v24  ;;  %v7977_v24 = vld [vmem:[%s9439_s9 + $0x58] sm:$0xff]  }
 0x5bb   : > { %5023 = vmatpush1.bf16.msra.mxu0 %v7899_v22  ;;  %5064 = vmatpush1.bf16.msra.mxu1 %v7902_v23  ;;  %v7975_v22 = vld [vmem:[%s9439_s9 + $0x10] sm:$0xff]  }
 0x5bc   : > { %5054 = vmatprep.mubr.bf16.mxu0 %v8061_v0  ;;  %5095 = vmatprep.mubr.bf16.mxu1 %v8061_v0  ;;  %v7976_v23 = vld [vmem:[%s9439_s9 + $0x90] sm:$0xff]  }
 0x5bd   : > { %5137 = vmatprep.subr.bf16.mxu0 %v7907_v25  ;;  %5178 = vmatprep.subr.bf16.mxu1 %v7910_v26  ;;  %v7978_v25 = vld [vmem:[%s9439_s9 + $0xd8] sm:$0xff]  }
 0x5be   : > { %v7979_v26 = vld [vmem:[%s9439_s9 + $0x18] sm:$0xff]  }
 0x5c2   : > { %7135 = vmatmul.mubr.msk.bf16.vlgmr.msra.gmra.mrb[136].mxu0 %vm4457_vm0, %v4998_v29  ;;  %7136 = vmatmul.mubr.msk.bf16.vlgmr.msra.gmra.mrb[136].mxu1 %vm4457_vm0, %v4998_v29  ;;  %v7982_v29 = vld [vmem:[%s9439_s9 + $0xe0] sm:$0xff]  }
 0x5c3   : > { %5138 = vmatpush1.bf16.msra.mxu0 %v7905_v27  ;;  %5179 = vmatpush1.bf16.msra.mxu1 %v7908_v28  ;;  %v7980_v27 = vld [vmem:[%s9439_s9 + $0x98] sm:$0xff]   ;;  %v7981_v28 = vld [vmem:[%s9439_s9 + $0x60] sm:$0xff]  }
 0x5c4   : > { %5169 = vmatprep.mubr.bf16.mxu0 %v8061_v0  ;;  %5210 = vmatprep.mubr.bf16.mxu1 %v8061_v0 }
 0x5c5   : > { %5252 = vmatprep.subr.bf16.mxu0 %v7913_v30  ;;  %5293 = vmatprep.subr.bf16.mxu1 %v7916_v31  ;;  %v7983_v30 = vld [vmem:[%s9439_s9 + $0x20] sm:$0xff]  }
 0x5c6   : > { %v7984_v31 = vld [vmem:[%s9439_s9 + $0xa0] sm:$0xff]  }
 0x5ca   : > { %7145 = vmatmul.mubr.msk.bf16.vlgmr.msra.gmra.mrb[140].mxu0 %vm4457_vm0, %v5113_v34  ;;  %7146 = vmatmul.mubr.msk.bf16.vlgmr.msra.gmra.mrb[140].mxu1 %vm4457_vm0, %v5113_v34  ;;  %v7987_v34 = vld [vmem:[%s9439_s9 + $0x28] sm:$0xff]  }
 0x5cb   : > { %5253 = vmatpush1.bf16.msra.mxu0 %v7911_v32  ;;  %5294 = vmatpush1.bf16.msra.mxu1 %v7914_v33  ;;  %v7985_v32 = vld [vmem:[%s9439_s9 + $0x68] sm:$0xff]  }
 0x5cc   : > { %5284 = vmatprep.mubr.bf16.mxu0 %v8061_v0  ;;  %5325 = vmatprep.mubr.bf16.mxu1 %v8061_v0  ;;  %v7986_v33 = vld [vmem:[%s9439_s9 + $0xe8] sm:$0xff]  }
 0x5cd   : > { %5367 = vmatprep.subr.bf16.mxu0 %v7919_v35  ;;  %5408 = vmatprep.subr.bf16.mxu1 %v7922_v36  ;;  %v7988_v35 = vld [vmem:[%s9439_s9 + $0xa8] sm:$0xff]   ;;  %v7989_v36 = vld [vmem:[%s9439_s9 + $0x70] sm:$0xff]  }
 0x5d2   : > { %7155 = vmatmul.mubr.msk.bf16.vlgmr.msra.gmra.mrb[144].mxu0 %vm4457_vm0, %v5228_v38  ;;  %7156 = vmatmul.mubr.msk.bf16.vlgmr.msra.gmra.mrb[144].mxu1 %vm4457_vm0, %v5228_v38  ;;  %v7992_v38 = vld [vmem:[%s9439_s9 + $0xb0] sm:$0xff]  }
 0x5d3   : > { %5368 = vmatpush1.bf16.msra.mxu0 %v7917_v37  ;;  %5409 = vmatpush1.bf16.msra.mxu1 %v7920_v11  ;;  %v7990_v37 = vld [vmem:[%s9439_s9 + $0xf0] sm:$0xff]  }
 0x5d4   : > { %5399 = vmatprep.mubr.bf16.mxu0 %v8061_v0  ;;  %5440 = vmatprep.mubr.bf16.mxu1 %v8061_v0  ;;  %v7991_v11 = vld [vmem:[%s9439_s9 + $0x30] sm:$0xff]  }
 0x5d5   : > { %5482 = vmatprep.subr.bf16.mxu0 %v7925_v39  ;;  %5523 = vmatprep.subr.bf16.mxu1 %v7928_v40  ;;  %v7993_v39 = vld [vmem:[%s9439_s9 + $0x78] sm:$0xff]  }
 0x5d6   : > { %v7994_v40 = vld [vmem:[%s9439_s9 + $0xf8] sm:$0xff]  }
 0x5da   : > { %7165 = vmatmul.mubr.msk.bf16.vlgmr.msra.gmra.mrb[148].mxu0 %vm4457_vm0, %v5343_v43  ;;  %7166 = vmatmul.mubr.msk.bf16.vlgmr.msra.gmra.mrb[148].mxu1 %vm4457_vm0, %v5343_v43 }
 0x5db   : > { %5483 = vmatpush1.bf16.msra.mxu0 %v7923_v41  ;;  %5524 = vmatpush1.bf16.msra.mxu1 %v7926_v42  ;;  %v7995_v41 = vld [vmem:[%s9439_s9 + $0x38] sm:$0xff]  }
 0x5dc   : > { %5514 = vmatprep.mubr.bf16.mxu0 %v8061_v0  ;;  %5555 = vmatprep.mubr.bf16.mxu1 %v8061_v0  ;;  %v7996_v42 = vld [vmem:[%s9439_s9 + $0xb8] sm:$0xff]  }
 0x5dd   : > { %5597 = vmatprep.subr.bf16.mxu0 %v7931_v44  ;;  %5638 = vmatprep.subr.bf16.mxu1 %v7934_v45 }
 0x5e2   : > { %7175 = vmatmul.mubr.msk.bf16.vlgmr.msra.gmra.mrb[152].mxu0 %vm4457_vm0, %v5458_v48  ;;  %7176 = vmatmul.mubr.msk.bf16.vlgmr.msra.gmra.mrb[152].mxu1 %vm4457_vm0, %v5458_v48 }
 0x5e3   : > { %5598 = vmatpush1.bf16.msra.mxu0 %v7929_v46  ;;  %5639 = vmatpush1.bf16.msra.mxu1 %v7932_v47 }
 0x5e4   : > { %5629 = vmatprep.mubr.bf16.mxu0 %v8061_v0  ;;  %5670 = vmatprep.mubr.bf16.mxu1 %v8061_v0 }
 0x5e5   : > { %5712 = vmatprep.subr.bf16.mxu0 %v7937_v49  ;;  %5753 = vmatprep.subr.bf16.mxu1 %v7940_v50 }
 0x5ea   : > { %7185 = vmatmul.mubr.msk.bf16.vlgmr.msra.gmra.mrb[156].mxu0 %vm4457_vm0, %v5573_v53  ;;  %7186 = vmatmul.mubr.msk.bf16.vlgmr.msra.gmra.mrb[156].mxu1 %vm4457_vm0, %v5573_v53 }
 0x5eb   : > { %5713 = vmatpush1.bf16.msra.mxu0 %v7935_v51  ;;  %5754 = vmatpush1.bf16.msra.mxu1 %v7938_v52 }
 0x5ec   : > { %5744 = vmatprep.mubr.bf16.mxu0 %v8061_v0  ;;  %5785 = vmatprep.mubr.bf16.mxu1 %v8061_v0 }
 0x5ed   : > { %5827 = vmatprep.subr.bf16.mxu0 %v7943_v54  ;;  %5868 = vmatprep.subr.bf16.mxu1 %v7946_v55 }
 0x5f2   : > { %7195 = vmatmul.mubr.msk.bf16.vlgmr.msra.gmra.mrb[160].mxu0 %vm4457_vm0, %v5688_v58  ;;  %7196 = vmatmul.mubr.msk.bf16.vlgmr.msra.gmra.mrb[160].mxu1 %vm4457_vm0, %v5688_v58 }
 0x5f3   : > { %5828 = vmatpush1.bf16.msra.mxu0 %v7941_v56  ;;  %5869 = vmatpush1.bf16.msra.mxu1 %v7944_v57 }
 0x5f4   : > { %5859 = vmatprep.mubr.bf16.mxu0 %v8061_v0  ;;  %5900 = vmatprep.mubr.bf16.mxu1 %v8061_v0 }
 0x5f5   : > { %5942 = vmatprep.subr.bf16.mxu0 %v7949_v59  ;;  %5983 = vmatprep.subr.bf16.mxu1 %v7952_v60 }
 0x5fa   : > { %7205 = vmatmul.mubr.msk.bf16.vlgmr.msra.gmra.mrb[164].mxu0 %vm4457_vm0, %v5803_v63  ;;  %7206 = vmatmul.mubr.msk.bf16.vlgmr.msra.gmra.mrb[164].mxu1 %vm4457_vm0, %v5803_v63 }
 0x5fb   : > { %5943 = vmatpush1.bf16.msra.mxu0 %v7947_v61  ;;  %5984 = vmatpush1.bf16.msra.mxu1 %v7950_v62 }
 0x5fc   : > { %5974 = vmatprep.mubr.bf16.mxu0 %v8061_v0  ;;  %6015 = vmatprep.mubr.bf16.mxu1 %v8061_v0 }
 0x5fd   : > { %6057 = vmatprep.subr.bf16.mxu0 %v7955_v3  ;;  %6098 = vmatprep.subr.bf16.mxu1 %v7958_v5 }
 0x602   : > { %7215 = vmatmul.mubr.msk.bf16.vlgmr.msra.gmra.mrb[168].mxu0 %vm4457_vm0, %v5918_v9  ;;  %7216 = vmatmul.mubr.msk.bf16.vlgmr.msra.gmra.mrb[168].mxu1 %vm4457_vm0, %v5918_v9 }
 0x603   : > { %6058 = vmatpush1.bf16.msra.mxu0 %v7953_v7  ;;  %6099 = vmatpush1.bf16.msra.mxu1 %v7956_v8 }
 0x604   : > { %6089 = vmatprep.mubr.bf16.mxu0 %v8061_v0  ;;  %6130 = vmatprep.mubr.bf16.mxu1 %v8061_v0 }
 0x605   : > { %6172 = vmatprep.subr.bf16.mxu0 %v7961_v10  ;;  %6213 = vmatprep.subr.bf16.mxu1 %v7964_v12 }
 0x60a   : > { %7225 = vmatmul.mubr.msk.bf16.vlgmr.msra.gmra.mrb[172].mxu0 %vm4457_vm0, %v6033_v15  ;;  %7226 = vmatmul.mubr.msk.bf16.vlgmr.msra.gmra.mrb[172].mxu1 %vm4457_vm0, %v6033_v15 }
 0x60b   : > { %6173 = vmatpush1.bf16.msra.mxu0 %v7959_v13  ;;  %6214 = vmatpush1.bf16.msra.mxu1 %v7962_v14 }
 0x60c   : > { %6204 = vmatprep.mubr.bf16.mxu0 %v8061_v0  ;;  %6245 = vmatprep.mubr.bf16.mxu1 %v8061_v0  ;;  %v7968_v0 = vld [vmem:[%s9439_s9 + $0x80] sm:$0xff]  }
 0x60d   : > { %7430 = vmatprep.subr.bf16.mxu0 %v7965_v1  ;;  %7452 = vmatprep.subr.bf16.mxu1 %v7966_v17 }
 0x612   : > { %7235 = vmatmul.mubr.msk.bf16.vlgmr.msra.gmra.mrb[176].mxu0 %vm4457_vm0, %v6148_v16  ;;  %7236 = vmatmul.mubr.msk.bf16.vlgmr.msra.gmra.mrb[176].mxu1 %vm4457_vm0, %v6148_v16 }
 0x613   : > { %7431 = vmatpush3.bf16.msra.mxu0 %v7967_v2  ;;  %7453 = vmatpush3.bf16.msra.mxu1 %v7968_v0 }
 0x614   : > { %7432 = vmatprep.subr.bf16.mxu0 %v7969_v6  ;;  %7454 = vmatprep.subr.bf16.mxu1 %v7970_v18 }
 0x617   : > { %7433 = vmatpush3.bf16.msra.mxu0 %v7971_v19  ;;  %7455 = vmatpush3.bf16.msra.mxu1 %v7972_v20 }
 0x618   : > { %7434 = vmatprep.subr.bf16.mxu0 %v7973_v4  ;;  %7456 = vmatprep.subr.bf16.mxu1 %v7974_v21 }
 0x61b   : > { %7435 = vmatpush3.bf16.msra.mxu0 %v7975_v22  ;;  %7457 = vmatpush3.bf16.msra.mxu1 %v7976_v23 }
 0x61c   : > { %7436 = vmatprep.subr.bf16.mxu0 %v7977_v24  ;;  %7458 = vmatprep.subr.bf16.mxu1 %v7978_v25 }
 0x61f   : > { %7437 = vmatpush3.bf16.msra.mxu0 %v7979_v26  ;;  %7459 = vmatpush3.bf16.msra.mxu1 %v7980_v27 }
 0x620   : > { %7438 = vmatprep.subr.bf16.mxu0 %v7981_v28  ;;  %7460 = vmatprep.subr.bf16.mxu1 %v7982_v29 }
 0x623   : > { %7439 = vmatpush3.bf16.msra.mxu0 %v7983_v30  ;;  %7461 = vmatpush3.bf16.msra.mxu1 %v7984_v31 }
 0x624   : > { %7440 = vmatprep.subr.bf16.mxu0 %v7985_v32  ;;  %7462 = vmatprep.subr.bf16.mxu1 %v7986_v33 }
 0x627   : > { %7441 = vmatpush3.bf16.msra.mxu0 %v7987_v34  ;;  %7463 = vmatpush3.bf16.msra.mxu1 %v7988_v35 }
 0x628   : > { %7442 = vmatprep.subr.bf16.mxu0 %v7989_v36  ;;  %7464 = vmatprep.subr.bf16.mxu1 %v7990_v37 }
 0x62b   : > { %7443 = vmatpush3.bf16.msra.mxu0 %v7991_v11  ;;  %7465 = vmatpush3.bf16.msra.mxu1 %v7992_v38 }
 0x62c   : > { %7444 = vmatprep.subr.bf16.mxu0 %v7993_v39  ;;  %7466 = vmatprep.subr.bf16.mxu1 %v7994_v40 }
 0x62f   : > { %7445 = vmatpush3.bf16.msra.mxu0 %v7995_v41  ;;  %7467 = vmatpush3.bf16.msra.mxu1 %v7996_v42 }
 0x66d   : > { %v4495_v43 = vpop.f32.mrb[116].mxu0  ;;  %v4536_v44 = vpop.f32.mrb[116].mxu1 }
 0x66e   : > { %v4497_v45 = vpop.f32.mrb[117].mxu0  ;;  %v4538_v46 = vpop.f32.mrb[117].mxu1 }
 0x66f   : > { %v4499_v47 = vpop.f32.mrb[118].mxu0  ;;  %v4540_v48 = vpop.f32.mrb[118].mxu1 }
 0x670   : > { %v4500_v49 = vpop.f32.mrb[119].mxu0  ;;  %v4541_v50 = vpop.f32.mrb[119].mxu1 }
 0x675   : > { %v4599_v51 = vpop.f32.mrb[120].mxu0  ;;  %v4640_v52 = vpop.f32.mrb[120].mxu1 }
 0x676   : > { %v4600_v53 = vadd.f32 %v4599_v51, %v4495_v43  ;;  %v4641_v54 = vadd.f32 %v4640_v52, %v4536_v44  ;;  %v4601_v55 = vpop.f32.mrb[121].mxu0  ;;  %v4642_v56 = vpop.f32.mrb[121].mxu1 }
 0x677   : > { %v4602_v57 = vadd.f32 %v4601_v55, %v4497_v45  ;;  %v4643_v58 = vadd.f32 %v4642_v56, %v4538_v46  ;;  %v4603_v59 = vpop.f32.mrb[122].mxu0  ;;  %v4644_v60 = vpop.f32.mrb[122].mxu1 }
 0x678   : > { %v4604_v61 = vpop.f32.mrb[123].mxu0  ;;  %v4645_v62 = vpop.f32.mrb[123].mxu1 }
 0x67d   : > { %v4711_v63 = vpop.f32.mrb[124].mxu0  ;;  %v4752_v3 = vpop.f32.mrb[124].mxu1 }
 0x67e   : > { %v4759_v5 = vadd.f32 %v4711_v63, %v4600_v53  ;;  %v4761_v7 = vadd.f32 %v4752_v3, %v4641_v54  ;;  %v4713_v8 = vpop.f32.mrb[125].mxu0  ;;  %v4754_v9 = vpop.f32.mrb[125].mxu1 }
 0x67f   : > { %v4760_v10 = vadd.f32 %v4713_v8, %v4602_v57  ;;  %v4762_v12 = vadd.f32 %v4754_v9, %v4643_v58  ;;  %v4715_v13 = vpop.f32.mrb[126].mxu0  ;;  %v4756_v14 = vpop.f32.mrb[126].mxu1 }
 0x680   : > { %v4716_v15 = vpop.f32.mrb[127].mxu0  ;;  %v4757_v16 = vpop.f32.mrb[127].mxu1 }
 0x685   : > { %v4826_v1 = vpop.f32.mrb[128].mxu0  ;;  %v4867_v17 = vpop.f32.mrb[128].mxu1 }
 0x686   : > { %v4874_v2 = vadd.f32 %v4826_v1, %v4759_v5  ;;  %v4876_v0 = vadd.f32 %v4867_v17, %v4761_v7  ;;  %v4828_v6 = vpop.f32.mrb[129].mxu0  ;;  %v4869_v18 = vpop.f32.mrb[129].mxu1 }
 0x687   : > { %v4875_v19 = vadd.f32 %v4828_v6, %v4760_v10  ;;  %v4877_v20 = vadd.f32 %v4869_v18, %v4762_v12  ;;  %v4830_v4 = vpop.f32.mrb[130].mxu0  ;;  %v4871_v21 = vpop.f32.mrb[130].mxu1 }
 0x688   : > { %v4831_v22 = vpop.f32.mrb[131].mxu0  ;;  %v4872_v23 = vpop.f32.mrb[131].mxu1 }
 0x68d   : > { %v4941_v24 = vpop.f32.mrb[132].mxu0  ;;  %v4982_v25 = vpop.f32.mrb[132].mxu1 }
 0x68e   : > { %v4989_v26 = vadd.f32 %v4941_v24, %v4874_v2  ;;  %v4991_v27 = vadd.f32 %v4982_v25, %v4876_v0  ;;  %v4943_v28 = vpop.f32.mrb[133].mxu0  ;;  %v4984_v29 = vpop.f32.mrb[133].mxu1 }
 0x68f   : > { %v4990_v30 = vadd.f32 %v4943_v28, %v4875_v19  ;;  %v4992_v31 = vadd.f32 %v4984_v29, %v4877_v20  ;;  %v4945_v32 = vpop.f32.mrb[134].mxu0  ;;  %v4986_v33 = vpop.f32.mrb[134].mxu1 }
 0x690   : > { %v4946_v34 = vpop.f32.mrb[135].mxu0  ;;  %v4987_v35 = vpop.f32.mrb[135].mxu1 }
 0x695   : > { %v5056_v36 = vpop.f32.mrb[136].mxu0  ;;  %v5097_v37 = vpop.f32.mrb[136].mxu1 }
 0x696   : > { %v5104_v11 = vadd.f32 %v5056_v36, %v4989_v26  ;;  %v5106_v38 = vadd.f32 %v5097_v37, %v4991_v27  ;;  %v5058_v39 = vpop.f32.mrb[137].mxu0  ;;  %v5099_v40 = vpop.f32.mrb[137].mxu1 }
 0x697   : > { %v5105_v41 = vadd.f32 %v5058_v39, %v4990_v30  ;;  %v5107_v42 = vadd.f32 %v5099_v40, %v4992_v31  ;;  %v5060_v43 = vpop.f32.mrb[138].mxu0  ;;  %v5101_v44 = vpop.f32.mrb[138].mxu1 }
 0x698   : > { %v5061_v45 = vpop.f32.mrb[139].mxu0  ;;  %v5102_v46 = vpop.f32.mrb[139].mxu1 }
 0x69d   : > { %v5171_v47 = vpop.f32.mrb[140].mxu0  ;;  %v5212_v48 = vpop.f32.mrb[140].mxu1 }
 0x69e   : > { %v5219_v49 = vadd.f32 %v5171_v47, %v5104_v11  ;;  %v5221_v50 = vadd.f32 %v5212_v48, %v5106_v38  ;;  %v5173_v51 = vpop.f32.mrb[141].mxu0  ;;  %v5214_v52 = vpop.f32.mrb[141].mxu1 }
 0x69f   : > { %v5220_v53 = vadd.f32 %v5173_v51, %v5105_v41  ;;  %v5222_v54 = vadd.f32 %v5214_v52, %v5107_v42  ;;  %v5175_v55 = vpop.f32.mrb[142].mxu0  ;;  %v5216_v56 = vpop.f32.mrb[142].mxu1 }
 0x6a0   : > { %v5176_v57 = vpop.f32.mrb[143].mxu0  ;;  %v5217_v58 = vpop.f32.mrb[143].mxu1 }
 0x6a5   : > { %v5286_v59 = vpop.f32.mrb[144].mxu0  ;;  %v5327_v60 = vpop.f32.mrb[144].mxu1 }
 0x6a6   : > { %v5334_v61 = vadd.f32 %v5286_v59, %v5219_v49  ;;  %v5336_v62 = vadd.f32 %v5327_v60, %v5221_v50  ;;  %v5288_v63 = vpop.f32.mrb[145].mxu0  ;;  %v5329_v3 = vpop.f32.mrb[145].mxu1 }
 0x6a7   : > { %v5335_v5 = vadd.f32 %v5288_v63, %v5220_v53  ;;  %v5337_v7 = vadd.f32 %v5329_v3, %v5222_v54  ;;  %v5290_v8 = vpop.f32.mrb[146].mxu0  ;;  %v5331_v9 = vpop.f32.mrb[146].mxu1 }
 0x6a8   : > { %v5291_v10 = vpop.f32.mrb[147].mxu0  ;;  %v5332_v12 = vpop.f32.mrb[147].mxu1 }
 0x6ad   : > { %v5401_v13 = vpop.f32.mrb[148].mxu0  ;;  %v5442_v14 = vpop.f32.mrb[148].mxu1 }
 0x6ae   : > { %v5449_v15 = vadd.f32 %v5401_v13, %v5334_v61  ;;  %v5451_v16 = vadd.f32 %v5442_v14, %v5336_v62  ;;  %v5403_v1 = vpop.f32.mrb[149].mxu0  ;;  %v5444_v17 = vpop.f32.mrb[149].mxu1 }
 0x6af   : > { %v5450_v2 = vadd.f32 %v5403_v1, %v5335_v5  ;;  %v5452_v0 = vadd.f32 %v5444_v17, %v5337_v7  ;;  %v5405_v6 = vpop.f32.mrb[150].mxu0  ;;  %v5446_v18 = vpop.f32.mrb[150].mxu1 }
 0x6b0   : > { %v5406_v19 = vpop.f32.mrb[151].mxu0  ;;  %v5447_v20 = vpop.f32.mrb[151].mxu1  ;;  %v6260_v6 = vlaneseq }
 0x6b2   : > { %v6261_v18 = vshrl.u32 %v6260_v6, 7 }
 0x6b5   : > { %v5516_v4 = vpop.f32.mrb[152].mxu0  ;;  %v5557_v21 = vpop.f32.mrb[152].mxu1 }
 0x6b6   : > { %v5564_v22 = vadd.f32 %v5516_v4, %v5449_v15  ;;  %v5566_v23 = vadd.f32 %v5557_v21, %v5451_v16  ;;  %v5518_v24 = vpop.f32.mrb[153].mxu0  ;;  %v5559_v25 = vpop.f32.mrb[153].mxu1 }
 0x6b7   : > { %v5565_v26 = vadd.f32 %v5518_v24, %v5450_v2  ;;  %v5567_v27 = vadd.f32 %v5559_v25, %v5452_v0  ;;  %v5520_v28 = vpop.f32.mrb[154].mxu0  ;;  %v5561_v29 = vpop.f32.mrb[154].mxu1 }
 0x6b8   : > { %v5521_v30 = vpop.f32.mrb[155].mxu0  ;;  %v5562_v31 = vpop.f32.mrb[155].mxu1 }
 0x6b9   : > { %v6262_v30 = vsub.s32 0, %v6261_v18  ;;  %v6270_v31 = vsub.s32 2, %v6261_v18 }
 0x6bd   : > { %v5631_v32 = vpop.f32.mrb[156].mxu0  ;;  %v5672_v33 = vpop.f32.mrb[156].mxu1 }
 0x6be   : > { %v5679_v34 = vadd.f32 %v5631_v32, %v5564_v22  ;;  %v5681_v35 = vadd.f32 %v5672_v33, %v5566_v23  ;;  %v5633_v36 = vpop.f32.mrb[157].mxu0  ;;  %v5674_v37 = vpop.f32.mrb[157].mxu1  ;;  %v6258_v32 = vld [vmem:[%s9438_s8] sm:$0xf]  ;;  %v6266_v33 = vsub.s32 1, %v6261_v18 }
 0x6bf   : > { %v5680_v11 = vadd.f32 %v5633_v36, %v5565_v26  ;;  %v5682_v38 = vadd.f32 %v5674_v37, %v5567_v27  ;;  %v5635_v39 = vpop.f32.mrb[158].mxu0  ;;  %v5676_v40 = vpop.f32.mrb[158].mxu1  ;;  %v6271_v36 = vrot.slane %v6258_v32, %v6270_v31 }
 0x6c0   : > { %v5636_v41 = vpop.f32.mrb[159].mxu0  ;;  %v5677_v42 = vpop.f32.mrb[159].mxu1 }
 0x6c5   : > { %v5746_v43 = vpop.f32.mrb[160].mxu0  ;;  %v5787_v44 = vpop.f32.mrb[160].mxu1 }
 0x6c6   : > { %v5794_v45 = vadd.f32 %v5746_v43, %v5679_v34  ;;  %v5796_v46 = vadd.f32 %v5787_v44, %v5681_v35  ;;  %v5748_v47 = vpop.f32.mrb[161].mxu0  ;;  %v5789_v48 = vpop.f32.mrb[161].mxu1  ;;  %v6274_v34 = vsub.s32 3, %v6261_v18  ;;  %v6263_v35 = vrot.slane %v6258_v32, %v6262_v30 }
 0x6c7   : > { %v5795_v49 = vadd.f32 %v5748_v47, %v5680_v11  ;;  %v5797_v50 = vadd.f32 %v5789_v48, %v5682_v38  ;;  %v5750_v51 = vpop.f32.mrb[162].mxu0  ;;  %v5791_v52 = vpop.f32.mrb[162].mxu1  ;;  %v6267_v38 = vrot.slane %v6258_v32, %v6266_v33 }
 0x6c8   : > { %v5751_v53 = vpop.f32.mrb[163].mxu0  ;;  %v5792_v54 = vpop.f32.mrb[163].mxu1  ;;  %v6275_v39 = vrot.slane %v6258_v32, %v6274_v34 }
 0x6cd   : > { %v5861_v55 = vpop.f32.mrb[164].mxu0  ;;  %v5902_v56 = vpop.f32.mrb[164].mxu1 }
 0x6ce   : > { %v5909_v57 = vadd.f32 %v5861_v55, %v5794_v45  ;;  %v5911_v58 = vadd.f32 %v5902_v56, %v5796_v46  ;;  %v5863_v59 = vpop.f32.mrb[165].mxu0  ;;  %v5904_v60 = vpop.f32.mrb[165].mxu1 }
 0x6cf   : > { %v5910_v61 = vadd.f32 %v5863_v59, %v5795_v49  ;;  %v5912_v62 = vadd.f32 %v5904_v60, %v5797_v50  ;;  %v5865_v63 = vpop.f32.mrb[166].mxu0  ;;  %v5906_v3 = vpop.f32.mrb[166].mxu1 }
 0x6d0   : > { %v5866_v5 = vpop.f32.mrb[167].mxu0  ;;  %v5907_v7 = vpop.f32.mrb[167].mxu1  ;;  %v6356_v3 = vld [vmem:[%s9440_s10] sm:$0x1] }
 0x6d5   : > { %v5976_v8 = vpop.f32.mrb[168].mxu0  ;;  %v6017_v9 = vpop.f32.mrb[168].mxu1 }
 0x6d6   : > { %v6024_v10 = vadd.f32 %v5976_v8, %v5909_v57  ;;  %v6026_v12 = vadd.f32 %v6017_v9, %v5911_v58  ;;  %v5978_v13 = vpop.f32.mrb[169].mxu0  ;;  %v6019_v14 = vpop.f32.mrb[169].mxu1 }
 0x6d7   : > { %v6025_v15 = vadd.f32 %v5978_v13, %v5910_v61  ;;  %v6027_v16 = vadd.f32 %v6019_v14, %v5912_v62  ;;  %v5980_v1 = vpop.f32.mrb[170].mxu0  ;;  %v6021_v17 = vpop.f32.mrb[170].mxu1 }
 0x6d8   : > { %v5981_v2 = vpop.f32.mrb[171].mxu0  ;;  %v6022_v0 = vpop.f32.mrb[171].mxu1 }
 0x6dd   : > { %v6091_v19 = vpop.f32.mrb[172].mxu0  ;;  %v6132_v20 = vpop.f32.mrb[172].mxu1 }
 0x6de   : > { %v6139_v4 = vadd.f32 %v6091_v19, %v6024_v10  ;;  %v6141_v21 = vadd.f32 %v6132_v20, %v6026_v12  ;;  %v6093_v22 = vpop.f32.mrb[173].mxu0  ;;  %v6134_v23 = vpop.f32.mrb[173].mxu1 }
 0x6df   : > { %v6140_v24 = vadd.f32 %v6093_v22, %v6025_v15  ;;  %v6142_v25 = vadd.f32 %v6134_v23, %v6027_v16  ;;  %v6095_v26 = vpop.f32.mrb[174].mxu0  ;;  %v6136_v27 = vpop.f32.mrb[174].mxu1 }
 0x6e0   : > { %v6096_v28 = vpop.f32.mrb[175].mxu0  ;;  %v6137_v29 = vpop.f32.mrb[175].mxu1 }
 0x6e5   : > { %v6206_v37 = vpop.f32.mrb[176].mxu0  ;;  %v6247_v11 = vpop.f32.mrb[176].mxu1 }
 0x6e6   : > { %v6254_v40 = vadd.f32 %v6206_v37, %v6139_v4  ;;  %v6256_v41 = vadd.f32 %v6247_v11, %v6141_v21  ;;  %v6208_v42 = vpop.f32.mrb[177].mxu0  ;;  %v6249_v43 = vpop.f32.mrb[177].mxu1 }
 0x6e7   : > { %v6255_v44 = vadd.f32 %v6208_v42, %v6140_v24  ;;  %v6257_v45 = vadd.f32 %v6249_v43, %v6142_v25  ;;  %v6210_v46 = vpop.f32.mrb[178].mxu0  ;;  %v6251_v47 = vpop.f32.mrb[178].mxu1 }
 0x6e8   : > { %v6280_v48 = vadd.f32 %v6263_v35, %v6254_v40  ;;  %v6282_v49 = vadd.f32 %v6271_v36, %v6256_v41  ;;  %v6211_v50 = vpop.f32.mrb[179].mxu0  ;;  %v6252_v51 = vpop.f32.mrb[179].mxu1 }
 0x6e9   : > { %v6281_v52 = vadd.f32 %v6267_v38, %v6255_v44  ;;  %v6283_v53 = vadd.f32 %v6275_v39, %v6257_v45 }
 0x6ea   : > { %v6284_v54 = vmax.f32 %v6280_v48, 0.0  ;;  %v6286_v55 = vmax.f32 %v6282_v49, 0.0 }
 0x6eb   : > { %v6285_v56 = vmax.f32 %v6281_v52, 0.0  ;;  %v6287_v57 = vmax.f32 %v6283_v53, 0.0 }
 0x6ec   : > { %v6288_v60 = vpack.c.bf16 %v6284_v54, %v6284_v54  ;;  %v6290_v61 = vpack.c.bf16 %v6286_v55, %v6286_v55 }
 0x6ed   : > { %v6289_v58 = vpack.c.bf16 %v6285_v56, %v6285_v56  ;;  %v6291_v59 = vpack.c.bf16 %v6287_v57, %v6287_v57 }
 0x6ef   : > { %6581 = vmatprep.mubr.bf16.mxu0 %v6289_v58  ;;  %6621 = vmatprep.mubr.bf16.mxu1 %v6291_v59 }
 0x6f0   : > { %6582 = vmatmul.mubr.bf16.vlgmr.msra.gmra.mrb[180].mxu0 %v6288_v60  ;;  %6622 = vmatmul.mubr.bf16.vlgmr.msra.gmra.mrb[180].mxu1 %v6290_v61 }
 0x7c3   : > { %v7446_v62 = vpop.f32.mrb[180].mxu0  ;;  %v7468_v63 = vpop.f32.mrb[180].mxu1 }
 0x7c4   : > { %v7447_v5 = vpop.f32.mrb[181].mxu0  ;;  %v7469_v7 = vpop.f32.mrb[181].mxu1 }
 0x7c5   : > { %v7448_v8 = vadd.f32 %v7447_v5, %v7446_v62  ;;  %v7470_v9 = vadd.f32 %v7469_v7, %v7468_v63  ;;  %v7449_v10 = vpop.f32.mrb[182].mxu0  ;;  %v7471_v12 = vpop.f32.mrb[182].mxu1 }
 0x7c6   : > { %v7450_v13 = vpop.f32.mrb[183].mxu0  ;;  %v7472_v14 = vpop.f32.mrb[183].mxu1 }
 0x7c7   : > { %v6584_v15 = vadd.f32 %v7448_v8, %v6356_v3 }
 0x7c9   : > { %v6624_v16 = vadd.f32 %v7470_v9, %v6584_v15 }
 0x7cb   : > { %6630 = vst.msk [vmem:[%s378_s16] sm:$0x1] %vm6629_vm1, %v6624_v16 }
 0x7cc   : > { %8010 = shalt.err (!%p8007_p3)
}
 0x7cd   : > { %s8011_s14 = scalar_lea.hbm %s9388_s22, 16  ;;  %s8015_s16 = scalar_lea.hbm %s9441_s11, 32 }
 0x7ce   : > { %p8012_p4 = scmp.ne.s32.totalorder %s9388_s22, %s8011_s14  ;;  %p8016_p9 = scmp.lt.u32.totalorder %s9388_s22, %s9441_s11 }
 0x7cf   : > { %p8017_p10 = scmp.lt.u32.totalorder %s8015_s16, %s8011_s14  ;;  %p8019_p12 = scmp.lt.u32.totalorder %s8011_s14, %s9388_s22 }
 0x7d0   : > { %p8013_p7 = pnand %p8012_p4, %p8203_p5 }
 0x7d1   : > { %p8018_p11 = por %p8017_p10, %p8016_p9 }
 0x7d2   : > { %p8014_p8 = pneg %p8013_p7 }
 0x7d3   : > { %p8020_p13 = por %p8019_p12, %p8018_p11 }
 0x7d5   : > { %p8021_p0 = pnand %p8020_p13, %p8014_p8 }
 0x7d7   : > { %8024 = shalt.err (!%p8021_p0)
}
 0x7d8   : > { %7677 = dma.vmem_to_hbm [thread:$0]  (%p8203_p5), %s9390_s25, 16, %s9388_s22, %s6632_s13  }
 0x7d9 PF: > { %p7683_p1 = scmp.ge.s32.totalorder %s8059_s20, 2  ;;  %s6656_s30 = sand.u32 1, %s8047_s17  }
 0x7da   : > { %s6657_s21 = scalar_lea.sflag [#allocation3], %s6656_s30 }
 0x7db   : > { %p7680_p2 = pnand %p7683_p1, %p8207_p6 }
 0x7dd   : > { %8042 = dma.done.wait (!%p7680_p2), %s6657_s21, 16  }
 0x7de   : > { %8044 = vsyncadd (!%p7680_p2), %s6657_s21, 4294967280  ;;  %p21_p3 = scmp.ge.s32.totalorder %s8190_s23, 4   ;;  %s9464_s17 = smov %s8051_s18 }
 0x7df   : > { %s9465_s18 = smov %s8055_s19  ;;  %s9466_s19 = smov %s8201_s26 }
 0x7e0   : > { %s9467_s20 = smov %s8190_s23  ;;  %23 = sbr.rel (!%p21_p3) target bundleno = 6 (0x6), region = 168 }
 0x7e7   :  { %6661 = vsyncpa [#allocation3], 1 }
 0x7e8   :  { %6663 = vsyncpa [#allocation3 + $0x1], 1 }

</bundles_post_ra>
